<compile_context>
chip_gen: v7x
topology: tpu7x:2x2x1
jax: 0.10.0
libtpu: 0.0.40
codegen_flags: <defaults>
</compile_context>

<pallas_src>
import functools

import jax
import jax.numpy as jnp
from jax import lax
from jax.experimental import pallas as pl
from jax.experimental.pallas import tpu as pltpu


def _dw_then_conv_kernel(x_ref, wdw_ref, wn_ref, b_ref, o_ref, *scratch,
                         ksz_h, ksz_w, stride, dilation, pad,
                         h, w, hd, wd, ho, wo, c, o_pad):
    # x_ref:   (1, H, W, C)        unpadded input block
    # wdw_ref: (KH, KW, C)         depthwise weights (f32, pre-cast in wrapper)
    # wn_ref:  (KH*KW*C, O_pad)    normal conv weights (im2col layout, MXU dtype)
    # b_ref:   (1, O_pad)          bias (f32)
    # o_ref:   (1, Ho, Wo, O_pad)  output block (lane-dense)
    # scratch: [xs_ref (H+2p, W+2p, C)]   only if pad > 0
    #          dwp_ref (Hd+2p, Wd+2p, C)  padded depthwise output (MXU dtype)
    if pad > 0:
        xs_ref, dwp_ref = scratch
    else:
        (dwp_ref,) = scratch

    # --- stage input with a zero halo (pad on-chip; only thin strips zeroed,
    #     every step, so it stays correct when the batch axis is core-sharded) ---
    if pad > 0:
        zr = jnp.zeros((pad, w + 2 * pad, c), xs_ref.dtype)
        zc = jnp.zeros((h + 2 * pad, pad, c), xs_ref.dtype)
        xs_ref[0:pad, :, :] = zr
        xs_ref[pad + h:pad + h + pad, :, :] = zr
        xs_ref[:, 0:pad, :] = zc
        xs_ref[:, pad + w:pad + w + pad, :] = zc
        xs_ref[pad:pad + h, pad:pad + w, :] = x_ref[0]

    # --- depthwise conv (stride=1, dilation=1, groups=C, no bias) on the VPU ---
    wdw = wdw_ref[...]                                  # (KH, KW, C), tiny
    dw = jnp.zeros((hd, wd, c), jnp.float32)
    for kh in range(ksz_h):
        for kw in range(ksz_w):
            if pad > 0:
                xwin = xs_ref[kh:kh + hd, kw:kw + wd, :]
            else:
                xwin = x_ref[0, kh:kh + hd, kw:kw + wd, :]
            dw = dw + xwin.astype(jnp.float32) * wdw[kh, kw]

    # --- padded depthwise output for the normal conv (halo strips only) ---
    if pad > 0:
        zr = jnp.zeros((pad, wd + 2 * pad, c), dwp_ref.dtype)
        zc = jnp.zeros((hd + 2 * pad, pad, c), dwp_ref.dtype)
        dwp_ref[0:pad, :, :] = zr
        dwp_ref[pad + hd:pad + hd + pad, :, :] = zr
        dwp_ref[:, 0:pad, :] = zc
        dwp_ref[:, pad + wd:pad + wd + pad, :] = zc
    dwp_ref[pad:pad + hd, pad:pad + wd, :] = dw.astype(dwp_ref.dtype)

    # --- normal conv: single fused im2col matmul on the MXU ---
    taps = []
    for kh in range(ksz_h):
        for kw in range(ksz_w):
            h0 = kh * dilation
            w0 = kw * dilation
            h1 = h0 + (ho - 1) * stride + 1
            w1 = w0 + (wo - 1) * stride + 1
            win = dwp_ref[h0:h1, w0:w1, :]              # load only the window
            if stride != 1:
                win = win[::stride, ::stride, :]
            taps.append(win)                            # (Ho, Wo, C)
    patch = jnp.concatenate(taps, axis=-1)              # (Ho, Wo, KH*KW*C)
    patch = patch.reshape(ho * wo, ksz_h * ksz_w * c)
    acc = jnp.dot(patch, wn_ref[...],
                  preferred_element_type=jnp.float32)   # (Ho*Wo, O_pad), f32 acc
    acc = acc + b_ref[...]                              # (1, O_pad) broadcast
    o_ref[0] = acc.reshape(ho, wo, o_pad).astype(o_ref.dtype)


def depthwise_and_conv2d(x_nchw, w_dw, w_n, bias=None, *, stride=1, padding=0,
                         dilation=1, mxu_dtype=jnp.float32):
    n, c, h, w = x_nchw.shape
    o, c2, kh, kw = w_n.shape
    assert c2 == c and w_dw.shape == (c, 1, kh, kw)
    if bias is None:
        bias = jnp.zeros((o,), x_nchw.dtype)
    assert bias.shape == (o,)

    # Depthwise output size (module fixes stride=1, dilation=1, same padding).
    hd = h + 2 * padding - kh + 1
    wd = w + 2 * padding - kw + 1
    # Normal conv output size.
    ho = (hd + 2 * padding - dilation * (kh - 1) - 1) // stride + 1
    wo = (wd + 2 * padding - dilation * (kw - 1) - 1) // stride + 1

    # Lane-dense output: pad O up to a multiple of 128 (unmasked stores, full
    # MXU columns); the pad is sliced off after the kernel.
    o_pad = ((o + 127) // 128) * 128

    # Weight / bias prep hoisted out of the kernel (weights are grid-invariant
    # and stay resident in VMEM): NCHW->NHWC, im2col weight layout, dtype casts.
    x_nhwc = jnp.transpose(x_nchw, (0, 2, 3, 1))                        # (N,H,W,C)
    wdw_k = jnp.transpose(w_dw[:, 0], (1, 2, 0)).astype(jnp.float32)    # (KH,KW,C)
    wn_k = jnp.transpose(w_n, (2, 3, 1, 0)).reshape(kh * kw * c, o)     # (KH*KW*C,O)
    wn_k = jnp.pad(wn_k, ((0, 0), (0, o_pad - o))).astype(mxu_dtype)
    b_k = jnp.pad(bias.astype(jnp.float32), (0, o_pad - o)).reshape(1, o_pad)

    kernel = functools.partial(
        _dw_then_conv_kernel,
        ksz_h=kh, ksz_w=kw, stride=stride, dilation=dilation, pad=padding,
        h=h, w=w, hd=hd, wd=wd, ho=ho, wo=wo, c=c, o_pad=o_pad)

    scratch_shapes = []
    if padding > 0:
        scratch_shapes.append(
            pltpu.VMEM((h + 2 * padding, w + 2 * padding, c), x_nhwc.dtype))
    scratch_shapes.append(
        pltpu.VMEM((hd + 2 * padding, wd + 2 * padding, c), mxu_dtype))

    # Explicit VMEM budget: double-buffered in/out blocks + resident weights +
    # scratch (+ in-flight im2col/acc), clamped to stay within v7x's 64 MiB.
    x_bytes = x_nhwc.dtype.itemsize
    m_bytes = jnp.dtype(mxu_dtype).itemsize
    ws = (2 * h * w * c * x_bytes
          + (h + 2 * padding) * (w + 2 * padding) * c * x_bytes
          + (hd + 2 * padding) * (wd + 2 * padding) * c * (m_bytes + 4)
          + kh * kw * c * o_pad * m_bytes
          + ho * wo * kh * kw * c * m_bytes
          + ho * wo * o_pad * (4 + 2 * x_bytes))
    vmem_limit = int(min(48 * 2 ** 20, max(32 * 2 ** 20, 2 * ws)))

    out_nhwc = pl.pallas_call(
        kernel,
        out_shape=jax.ShapeDtypeStruct((n, ho, wo, o_pad), x_nchw.dtype),
        grid_spec=pltpu.PrefetchScalarGridSpec(
            num_scalar_prefetch=0,
            grid=(n,),
            in_specs=[
                pl.BlockSpec((1, h, w, c), lambda b: (b, 0, 0, 0)),
                pl.BlockSpec((kh, kw, c), lambda b: (0, 0, 0)),
                pl.BlockSpec((kh * kw * c, o_pad), lambda b: (0, 0)),
                pl.BlockSpec((1, o_pad), lambda b: (0, 0)),
            ],
            out_specs=pl.BlockSpec((1, ho, wo, o_pad), lambda b: (b, 0, 0, 0)),
            scratch_shapes=scratch_shapes,
        ),
        compiler_params=pltpu.CompilerParams(
            dimension_semantics=("parallel",),      # batch elements independent
            vmem_limit_bytes=vmem_limit),
    )(x_nhwc, wdw_k, wn_k, b_k)

    # Drop the O padding, back to NCHW.
    return jnp.transpose(out_nhwc[..., :o], (0, 3, 1, 2))


def _reference(x, w_dw, w_n, bias, *, stride, padding, dilation):
    c = x.shape[1]
    o = w_n.shape[0]
    dw = lax.conv_general_dilated(
        x, w_dw, window_strides=(1, 1),
        padding=[(padding, padding), (padding, padding)],
        feature_group_count=c,
        dimension_numbers=('NCHW', 'OIHW', 'NCHW'))
    out = lax.conv_general_dilated(
        dw, w_n, window_strides=(stride, stride),
        padding=[(padding, padding), (padding, padding)],
        rhs_dilation=(dilation, dilation),
        dimension_numbers=('NCHW', 'OIHW', 'NCHW'))
    return out + bias.reshape(1, o, 1, 1)


if __name__ == "__main__":
    # Small deterministic config consistent with the module's forward.
    N, C, O, H, W = 2, 4, 8, 16, 16
    K = 3

    key = jax.random.PRNGKey(0)
    kx, kdw, kwn, kb = jax.random.split(key, 4)
    x = jax.random.normal(kx, (N, C, H, W), jnp.float32)
    w_dw = jax.random.normal(kdw, (C, 1, K, K), jnp.float32) * 0.2   # depthwise, groups=C
    w_n = jax.random.normal(kwn, (O, C, K, K), jnp.float32) * 0.2    # normal conv weight
    bias = jax.random.normal(kb, (O,), jnp.float32) * 0.1            # normal conv bias

    # f32 MXU path (exact vs. the XLA reference).
    for cfg in (dict(stride=1, padding=1, dilation=1),
                dict(stride=2, padding=1, dilation=1)):
        out = depthwise_and_conv2d(x, w_dw, w_n, bias, **cfg)
        out = jax.block_until_ready(out)
        ref = _reference(x, w_dw, w_n, bias, **cfg)
        assert out.shape == ref.shape, (cfg, out.shape, ref.shape)
        err = float(jnp.max(jnp.abs(out - ref)))
        assert jnp.allclose(out, ref, atol=1e-4, rtol=1e-4), (cfg, err)

    # bf16 MXU operands (v6e/v7x fast path), f32 accumulation -> looser check.
    out_bf = depthwise_and_conv2d(x, w_dw, w_n, bias, stride=1, padding=1,
                                  dilation=1, mxu_dtype=jnp.bfloat16)
    out_bf = jax.block_until_ready(out_bf)
    ref = _reference(x, w_dw, w_n, bias, stride=1, padding=1, dilation=1)
    assert jnp.allclose(out_bf, ref, atol=1e-1, rtol=1e-1), \
        float(jnp.max(jnp.abs(out_bf - ref)))

    print("KERNEL_OK")
</pallas_src>

<mosaic_0001>
module attributes {stable_mosaic.version = 11 : i64} {
  func.func @_dw_then_conv_kernel(%arg0: i32, %arg1: memref<1x16x16x4xf32, #tpu.memory_space<vmem>>, %arg2: memref<3x3x4xf32, #tpu.memory_space<vmem>>, %arg3: memref<36x128xf32, #tpu.memory_space<vmem>>, %arg4: memref<1x128xf32, #tpu.memory_space<vmem>>, %arg5: memref<1x16x16x128xf32, #tpu.memory_space<vmem>>, %arg6: memref<18x18x4xf32, #tpu.memory_space<vmem>>, %arg7: memref<18x18x4xf32, #tpu.memory_space<vmem>>) attributes {dimension_semantics = [#tpu.dimension_semantics<parallel>], iteration_bounds = array<i64: 2>, scalar_prefetch = 0 : i64, scratch_operands = 2 : i64, tpu.core_type = #tpu.core_type<tc>, window_params = [{transform_indices = @transform_0, window_bounds = array<i64: 1, 16, 16, 4>}, {pipeline_mode = #tpu.pipeline_mode<synchronous>, transform_indices = @transform_1, window_bounds = array<i64: 3, 3, 4>}, {pipeline_mode = #tpu.pipeline_mode<synchronous>, transform_indices = @transform_2, window_bounds = array<i64: 36, 128>}, {pipeline_mode = #tpu.pipeline_mode<synchronous>, transform_indices = @transform_3, window_bounds = array<i64: 1, 128>}, {transform_indices = @transform_4, window_bounds = array<i64: 1, 16, 16, 128>}]} {
    %cst = arith.constant 0.000000e+00 : f32
    %0 = vector.broadcast %cst : f32 to vector<1x18x4xf32>
    %cst_0 = arith.constant 0.000000e+00 : f32
    %1 = vector.broadcast %cst_0 : f32 to vector<18x1x4xf32>
    %c0 = arith.constant 0 : index
    %c0_1 = arith.constant 0 : index
    %c0_2 = arith.constant 0 : index
    %2 = vector.load %arg6[%c0, %c0_1, %c0_2] : memref<18x18x4xf32, #tpu.memory_space<vmem>>, vector<1x18x4xf32>
    tpu.vector_store %arg6[%c0, %c0_1, %c0_2], %0 {strides = array<i32>} : memref<18x18x4xf32, #tpu.memory_space<vmem>>, vector<1x18x4xf32>,
    %c17 = arith.constant 17 : index
    %c0_3 = arith.constant 0 : index
    %c0_4 = arith.constant 0 : index
    %3 = vector.load %arg6[%c17, %c0_3, %c0_4] : memref<18x18x4xf32, #tpu.memory_space<vmem>>, vector<1x18x4xf32>
    tpu.vector_store %arg6[%c17, %c0_3, %c0_4], %0 {strides = array<i32>} : memref<18x18x4xf32, #tpu.memory_space<vmem>>, vector<1x18x4xf32>,
    %c0_5 = arith.constant 0 : index
    %c0_6 = arith.constant 0 : index
    %c0_7 = arith.constant 0 : index
    %4 = vector.load %arg6[%c0_5, %c0_6, %c0_7] : memref<18x18x4xf32, #tpu.memory_space<vmem>>, vector<18x1x4xf32>
    tpu.vector_store %arg6[%c0_5, %c0_6, %c0_7], %1 {strides = array<i32>} : memref<18x18x4xf32, #tpu.memory_space<vmem>>, vector<18x1x4xf32>,
    %c0_8 = arith.constant 0 : index
    %c17_9 = arith.constant 17 : index
    %c0_10 = arith.constant 0 : index
    %5 = vector.load %arg6[%c0_8, %c17_9, %c0_10] : memref<18x18x4xf32, #tpu.memory_space<vmem>>, vector<18x1x4xf32>
    tpu.vector_store %arg6[%c0_8, %c17_9, %c0_10], %1 {strides = array<i32>} : memref<18x18x4xf32, #tpu.memory_space<vmem>>, vector<18x1x4xf32>,
    %c0_11 = arith.constant 0 : index
    %c0_12 = arith.constant 0 : index
    %c0_13 = arith.constant 0 : index
    %c0_14 = arith.constant 0 : index
    %6 = vector.load %arg1[%c0_11, %c0_12, %c0_13, %c0_14] : memref<1x16x16x4xf32, #tpu.memory_space<vmem>>, vector<1x16x16x4xf32>
    %7 = vector.shape_cast %6 : vector<1x16x16x4xf32> to vector<16x16x4xf32>
    %c1 = arith.constant 1 : index
    %c1_15 = arith.constant 1 : index
    %c0_16 = arith.constant 0 : index
    %8 = vector.load %arg6[%c1, %c1_15, %c0_16] : memref<18x18x4xf32, #tpu.memory_space<vmem>>, vector<16x16x4xf32>
    tpu.vector_store %arg6[%c1, %c1_15, %c0_16], %7 {strides = array<i32>} : memref<18x18x4xf32, #tpu.memory_space<vmem>>, vector<16x16x4xf32>,
    %c0_17 = arith.constant 0 : index
    %c0_18 = arith.constant 0 : index
    %c0_19 = arith.constant 0 : index
    %9 = vector.load %arg2[%c0_17, %c0_18, %c0_19] : memref<3x3x4xf32, #tpu.memory_space<vmem>>, vector<3x3x4xf32>
    %cst_20 = arith.constant 0.000000e+00 : f32
    %10 = vector.broadcast %cst_20 : f32 to vector<16x16x4xf32>
    %c0_21 = arith.constant 0 : index
    %c0_22 = arith.constant 0 : index
    %c0_23 = arith.constant 0 : index
    %11 = vector.load %arg6[%c0_21, %c0_22, %c0_23] : memref<18x18x4xf32, #tpu.memory_space<vmem>>, vector<16x16x4xf32>
    %12 = vector.extract_strided_slice %9 {offsets = [0, 0, 0], sizes = [1, 1, 4], strides = [1, 1, 1]} : vector<3x3x4xf32> to vector<1x1x4xf32>
    %13 = vector.shape_cast %12 : vector<1x1x4xf32> to vector<4xf32>
    %14 = vector.shape_cast %13 : vector<4xf32> to vector<1x1x4xf32>
    %15 = vector.broadcast %14 : vector<1x1x4xf32> to vector<16x16x4xf32>
    %16 = arith.mulf %11, %15 : vector<16x16x4xf32>
    %17 = arith.addf %10, %16 : vector<16x16x4xf32>
    %c0_24 = arith.constant 0 : index
    %c1_25 = arith.constant 1 : index
    %c0_26 = arith.constant 0 : index
    %18 = vector.load %arg6[%c0_24, %c1_25, %c0_26] : memref<18x18x4xf32, #tpu.memory_space<vmem>>, vector<16x16x4xf32>
    %19 = vector.extract_strided_slice %9 {offsets = [0, 1, 0], sizes = [1, 1, 4], strides = [1, 1, 1]} : vector<3x3x4xf32> to vector<1x1x4xf32>
    %20 = vector.shape_cast %19 : vector<1x1x4xf32> to vector<4xf32>
    %21 = vector.shape_cast %20 : vector<4xf32> to vector<1x1x4xf32>
    %22 = vector.broadcast %21 : vector<1x1x4xf32> to vector<16x16x4xf32>
    %23 = arith.mulf %18, %22 : vector<16x16x4xf32>
    %24 = arith.addf %17, %23 : vector<16x16x4xf32>
    %c0_27 = arith.constant 0 : index
    %c2 = arith.constant 2 : index
    %c0_28 = arith.constant 0 : index
    %25 = vector.load %arg6[%c0_27, %c2, %c0_28] : memref<18x18x4xf32, #tpu.memory_space<vmem>>, vector<16x16x4xf32>
    %26 = vector.extract_strided_slice %9 {offsets = [0, 2, 0], sizes = [1, 1, 4], strides = [1, 1, 1]} : vector<3x3x4xf32> to vector<1x1x4xf32>
    %27 = vector.shape_cast %26 : vector<1x1x4xf32> to vector<4xf32>
    %28 = vector.shape_cast %27 : vector<4xf32> to vector<1x1x4xf32>
    %29 = vector.broadcast %28 : vector<1x1x4xf32> to vector<16x16x4xf32>
    %30 = arith.mulf %25, %29 : vector<16x16x4xf32>
    %31 = arith.addf %24, %30 : vector<16x16x4xf32>
    %c1_29 = arith.constant 1 : index
    %c0_30 = arith.constant 0 : index
    %c0_31 = arith.constant 0 : index
    %32 = vector.load %arg6[%c1_29, %c0_30, %c0_31] : memref<18x18x4xf32, #tpu.memory_space<vmem>>, vector<16x16x4xf32>
    %33 = vector.extract_strided_slice %9 {offsets = [1, 0, 0], sizes = [1, 1, 4], strides = [1, 1, 1]} : vector<3x3x4xf32> to vector<1x1x4xf32>
    %34 = vector.shape_cast %33 : vector<1x1x4xf32> to vector<4xf32>
    %35 = vector.shape_cast %34 : vector<4xf32> to vector<1x1x4xf32>
    %36 = vector.broadcast %35 : vector<1x1x4xf32> to vector<16x16x4xf32>
    %37 = arith.mulf %32, %36 : vector<16x16x4xf32>
    %38 = arith.addf %31, %37 : vector<16x16x4xf32>
    %c1_32 = arith.constant 1 : index
    %c1_33 = arith.constant 1 : index
    %c0_34 = arith.constant 0 : index
    %39 = vector.load %arg6[%c1_32, %c1_33, %c0_34] : memref<18x18x4xf32, #tpu.memory_space<vmem>>, vector<16x16x4xf32>
    %40 = vector.extract_strided_slice %9 {offsets = [1, 1, 0], sizes = [1, 1, 4], strides = [1, 1, 1]} : vector<3x3x4xf32> to vector<1x1x4xf32>
    %41 = vector.shape_cast %40 : vector<1x1x4xf32> to vector<4xf32>
    %42 = vector.shape_cast %41 : vector<4xf32> to vector<1x1x4xf32>
    %43 = vector.broadcast %42 : vector<1x1x4xf32> to vector<16x16x4xf32>
    %44 = arith.mulf %39, %43 : vector<16x16x4xf32>
    %45 = arith.addf %38, %44 : vector<16x16x4xf32>
    %c1_35 = arith.constant 1 : index
    %c2_36 = arith.constant 2 : index
    %c0_37 = arith.constant 0 : index
    %46 = vector.load %arg6[%c1_35, %c2_36, %c0_37] : memref<18x18x4xf32, #tpu.memory_space<vmem>>, vector<16x16x4xf32>
    %47 = vector.extract_strided_slice %9 {offsets = [1, 2, 0], sizes = [1, 1, 4], strides = [1, 1, 1]} : vector<3x3x4xf32> to vector<1x1x4xf32>
    %48 = vector.shape_cast %47 : vector<1x1x4xf32> to vector<4xf32>
    %49 = vector.shape_cast %48 : vector<4xf32> to vector<1x1x4xf32>
    %50 = vector.broadcast %49 : vector<1x1x4xf32> to vector<16x16x4xf32>
    %51 = arith.mulf %46, %50 : vector<16x16x4xf32>
    %52 = arith.addf %45, %51 : vector<16x16x4xf32>
    %c2_38 = arith.constant 2 : index
    %c0_39 = arith.constant 0 : index
    %c0_40 = arith.constant 0 : index
    %53 = vector.load %arg6[%c2_38, %c0_39, %c0_40] : memref<18x18x4xf32, #tpu.memory_space<vmem>>, vector<16x16x4xf32>
    %54 = vector.extract_strided_slice %9 {offsets = [2, 0, 0], sizes = [1, 1, 4], strides = [1, 1, 1]} : vector<3x3x4xf32> to vector<1x1x4xf32>
    %55 = vector.shape_cast %54 : vector<1x1x4xf32> to vector<4xf32>
    %56 = vector.shape_cast %55 : vector<4xf32> to vector<1x1x4xf32>
    %57 = vector.broadcast %56 : vector<1x1x4xf32> to vector<16x16x4xf32>
    %58 = arith.mulf %53, %57 : vector<16x16x4xf32>
    %59 = arith.addf %52, %58 : vector<16x16x4xf32>
    %c2_41 = arith.constant 2 : index
    %c1_42 = arith.constant 1 : index
    %c0_43 = arith.constant 0 : index
    %60 = vector.load %arg6[%c2_41, %c1_42, %c0_43] : memref<18x18x4xf32, #tpu.memory_space<vmem>>, vector<16x16x4xf32>
    %61 = vector.extract_strided_slice %9 {offsets = [2, 1, 0], sizes = [1, 1, 4], strides = [1, 1, 1]} : vector<3x3x4xf32> to vector<1x1x4xf32>
    %62 = vector.shape_cast %61 : vector<1x1x4xf32> to vector<4xf32>
    %63 = vector.shape_cast %62 : vector<4xf32> to vector<1x1x4xf32>
    %64 = vector.broadcast %63 : vector<1x1x4xf32> to vector<16x16x4xf32>
    %65 = arith.mulf %60, %64 : vector<16x16x4xf32>
    %66 = arith.addf %59, %65 : vector<16x16x4xf32>
    %c2_44 = arith.constant 2 : index
    %c2_45 = arith.constant 2 : index
    %c0_46 = arith.constant 0 : index
    %67 = vector.load %arg6[%c2_44, %c2_45, %c0_46] : memref<18x18x4xf32, #tpu.memory_space<vmem>>, vector<16x16x4xf32>
    %68 = vector.extract_strided_slice %9 {offsets = [2, 2, 0], sizes = [1, 1, 4], strides = [1, 1, 1]} : vector<3x3x4xf32> to vector<1x1x4xf32>
    %69 = vector.shape_cast %68 : vector<1x1x4xf32> to vector<4xf32>
    %70 = vector.shape_cast %69 : vector<4xf32> to vector<1x1x4xf32>
    %71 = vector.broadcast %70 : vector<1x1x4xf32> to vector<16x16x4xf32>
    %72 = arith.mulf %67, %71 : vector<16x16x4xf32>
    %73 = arith.addf %66, %72 : vector<16x16x4xf32>
    %cst_47 = arith.constant 0.000000e+00 : f32
    %74 = vector.broadcast %cst_47 : f32 to vector<1x18x4xf32>
    %cst_48 = arith.constant 0.000000e+00 : f32
    %75 = vector.broadcast %cst_48 : f32 to vector<18x1x4xf32>
    %c0_49 = arith.constant 0 : index
    %c0_50 = arith.constant 0 : index
    %c0_51 = arith.constant 0 : index
    %76 = vector.load %arg7[%c0_49, %c0_50, %c0_51] : memref<18x18x4xf32, #tpu.memory_space<vmem>>, vector<1x18x4xf32>
    tpu.vector_store %arg7[%c0_49, %c0_50, %c0_51], %74 {strides = array<i32>} : memref<18x18x4xf32, #tpu.memory_space<vmem>>, vector<1x18x4xf32>,
    %c17_52 = arith.constant 17 : index
    %c0_53 = arith.constant 0 : index
    %c0_54 = arith.constant 0 : index
    %77 = vector.load %arg7[%c17_52, %c0_53, %c0_54] : memref<18x18x4xf32, #tpu.memory_space<vmem>>, vector<1x18x4xf32>
    tpu.vector_store %arg7[%c17_52, %c0_53, %c0_54], %74 {strides = array<i32>} : memref<18x18x4xf32, #tpu.memory_space<vmem>>, vector<1x18x4xf32>,
    %c0_55 = arith.constant 0 : index
    %c0_56 = arith.constant 0 : index
    %c0_57 = arith.constant 0 : index
    %78 = vector.load %arg7[%c0_55, %c0_56, %c0_57] : memref<18x18x4xf32, #tpu.memory_space<vmem>>, vector<18x1x4xf32>
    tpu.vector_store %arg7[%c0_55, %c0_56, %c0_57], %75 {strides = array<i32>} : memref<18x18x4xf32, #tpu.memory_space<vmem>>, vector<18x1x4xf32>,
    %c0_58 = arith.constant 0 : index
    %c17_59 = arith.constant 17 : index
    %c0_60 = arith.constant 0 : index
    %79 = vector.load %arg7[%c0_58, %c17_59, %c0_60] : memref<18x18x4xf32, #tpu.memory_space<vmem>>, vector<18x1x4xf32>
    tpu.vector_store %arg7[%c0_58, %c17_59, %c0_60], %75 {strides = array<i32>} : memref<18x18x4xf32, #tpu.memory_space<vmem>>, vector<18x1x4xf32>,
    %c1_61 = arith.constant 1 : index
    %c1_62 = arith.constant 1 : index
    %c0_63 = arith.constant 0 : index
    %80 = vector.load %arg7[%c1_61, %c1_62, %c0_63] : memref<18x18x4xf32, #tpu.memory_space<vmem>>, vector<16x16x4xf32>
    tpu.vector_store %arg7[%c1_61, %c1_62, %c0_63], %73 {strides = array<i32>} : memref<18x18x4xf32, #tpu.memory_space<vmem>>, vector<16x16x4xf32>,
    %c0_64 = arith.constant 0 : index
    %c0_65 = arith.constant 0 : index
    %c0_66 = arith.constant 0 : index
    %81 = vector.load %arg7[%c0_64, %c0_65, %c0_66] : memref<18x18x4xf32, #tpu.memory_space<vmem>>, vector<16x16x4xf32>
    %c0_67 = arith.constant 0 : index
    %c1_68 = arith.constant 1 : index
    %c0_69 = arith.constant 0 : index
    %82 = vector.load %arg7[%c0_67, %c1_68, %c0_69] : memref<18x18x4xf32, #tpu.memory_space<vmem>>, vector<16x16x4xf32>
    %c0_70 = arith.constant 0 : index
    %c2_71 = arith.constant 2 : index
    %c0_72 = arith.constant 0 : index
    %83 = vector.load %arg7[%c0_70, %c2_71, %c0_72] : memref<18x18x4xf32, #tpu.memory_space<vmem>>, vector<16x16x4xf32>
    %c1_73 = arith.constant 1 : index
    %c0_74 = arith.constant 0 : index
    %c0_75 = arith.constant 0 : index
    %84 = vector.load %arg7[%c1_73, %c0_74, %c0_75] : memref<18x18x4xf32, #tpu.memory_space<vmem>>, vector<16x16x4xf32>
    %c1_76 = arith.constant 1 : index
    %c1_77 = arith.constant 1 : index
    %c0_78 = arith.constant 0 : index
    %85 = vector.load %arg7[%c1_76, %c1_77, %c0_78] : memref<18x18x4xf32, #tpu.memory_space<vmem>>, vector<16x16x4xf32>
    %c1_79 = arith.constant 1 : index
    %c2_80 = arith.constant 2 : index
    %c0_81 = arith.constant 0 : index
    %86 = vector.load %arg7[%c1_79, %c2_80, %c0_81] : memref<18x18x4xf32, #tpu.memory_space<vmem>>, vector<16x16x4xf32>
    %c2_82 = arith.constant 2 : index
    %c0_83 = arith.constant 0 : index
    %c0_84 = arith.constant 0 : index
    %87 = vector.load %arg7[%c2_82, %c0_83, %c0_84] : memref<18x18x4xf32, #tpu.memory_space<vmem>>, vector<16x16x4xf32>
    %c2_85 = arith.constant 2 : index
    %c1_86 = arith.constant 1 : index
    %c0_87 = arith.constant 0 : index
    %88 = vector.load %arg7[%c2_85, %c1_86, %c0_87] : memref<18x18x4xf32, #tpu.memory_space<vmem>>, vector<16x16x4xf32>
    %c2_88 = arith.constant 2 : index
    %c2_89 = arith.constant 2 : index
    %c0_90 = arith.constant 0 : index
    %89 = vector.load %arg7[%c2_88, %c2_89, %c0_90] : memref<18x18x4xf32, #tpu.memory_space<vmem>>, vector<16x16x4xf32>
    %90 = tpu.concatenate %81, %82, %83, %84, %85, %86, %87, %88, %89 in 2 : vector<16x16x4xf32>, vector<16x16x4xf32>, vector<16x16x4xf32>, vector<16x16x4xf32>, vector<16x16x4xf32>, vector<16x16x4xf32>, vector<16x16x4xf32>, vector<16x16x4xf32>, vector<16x16x4xf32> -> vector<16x16x36xf32>
    %91 = vector.shape_cast %90 : vector<16x16x36xf32> to vector<256x36xf32>
    %c0_91 = arith.constant 0 : index
    %c0_92 = arith.constant 0 : index
    %92 = vector.load %arg3[%c0_91, %c0_92] : memref<36x128xf32, #tpu.memory_space<vmem>>, vector<36x128xf32>
    %cst_93 = arith.constant dense<0.000000e+00> : vector<256x128xf32>
    %93 = tpu.matmul %91, %92, %cst_93 {dimension_numbers = #tpu.dot_dimension_numbers<[1], [0], [0], [1], [0, 0, 1, 1], [], []>} : vector<256x36xf32>, vector<36x128xf32>, vector<256x128xf32> -> vector<256x128xf32>
    %c0_94 = arith.constant 0 : index
    %c0_95 = arith.constant 0 : index
    %94 = vector.load %arg4[%c0_94, %c0_95] : memref<1x128xf32, #tpu.memory_space<vmem>>, vector<1x128xf32>
    %95 = vector.broadcast %94 : vector<1x128xf32> to vector<256x128xf32>
    %96 = arith.addf %93, %95 : vector<256x128xf32>
    %97 = vector.shape_cast %96 : vector<256x128xf32> to vector<16x16x128xf32>
    %c0_96 = arith.constant 0 : index
    %c0_97 = arith.constant 0 : index
    %c0_98 = arith.constant 0 : index
    %c0_99 = arith.constant 0 : index
    %98 = vector.load %arg5[%c0_96, %c0_97, %c0_98, %c0_99] : memref<1x16x16x128xf32, #tpu.memory_space<vmem>>, vector<1x16x16x128xf32>
    %99 = vector.shape_cast %98 : vector<1x16x16x128xf32> to vector<16x16x128xf32>
    %100 = vector.shape_cast %97 : vector<16x16x128xf32> to vector<1x16x16x128xf32>
    tpu.vector_store %arg5[%c0_96, %c0_97, %c0_98, %c0_99], %100 {strides = array<i32>} : memref<1x16x16x128xf32, #tpu.memory_space<vmem>>, vector<1x16x16x128xf32>,
    return
  }
  func.func @transform_0(%arg0: i32) -> (i32, i32, i32, i32) {
    %c0_i32 = arith.constant 0 : i32
    %c0_i32_0 = arith.constant 0 : i32
    %c0_i32_1 = arith.constant 0 : i32
    %c0_i32_2 = arith.constant 0 : i32
    return %arg0, %c0_i32, %c0_i32_0, %c0_i32_1 : i32, i32, i32, i32
  }
  func.func @transform_1(%arg0: i32) -> (i32, i32, i32) {
    %c0_i32 = arith.constant 0 : i32
    %c0_i32_0 = arith.constant 0 : i32
    %c0_i32_1 = arith.constant 0 : i32
    %c0_i32_2 = arith.constant 0 : i32
    return %c0_i32, %c0_i32_0, %c0_i32_1 : i32, i32, i32
  }
  func.func @transform_2(%arg0: i32) -> (i32, i32) {
    %c0_i32 = arith.constant 0 : i32
    %c0_i32_0 = arith.constant 0 : i32
    %c0_i32_1 = arith.constant 0 : i32
    return %c0_i32, %c0_i32_0 : i32, i32
  }
  func.func @transform_3(%arg0: i32) -> (i32, i32) {
    %c0_i32 = arith.constant 0 : i32
    %c0_i32_0 = arith.constant 0 : i32
    %c0_i32_1 = arith.constant 0 : i32
    return %c0_i32, %c0_i32_0 : i32, i32
  }
  func.func @transform_4(%arg0: i32) -> (i32, i32, i32, i32) {
    %c0_i32 = arith.constant 0 : i32
    %c0_i32_0 = arith.constant 0 : i32
    %c0_i32_1 = arith.constant 0 : i32
    %c0_i32_2 = arith.constant 0 : i32
    return %arg0, %c0_i32, %c0_i32_0, %c0_i32_1 : i32, i32, i32, i32
  }
}

</mosaic_0001>

<bundles_post_ra>
// kernel: tpu_custom_call.1
= control target key start
LH: loop header
LB: loop body
LE: loop exit
PB: predicated region body
PF: predicated region fallthrough
CT: control target
= control target key end

     0   :  { %9 = vsyncpa [#allocation5], 0  ;;  %s5585_s0 = inlined_call_operand.vmem [shape: f32[2,16,16,4], index: 0, kind: input, shape index: {}]   ;;  %s5586_s1 = inlined_call_operand.vmem [shape: f32[3,3,4], index: 1, kind: input, shape index: {}]   ;;  %s5587_s2 = inlined_call_operand.vmem [shape: f32[36,128], index: 2, kind: input, shape index: {}]   ;;  %s5588_s3 = inlined_call_operand.vmem [shape: f32[1,128], index: 3, kind: input, shape index: {}]   ;;  %s5589_s4 = inlined_call_operand.hbm [shape: f32[2,16,16,128], index: 4, kind: output, shape index: {}]  }
   0x1   :  { %11 = vsyncpa [#allocation5 + $0x1], 0  ;;  %s3615_s15 = smov 0   ;;  %s3617_s16 = smov 0  }
   0x2   :  { %s3619_s17 = smov 0   ;;  %s3621_s18 = smov 0  }
   0x3 LB: > { %s3636_s19 = sadd.s32 4294967295, %s3577_s18   ;;  %s3309_s20 = sadd.s32 4294967294, %s3577_s18   ;;  %s3577_s18 = sphi %s3621_s18, %s5704_s18   ;;  %s3573_s17 = sphi %s3619_s17, %s5703_s17   ;;  %s3569_s16 = sphi %s3617_s16, %s5702_s16   ;;  %s3565_s15 = sphi %s3615_s15, %s5701_s15  }
   0x4   : > { %s3640_s21 = sadd.s32 1, %s3577_s18   ;;  %s113_s22 = sadd.s32 1, %s3573_s17 }
   0x5   : > { %s110_s23 = ssub.s32 %s3577_s18, %s3640_s21  ;;  %p123_p0 = scmp.ne.s32.totalorder %s3573_s17, %s3569_s16 }
   0x6   : > { %p111_p1 = scmp.eq.s32.totalorder %s110_s23, 0  ;;  %p124_p2 = scmp.eq.s32.totalorder %s3636_s19, 1 }
   0x7   : > { %p129_p3 = scmp.ne.s32.totalorder %s3569_s16, %s3565_s15  ;;  %p130_p4 = scmp.eq.s32.totalorder %s3309_s20, 1 }
   0x8   : > { %s3651_s24 = scalar_select %p111_p1, %s3573_s17, %s113_s22  }
   0x9   : > { %p3653_p5 = por %p124_p2, %p123_p0  ;;  %p3657_p6 = por %p130_p4, %p129_p3 }
   0xa   : > { %p3312_p7 = scmp.ge.s32.totalorder %s3577_s18, 1  ;;  %p165_p8 = scmp.lt.s32.totalorder %s3577_s18, 3 }
   0xc   : > { %p166_p9 = pnand %p3312_p7, %p165_p8 }
   0xe   : > { %169 = sbr.rel (%p166_p9) target bundleno = 1010 (0x3f2), region = 36 }
  0x15   : > { %vm196_vm0 = vcmask 31744   ;;  %vm199_vm1 = vcmask 25600   ;;  %vm205_vm2 = vcmask 24576   ;;  %p191_p10 = scmp.lt.s32.totalorder %s3636_s19, 1  ;;  %v3579_v0 = vmov 0.0   ;;  %s3580_s10 = smov 4  }
  0x16   : > { %1211 = vst.msk [vmem:[#allocation3] sm:$0xff] %vm196_vm0, %v3579_v0  ;;  %1212 = vst.msk [vmem:[#allocation3 + $0x8] sm:$0xff] %vm196_vm0, %v3579_v0  ;;  %v342_v1 = vlaneseq  ;;  %v307_v3 = vld [vmem:[%s5586_s1] sm:$0x7]  ;;  %v308_v10 = vld [vmem:[%s5586_s1 + $0x4] sm:$0x7] }
  0x17   : > { %197 = vst.msk [vmem:[#allocation2] sm:$0xff] %vm196_vm0, %v3579_v0  ;;  %198 = vst.msk [vmem:[#allocation2 + $0x8] sm:$0xff] %vm196_vm0, %v3579_v0  ;;  %s192_s27 = scalar_select %p191_p10, %s3636_s19, 1  ;;  %v309_v20 = vld [vmem:[%s5586_s1 + $0x8] sm:$0x7]  ;;  %vm2632_vm3 = vcmask 64512  }
  0x18   : > { %202 = vst.msk [vmem:[#allocation2 + $0x198] sm:$0xff] %vm196_vm0, %v3579_v0  ;;  %203 = vst.msk [vmem:[#allocation2 + $0x1a0] sm:$0xff] %vm196_vm0, %v3579_v0  ;;  %v343_v2 = vshrl.u32 %v342_v1, 7  ;;  %s3581_s13 = smov 8   ;;  %s3582_s14 = smov 12   ;;  %vm2972_vm4 = vcmask 1043456  }
  0x19   : > { %1215 = vst.msk [vmem:[#allocation3 + $0x198] sm:$0xff] %vm196_vm0, %v3579_v0  ;;  %1216 = vst.msk [vmem:[#allocation3 + $0x1a0] sm:$0xff] %vm196_vm0, %v3579_v0  ;;  %s3355_s28 = sshll.u32 %s192_s27, 8  ;;  %s3583_s20 = smov 16   ;;  %vm2665_vm5 = vcmask 97280   ;;  %vm2698_vm6 = vcmask 130048  }
  0x1a   : > { %200 = vst.msk [vmem:[#allocation2 + $0x10] sm:$0x3] %vm199_vm1, %v3579_v0  ;;  %204 = vst.msk [vmem:[#allocation2 + $0x1a8] sm:$0x3] %vm199_vm1, %v3579_v0  ;;  %s3841_s7 = scalar_lea.vmem %s5585_s0, %s3355_s28  ;;  %v344_v4 = vsub.s32 0, %v343_v2  ;;  %v444_v5 = vsub.s32 1, %v343_v2 }
  0x1b   : > { %1213 = vst.msk [vmem:[#allocation3 + $0x10] sm:$0x3] %vm199_vm1, %v3579_v0  ;;  %1217 = vst.msk [vmem:[#allocation3 + $0x1a8] sm:$0x3] %vm199_vm1, %v3579_v0  ;;  %v3843_v6 = vsub.s32 2, %v343_v2  ;;  %v242_v7 = vld [vmem:[%s3841_s7] sm:$0xff] }
  0x1c   : > { %207 = vst.msk [vmem:[#allocation2 + $0x18] sm:$0x1] %vm205_vm2, %v3579_v0  ;;  %208 = vst.msk [vmem:[#allocation2 + $0x30] sm:$0x1] %vm205_vm2, %v3579_v0  ;;  %v243_v8 = vld [vmem:[%s3841_s7 + $0x8] sm:$0xff]  ;;  %v244_v9 = vld [vmem:[%s3841_s7 + $0x10] sm:$0xff]  ;;  %v3855_v12 = vrot.slane %v307_v3, %v344_v4  ;;  %v3857_v13 = vrot.slane %v307_v3, %v444_v5  ;;  %v3876_v31 = vrot.slane %v308_v10, %v344_v4 }
  0x1d   : > { %209 = vst.msk [vmem:[#allocation2 + $0x48] sm:$0x1] %vm205_vm2, %v3579_v0  ;;  %210 = vst.msk [vmem:[#allocation2 + $0x60] sm:$0x1] %vm205_vm2, %v3579_v0  ;;  %v245_v11 = vld [vmem:[%s3841_s7 + $0x18] sm:$0xff]  ;;  %v3860_v14 = vrot.slane %v307_v3, %v3843_v6  ;;  %v246_v15 = vld [vmem:[%s3841_s7 + $0x20] sm:$0xff]  ;;  %v3878_v32 = vrot.slane %v308_v10, %v444_v5  ;;  %v3894_v42 = vrot.slane %v308_v10, %v3843_v6 }
  0x1e   : > { %211 = vst.msk [vmem:[#allocation2 + $0x78] sm:$0x1] %vm205_vm2, %v3579_v0  ;;  %212 = vst.msk [vmem:[#allocation2 + $0x90] sm:$0x1] %vm205_vm2, %v3579_v0  ;;  %v247_v16 = vld [vmem:[%s3841_s7 + $0x28] sm:$0xff]  ;;  %v1319_v17 = vld [vmem:[#allocation3 + $0x1] sm:$0xff]  ;;  %v3902_v50 = vrot.slane %v309_v20, %v344_v4  ;;  %v3904_v51 = vrot.slane %v309_v20, %v444_v5  ;;  %v3912_v56 = vrot.slane %v309_v20, %v3843_v6 }
  0x1f   : > { %213 = vst.msk [vmem:[#allocation2 + $0xa8] sm:$0x1] %vm205_vm2, %v3579_v0  ;;  %214 = vst.msk [vmem:[#allocation2 + $0xc0] sm:$0x1] %vm205_vm2, %v3579_v0  ;;  %v410_v19 = vld [vmem:[#allocation2 + $0x1] sm:$0xff]  ;;  %1608 = vrot.lane.b32.xlu0 %v1319_v17, %s3580_s10  ;;  %v248_v30 = vld [vmem:[%s3841_s7 + $0x30] sm:$0xff] }
  0x20   : > { %215 = vst.msk [vmem:[#allocation2 + $0xd8] sm:$0x1] %vm205_vm2, %v3579_v0  ;;  %216 = vst.msk [vmem:[#allocation2 + $0xf0] sm:$0x1] %vm205_vm2, %v3579_v0  ;;  %v446_v22 = vmul.f32 %v3857_v13, %v410_v19  ;;  %v510_v23 = vld [vmem:[#allocation2 + $0x2] sm:$0xff]  ;;  %v249_v35 = vld [vmem:[%s3841_s7 + $0x38] sm:$0xff] }
  0x21   : > { %217 = vst.msk [vmem:[#allocation2 + $0x108] sm:$0x1] %vm205_vm2, %v3579_v0  ;;  %218 = vst.msk [vmem:[#allocation2 + $0x120] sm:$0x1] %vm205_vm2, %v3579_v0  ;;  %v311_v24 = vld [vmem:[#allocation2 + $0x8] sm:$0xff]  ;;  %v546_v26 = vmul.f32 %v3860_v14, %v510_v23  ;;  %v250_v36 = vld [vmem:[%s3841_s7 + $0x40] sm:$0xff] }
  0x22   : > { %219 = vst.msk [vmem:[#allocation2 + $0x138] sm:$0x1] %vm205_vm2, %v3579_v0  ;;  %220 = vst.msk [vmem:[#allocation2 + $0x150] sm:$0x1] %vm205_vm2, %v3579_v0  ;;  %v1320_v18 = vld [vmem:[#allocation3 + $0x9] sm:$0xff]  ;;  %v347_v27 = vmul.f32 %v3855_v12, %v311_v24  ;;  %v411_v28 = vld [vmem:[#allocation2 + $0x9] sm:$0xff] }
  0x23   : > { %221 = vst.msk [vmem:[#allocation2 + $0x168] sm:$0x1] %vm205_vm2, %v3579_v0  ;;  %222 = vst.msk [vmem:[#allocation2 + $0x180] sm:$0x1] %vm205_vm2, %v3579_v0  ;;  %v447_v33 = vmul.f32 %v3857_v13, %v411_v28  ;;  %v251_v37 = vld [vmem:[%s3841_s7 + $0x48] sm:$0xff]  ;;  %v252_v39 = vld [vmem:[%s3841_s7 + $0x50] sm:$0xff]  ;;  %1610 = vrot.lane.b32.xlu0 %v1320_v18, %s3580_s10 }
  0x24   : > { %225 = vst.msk [vmem:[#allocation2 + $0x29] sm:$0x1] %vm205_vm2, %v3579_v0  ;;  %226 = vst.msk [vmem:[#allocation2 + $0x41] sm:$0x1] %vm205_vm2, %v3579_v0  ;;  %v253_v40 = vld [vmem:[%s3841_s7 + $0x58] sm:$0xff]  ;;  %v254_v41 = vld [vmem:[%s3841_s7 + $0x60] sm:$0xff] }
  0x25   : > { %227 = vst.msk [vmem:[#allocation2 + $0x59] sm:$0x1] %vm205_vm2, %v3579_v0  ;;  %228 = vst.msk [vmem:[#allocation2 + $0x71] sm:$0x1] %vm205_vm2, %v3579_v0  ;;  %v479_v43 = vadd.f32 %v447_v33, %v347_v27  ;;  %v255_v44 = vld [vmem:[%s3841_s7 + $0x68] sm:$0xff]  ;;  %v256_v45 = vld [vmem:[%s3841_s7 + $0x70] sm:$0xff] }
  0x26   : > { %229 = vst.msk [vmem:[#allocation2 + $0x89] sm:$0x1] %vm205_vm2, %v3579_v0  ;;  %230 = vst.msk [vmem:[#allocation2 + $0xa1] sm:$0x1] %vm205_vm2, %v3579_v0  ;;  %v257_v46 = vld [vmem:[%s3841_s7 + $0x78] sm:$0xff]  ;;  %s3584_s22 = smov 20  }
  0x27   : > { %231 = vst.msk [vmem:[#allocation2 + $0xb9] sm:$0x1] %vm205_vm2, %v3579_v0  ;;  %232 = vst.msk [vmem:[#allocation2 + $0xd1] sm:$0x1] %vm205_vm2, %v3579_v0  ;;  %s3585_s23 = smov 24   ;;  %s3586_s5 = smov 28  }
  0x28   : > { %233 = vst.msk [vmem:[#allocation2 + $0xe9] sm:$0x1] %vm205_vm2, %v3579_v0  ;;  %234 = vst.msk [vmem:[#allocation2 + $0x101] sm:$0x1] %vm205_vm2, %v3579_v0  ;;  %s3587_s12 = smov 32   ;;  %vm2731_vm7 = vcmask 162816  }
  0x29   : > { %235 = vst.msk [vmem:[#allocation2 + $0x119] sm:$0x1] %vm205_vm2, %v3579_v0  ;;  %236 = vst.msk [vmem:[#allocation2 + $0x131] sm:$0x1] %vm205_vm2, %v3579_v0  ;;  %vm2764_vm8 = vcmask 195584   ;;  %vm2797_vm9 = vcmask 228352  }
  0x2a   : > { %237 = vst.msk [vmem:[#allocation2 + $0x149] sm:$0x1] %vm205_vm2, %v3579_v0  ;;  %238 = vst.msk [vmem:[#allocation2 + $0x161] sm:$0x1] %vm205_vm2, %v3579_v0  ;;  %vm2830_vm10 = vcmask 261120   ;;  %vm2875_vm11 = vcmask 293888  }
  0x2b   : > { %239 = vst.msk [vmem:[#allocation2 + $0x179] sm:$0x1] %vm205_vm2, %v3579_v0  ;;  %240 = vst.msk [vmem:[#allocation2 + $0x191] sm:$0x1] %vm205_vm2, %v3579_v0  ;;  %s3356_s28 = sshll.u32 %s3636_s19, 12  ;;  %s3588_s8 = smov [#allocation4]  }
  0x2c   : > { %1219 = vst.msk [vmem:[#allocation3 + $0x18] sm:$0x1] %vm205_vm2, %v3579_v0  ;;  %1220 = vst.msk [vmem:[#allocation3 + $0x30] sm:$0x1] %vm205_vm2, %v3579_v0  ;;  %s5534_s6 = scalar_lea.hbm %s5589_s4, %s3356_s28  ;;  %s3519_s9 = sshll.u32 %s3588_s8, 4  ;;  %s3520_s9 = int_to_ptr.vmem [resolvable:$false] %s3519_s9 }
  0x2d   : > { %1221 = vst.msk [vmem:[#allocation3 + $0x48] sm:$0x1] %vm205_vm2, %v3579_v0  ;;  %1222 = vst.msk [vmem:[#allocation3 + $0x60] sm:$0x1] %vm205_vm2, %v3579_v0 }
  0x2e   : > { %1223 = vst.msk [vmem:[#allocation3 + $0x78] sm:$0x1] %vm205_vm2, %v3579_v0  ;;  %1224 = vst.msk [vmem:[#allocation3 + $0x90] sm:$0x1] %vm205_vm2, %v3579_v0 }
  0x2f   : > { %1225 = vst.msk [vmem:[#allocation3 + $0xa8] sm:$0x1] %vm205_vm2, %v3579_v0  ;;  %1226 = vst.msk [vmem:[#allocation3 + $0xc0] sm:$0x1] %vm205_vm2, %v3579_v0 }
  0x30   : > { %1227 = vst.msk [vmem:[#allocation3 + $0xd8] sm:$0x1] %vm205_vm2, %v3579_v0  ;;  %1228 = vst.msk [vmem:[#allocation3 + $0xf0] sm:$0x1] %vm205_vm2, %v3579_v0 }
  0x31   : > { %1229 = vst.msk [vmem:[#allocation3 + $0x108] sm:$0x1] %vm205_vm2, %v3579_v0  ;;  %1230 = vst.msk [vmem:[#allocation3 + $0x120] sm:$0x1] %vm205_vm2, %v3579_v0 }
  0x32   : > { %1231 = vst.msk [vmem:[#allocation3 + $0x138] sm:$0x1] %vm205_vm2, %v3579_v0  ;;  %1232 = vst.msk [vmem:[#allocation3 + $0x150] sm:$0x1] %vm205_vm2, %v3579_v0 }
  0x33   : > { %1233 = vst.msk [vmem:[#allocation3 + $0x168] sm:$0x1] %vm205_vm2, %v3579_v0  ;;  %1234 = vst.msk [vmem:[#allocation3 + $0x180] sm:$0x1] %vm205_vm2, %v3579_v0 }
  0x34   : > { %1237 = vst.msk [vmem:[#allocation3 + $0x29] sm:$0x1] %vm205_vm2, %v3579_v0  ;;  %1238 = vst.msk [vmem:[#allocation3 + $0x41] sm:$0x1] %vm205_vm2, %v3579_v0 }
  0x35   : > { %1239 = vst.msk [vmem:[#allocation3 + $0x59] sm:$0x1] %vm205_vm2, %v3579_v0  ;;  %1240 = vst.msk [vmem:[#allocation3 + $0x71] sm:$0x1] %vm205_vm2, %v3579_v0 }
  0x36   : > { %1241 = vst.msk [vmem:[#allocation3 + $0x89] sm:$0x1] %vm205_vm2, %v3579_v0  ;;  %1242 = vst.msk [vmem:[#allocation3 + $0xa1] sm:$0x1] %vm205_vm2, %v3579_v0 }
  0x37   : > { %1243 = vst.msk [vmem:[#allocation3 + $0xb9] sm:$0x1] %vm205_vm2, %v3579_v0  ;;  %1244 = vst.msk [vmem:[#allocation3 + $0xd1] sm:$0x1] %vm205_vm2, %v3579_v0 }
  0x38   : > { %1245 = vst.msk [vmem:[#allocation3 + $0xe9] sm:$0x1] %vm205_vm2, %v3579_v0  ;;  %1246 = vst.msk [vmem:[#allocation3 + $0x101] sm:$0x1] %vm205_vm2, %v3579_v0 }
  0x39   : > { %1247 = vst.msk [vmem:[#allocation3 + $0x119] sm:$0x1] %vm205_vm2, %v3579_v0  ;;  %1248 = vst.msk [vmem:[#allocation3 + $0x131] sm:$0x1] %vm205_vm2, %v3579_v0 }
  0x3a   : > { %1249 = vst.msk [vmem:[#allocation3 + $0x149] sm:$0x1] %vm205_vm2, %v3579_v0  ;;  %1250 = vst.msk [vmem:[#allocation3 + $0x161] sm:$0x1] %vm205_vm2, %v3579_v0 }
  0x3b   : > { %1251 = vst.msk [vmem:[#allocation3 + $0x179] sm:$0x1] %vm205_vm2, %v3579_v0  ;;  %1252 = vst.msk [vmem:[#allocation3 + $0x191] sm:$0x1] %vm205_vm2, %v3579_v0 }
  0x3c   : > { %224 = vst.msk [vmem:[#allocation2 + $0x11] sm:$0x1] %vm205_vm2, %v3579_v0  ;;  %241 = vst.msk [vmem:[#allocation2 + $0x1a9] sm:$0x1] %vm205_vm2, %v3579_v0 }
  0x3d   : > { %206 = vst.msk [vmem:[#allocation2] sm:$0x1] %vm205_vm2, %v3579_v0  ;;  %223 = vst.msk [vmem:[#allocation2 + $0x198] sm:$0x1] %vm205_vm2, %v3579_v0 }
  0x3e   : > { %1218 = vst.msk [vmem:[#allocation3] sm:$0x1] %vm205_vm2, %v3579_v0  ;;  %1235 = vst.msk [vmem:[#allocation3 + $0x198] sm:$0x1] %vm205_vm2, %v3579_v0 }
  0x3f   : > { %1236 = vst.msk [vmem:[#allocation3 + $0x11] sm:$0x1] %vm205_vm2, %v3579_v0  ;;  %1253 = vst.msk [vmem:[#allocation3 + $0x1a9] sm:$0x1] %vm205_vm2, %v3579_v0 }
  0x40   : > { %275 = vst.msk [vmem:[#allocation2 + $0x19] sm:$0xff] %vm196_vm0, %v242_v7  ;;  %276 = vst.msk [vmem:[#allocation2 + $0x21] sm:$0xff] %vm196_vm0, %v243_v8 }
  0x41   : > { %277 = vst.msk [vmem:[#allocation2 + $0x31] sm:$0xff] %vm196_vm0, %v244_v9  ;;  %278 = vst.msk [vmem:[#allocation2 + $0x39] sm:$0xff] %vm196_vm0, %v245_v11 }
  0x42   : > { %279 = vst.msk [vmem:[#allocation2 + $0x49] sm:$0xff] %vm196_vm0, %v246_v15  ;;  %280 = vst.msk [vmem:[#allocation2 + $0x51] sm:$0xff] %vm196_vm0, %v247_v16 }
  0x43   : > { %v511_v29 = vld [vmem:[#allocation2 + $0xa] sm:$0xff]  ;;  %281 = vst.msk [vmem:[#allocation2 + $0x61] sm:$0xff] %vm196_vm0, %v248_v30  ;;  %282 = vst.msk [vmem:[#allocation2 + $0x69] sm:$0xff] %vm196_vm0, %v249_v35 }
  0x44   : > { %v310_v21 = vld [vmem:[#allocation2] sm:$0xff]  ;;  %v547_v34 = vmul.f32 %v3860_v14, %v511_v29  ;;  %283 = vst.msk [vmem:[#allocation2 + $0x79] sm:$0xff] %vm196_vm0, %v250_v36  ;;  %284 = vst.msk [vmem:[#allocation2 + $0x81] sm:$0xff] %vm196_vm0, %v251_v37 }
  0x45   : > { %v346_v25 = vmul.f32 %v3855_v12, %v310_v21  ;;  %285 = vst.msk [vmem:[#allocation2 + $0x91] sm:$0xff] %vm196_vm0, %v252_v39  ;;  %286 = vst.msk [vmem:[#allocation2 + $0x99] sm:$0xff] %vm196_vm0, %v253_v40 }
  0x46   : > { %287 = vst.msk [vmem:[#allocation2 + $0xa9] sm:$0xff] %vm196_vm0, %v254_v41  ;;  %288 = vst.msk [vmem:[#allocation2 + $0xb1] sm:$0xff] %vm196_vm0, %v255_v44  ;;  %v579_v54 = vadd.f32 %v547_v34, %v479_v43 }
  0x47   : > { %v478_v38 = vadd.f32 %v446_v22, %v346_v25  ;;  %v610_v48 = vld [vmem:[#allocation2 + $0x18] sm:$0xff]  ;;  %289 = vst.msk [vmem:[#allocation2 + $0xc1] sm:$0xff] %vm196_vm0, %v256_v45  ;;  %290 = vst.msk [vmem:[#allocation2 + $0xc9] sm:$0xff] %vm196_vm0, %v257_v46  ;;  %v611_v57 = vld [vmem:[#allocation2 + $0x20] sm:$0xff] }
  0x48   : > { %v710_v49 = vld [vmem:[#allocation2 + $0x19] sm:$0xff]  ;;  %v646_v52 = vmul.f32 %v3876_v31, %v610_v48  ;;  %v711_v58 = vld [vmem:[#allocation2 + $0x21] sm:$0xff]  ;;  %v348_v59 = vmul.f32 %v610_v48, %v3855_v12  ;;  %v911_v62 = vld [vmem:[#allocation2 + $0x30] sm:$0xff]  ;;  %v647_v0 = vmul.f32 %v3876_v31, %v611_v57 }
  0x49   : > { %v578_v47 = vadd.f32 %v546_v26, %v478_v38  ;;  %v746_v53 = vmul.f32 %v3878_v32, %v710_v49  ;;  %v810_v55 = vld [vmem:[#allocation2 + $0x1a] sm:$0xff]  ;;  %v1011_v63 = vld [vmem:[#allocation2 + $0x31] sm:$0xff]  ;;  %v747_v1 = vmul.f32 %v3878_v32, %v711_v58  ;;  %v947_v2 = vmul.f32 %v3902_v50, %v911_v62  ;;  %v811_v4 = vld [vmem:[#allocation2 + $0x22] sm:$0xff] }
  0x4a   : > { %v846_v61 = vmul.f32 %v3894_v42, %v810_v55  ;;  %v1047_v3 = vmul.f32 %v3904_v51, %v1011_v63  ;;  %v448_v5 = vmul.f32 %v710_v49, %v3857_v13  ;;  %v1111_v7 = vld [vmem:[#allocation2 + $0x32] sm:$0xff]  ;;  %v679_v8 = vadd.f32 %v647_v0, %v579_v54  ;;  %v1112_v24 = vld [vmem:[#allocation2 + $0x3a] sm:$0xff]  ;;  %v3933_v35 = vld [vmem:[#allocation2 + $0x48] sm:$0xff] }
  0x4b   : > { %v678_v60 = vadd.f32 %v646_v52, %v578_v47  ;;  %v847_v9 = vmul.f32 %v3894_v42, %v811_v4  ;;  %v912_v10 = vld [vmem:[#allocation2 + $0x38] sm:$0xff]  ;;  %v548_v11 = vmul.f32 %v810_v55, %v3860_v14  ;;  %v1147_v15 = vmul.f32 %v3912_v56, %v1111_v7  ;;  %v3937_v38 = vld [vmem:[#allocation2 + $0x49] sm:$0xff] }
  0x4c   : > { %v948_v16 = vmul.f32 %v3902_v50, %v912_v10  ;;  %v1012_v17 = vld [vmem:[#allocation2 + $0x39] sm:$0xff]  ;;  %v480_v18 = vadd.f32 %v448_v5, %v348_v59  ;;  %v648_v19 = vmul.f32 %v911_v62, %v3876_v31  ;;  %v779_v21 = vadd.f32 %v747_v1, %v679_v8 }
  0x4d   : > { %v778_v6 = vadd.f32 %v746_v53, %v678_v60  ;;  %v1048_v22 = vmul.f32 %v3904_v51, %v1012_v17  ;;  %v748_v23 = vmul.f32 %v1011_v63, %v3878_v32  ;;  %v349_v26 = vmul.f32 %v611_v57, %v3855_v12  ;;  %v3949_v60 = vld [vmem:[#allocation2 + $0x50] sm:$0xff]  ;;  %v3964_v8 = vld [vmem:[#allocation2 + $0x60] sm:$0xff] }
  0x4e   : > { %v580_v25 = vadd.f32 %v548_v11, %v480_v18  ;;  %v449_v27 = vmul.f32 %v711_v58, %v3857_v13  ;;  %v549_v28 = vmul.f32 %v811_v4, %v3860_v14  ;;  %v879_v30 = vadd.f32 %v847_v9, %v779_v21  ;;  %v3947_v58 = vld [vmem:[#allocation2 + $0x4a] sm:$0xff]  ;;  %v3960_v5 = vld [vmem:[#allocation2 + $0x52] sm:$0xff]  ;;  %v258_v9 = vld [vmem:[%s3841_s7 + $0x80] sm:$0xff] }
  0x4f   : > { %v878_v20 = vadd.f32 %v846_v61, %v778_v6  ;;  %v1148_v33 = vmul.f32 %v3912_v56, %v1112_v24  ;;  %v848_v34 = vmul.f32 %v1111_v7, %v3894_v42  ;;  %v949_v37 = vmul.f32 %v3902_v50, %v3933_v35  ;;  %v259_v11 = vld [vmem:[%s3841_s7 + $0x88] sm:$0xff]  ;;  %291 = vst.msk [vmem:[#allocation2 + $0xd9] sm:$0xff] %vm196_vm0, %v258_v9  ;;  %v261_v21 = vld [vmem:[%s3841_s7 + $0x98] sm:$0xff] }
  0x50   : > { %v680_v36 = vadd.f32 %v648_v19, %v580_v25  ;;  %v481_v39 = vadd.f32 %v449_v27, %v349_v26  ;;  %v649_v40 = vmul.f32 %v912_v10, %v3876_v31  ;;  %v980_v43 = vadd.f32 %v948_v16, %v879_v30  ;;  %292 = vst.msk [vmem:[#allocation2 + $0xe1] sm:$0xff] %vm196_vm0, %v259_v11  ;;  %v265_v27 = vld [vmem:[%s3841_s7 + $0xb8] sm:$0xff] }
  0x51   : > { %v979_v29 = vadd.f32 %v947_v2, %v878_v20  ;;  %v1049_v44 = vmul.f32 %v3904_v51, %v3937_v38  ;;  %v749_v45 = vmul.f32 %v1012_v17, %v3878_v32  ;;  %v350_v48 = vmul.f32 %v911_v62, %v3855_v12  ;;  %v3958_v2 = vld [vmem:[#allocation2 + $0x51] sm:$0xff]  ;;  %294 = vst.msk [vmem:[#allocation2 + $0xf9] sm:$0xff] %vm196_vm0, %v261_v21 }
  0x52   : > { %v780_v46 = vadd.f32 %v748_v23, %v680_v36  ;;  %v581_v47 = vadd.f32 %v549_v28, %v481_v39  ;;  %v450_v49 = vmul.f32 %v1011_v63, %v3857_v13  ;;  %v1080_v53 = vadd.f32 %v1048_v22, %v980_v43  ;;  %v262_v22 = vld [vmem:[%s3841_s7 + $0xa0] sm:$0xff]  ;;  %v263_v23 = vld [vmem:[%s3841_s7 + $0xa8] sm:$0xff]  ;;  %298 = vst.msk [vmem:[#allocation2 + $0x129] sm:$0xff] %vm196_vm0, %v265_v27  ;;  %v269_v39 = vld [vmem:[%s3841_s7 + $0xd8] sm:$0xff] }
  0x53   : > { %v1079_v41 = vadd.f32 %v1047_v3, %v979_v29  ;;  %v849_v54 = vmul.f32 %v1112_v24, %v3894_v42  ;;  %v550_v55 = vmul.f32 %v1111_v7, %v3860_v14  ;;  %v650_v62 = vmul.f32 %v3933_v35, %v3876_v31  ;;  %295 = vst.msk [vmem:[#allocation2 + $0x109] sm:$0xff] %vm196_vm0, %v262_v22  ;;  %v266_v28 = vld [vmem:[%s3841_s7 + $0xc0] sm:$0xff]  ;;  %v267_v36 = vld [vmem:[%s3841_s7 + $0xc8] sm:$0xff] }
  0x54   : > { %v880_v57 = vadd.f32 %v848_v34, %v780_v46  ;;  %v681_v59 = vadd.f32 %v649_v40, %v581_v47  ;;  %v482_v61 = vadd.f32 %v450_v49, %v350_v48  ;;  %v1180_v63 = vadd.f32 %v1148_v33, %v1080_v53  ;;  %296 = vst.msk [vmem:[#allocation2 + $0x111] sm:$0xff] %vm196_vm0, %v263_v23  ;;  %v271_v46 = vld [vmem:[%s3841_s7 + $0xe8] sm:$0xff]  ;;  %v272_v47 = vld [vmem:[%s3841_s7 + $0xf0] sm:$0xff] }
  0x55   : > { %v1179_v52 = vadd.f32 %v1147_v15, %v1079_v41  ;;  %v1149_v0 = vmul.f32 %v3912_v56, %v3947_v58  ;;  %v950_v1 = vmul.f32 %v3902_v50, %v3949_v60  ;;  %v750_v7 = vmul.f32 %v3937_v38, %v3878_v32  ;;  %v260_v15 = vld [vmem:[%s3841_s7 + $0x90] sm:$0xff]  ;;  %299 = vst.msk [vmem:[#allocation2 + $0x139] sm:$0xff] %vm196_vm0, %v266_v28  ;;  %v1015_v48 = vld [vmem:[#allocation2 + $0x61] sm:$0xff] }
  0x56   : > { %v981_v3 = vadd.f32 %v949_v37, %v880_v57  ;;  %v781_v4 = vadd.f32 %v749_v45, %v681_v59  ;;  %v582_v6 = vadd.f32 %v550_v55, %v482_v61  ;;  %1256 = vst.msk [vmem:[#allocation3 + $0x21] sm:$0xff] %vm196_vm0, %v1180_v63  ;;  %v1050_v16 = vmul.f32 %v3904_v51, %v3958_v2  ;;  %v268_v37 = vld [vmem:[%s3841_s7 + $0xd0] sm:$0xff]  ;;  %v270_v45 = vld [vmem:[%s3841_s7 + $0xe0] sm:$0xff]  ;;  %v273_v57 = vld [vmem:[%s3841_s7 + $0xf8] sm:$0xff] }
  0x57   : > { %1255 = vst.msk [vmem:[#allocation3 + $0x19] sm:$0xff] %vm196_vm0, %v1179_v52  ;;  %v351_v18 = vmul.f32 %v912_v10, %v3855_v12  ;;  %v451_v19 = vmul.f32 %v1012_v17, %v3857_v13  ;;  %v551_v20 = vmul.f32 %v1112_v24, %v3860_v14  ;;  %293 = vst.msk [vmem:[#allocation2 + $0xf1] sm:$0xff] %vm196_vm0, %v260_v15  ;;  %v264_v24 = vld [vmem:[%s3841_s7 + $0xb0] sm:$0xff]  ;;  %v1115_v49 = vld [vmem:[#allocation2 + $0x62] sm:$0xff] }
  0x58   : > { %v1081_v25 = vadd.f32 %v1049_v44, %v981_v3  ;;  %v881_v26 = vadd.f32 %v849_v54, %v781_v4  ;;  %v682_v10 = vadd.f32 %v650_v62, %v582_v6  ;;  %v850_v17 = vmul.f32 %v3947_v58, %v3894_v42  ;;  %297 = vst.msk [vmem:[#allocation2 + $0x121] sm:$0xff] %vm196_vm0, %v264_v24  ;;  %v917_v24 = vld [vmem:[#allocation2 + $0x78] sm:$0xff] }
  0x59   : > { %v1150_v29 = vmul.f32 %v3912_v56, %v3960_v5  ;;  %v951_v30 = vmul.f32 %v3902_v50, %v3964_v8  ;;  %v483_v33 = vadd.f32 %v451_v19, %v351_v18  ;;  %v651_v34 = vmul.f32 %v3949_v60, %v3876_v31  ;;  %300 = vst.msk [vmem:[#allocation2 + $0x141] sm:$0xff] %vm196_vm0, %v267_v36 }
  0x5a   : > { %v1181_v40 = vadd.f32 %v1149_v0, %v1081_v25  ;;  %v982_v41 = vadd.f32 %v950_v1, %v881_v26  ;;  %v782_v43 = vadd.f32 %v750_v7, %v682_v10  ;;  %v751_v44 = vmul.f32 %v3958_v2, %v3878_v32  ;;  %301 = vst.msk [vmem:[#allocation2 + $0x151] sm:$0xff] %vm196_vm0, %v268_v37  ;;  %v916_v0 = vld [vmem:[#allocation2 + $0x68] sm:$0xff]  ;;  %v1117_v37 = vld [vmem:[#allocation2 + $0x7a] sm:$0xff] }
  0x5b   : > { %302 = vst.msk [vmem:[#allocation2 + $0x159] sm:$0xff] %vm196_vm0, %v269_v39  ;;  %v583_v52 = vadd.f32 %v551_v20, %v483_v33  ;;  %v352_v53 = vmul.f32 %v3933_v35, %v3855_v12  ;;  %v452_v54 = vmul.f32 %v3937_v38, %v3857_v13  ;;  %v552_v55 = vmul.f32 %v3947_v58, %v3860_v14  ;;  %v1116_v10 = vld [vmem:[#allocation2 + $0x6a] sm:$0xff] }
  0x5c   : > { %303 = vst.msk [vmem:[#allocation2 + $0x169] sm:$0xff] %vm196_vm0, %v270_v45  ;;  %304 = vst.msk [vmem:[#allocation2 + $0x171] sm:$0xff] %vm196_vm0, %v271_v46  ;;  %v1082_v61 = vadd.f32 %v1050_v16, %v982_v41  ;;  %v882_v62 = vadd.f32 %v850_v17, %v782_v43  ;;  %v1051_v35 = vmul.f32 %v3904_v51, %v1015_v48  ;;  %v1016_v16 = vld [vmem:[#allocation2 + $0x69] sm:$0xff] }
  0x5d   : > { %305 = vst.msk [vmem:[#allocation2 + $0x181] sm:$0xff] %vm196_vm0, %v272_v47  ;;  %1257 = vst.msk [vmem:[#allocation3 + $0x31] sm:$0xff] %vm196_vm0, %v1181_v40  ;;  %v1151_v63 = vmul.f32 %v3912_v56, %v1115_v49  ;;  %v683_v38 = vadd.f32 %v651_v34, %v583_v52  ;;  %v851_v58 = vmul.f32 %v3960_v5, %v3894_v42  ;;  %v1322_v4 = vld [vmem:[#allocation3 + $0x21] sm:$0xff] }
  0x5e   : > { %v1321_v59 = vld [vmem:[#allocation3 + $0x19] sm:$0xff]  ;;  %306 = vst.msk [vmem:[#allocation2 + $0x189] sm:$0xff] %vm196_vm0, %v273_v57  ;;  %v484_v1 = vadd.f32 %v452_v54, %v352_v53  ;;  %v652_v3 = vmul.f32 %v3964_v8, %v3876_v31  ;;  %v1182_v6 = vadd.f32 %v1150_v29, %v1082_v61  ;;  %v983_v7 = vadd.f32 %v951_v30, %v882_v62  ;;  %v918_v54 = vld [vmem:[#allocation2 + $0x80] sm:$0xff] }
  0x5f   : > { %1612 = vrot.lane.b32.xlu1 %v1321_v59, %s3580_s10  ;;  %v952_v9 = vmul.f32 %v3902_v50, %v916_v0  ;;  %v752_v11 = vmul.f32 %v1015_v48, %v3878_v32  ;;  %v783_v15 = vadd.f32 %v751_v44, %v683_v38  ;;  %v353_v19 = vmul.f32 %v3949_v60, %v3855_v12  ;;  %v1118_v38 = vld [vmem:[#allocation2 + $0x82] sm:$0xff] }
  0x60   : > { %v584_v18 = vadd.f32 %v552_v55, %v484_v1  ;;  %v453_v20 = vmul.f32 %v3958_v2, %v3857_v13  ;;  %1258 = vst.msk [vmem:[#allocation3 + $0x39] sm:$0xff] %vm196_vm0, %v1182_v6  ;;  %v1083_v21 = vadd.f32 %v1051_v35, %v983_v7  ;;  %v1052_v22 = vmul.f32 %v3904_v51, %v1016_v16  ;;  %v1018_v55 = vld [vmem:[#allocation2 + $0x81] sm:$0xff] }
  0x61   : > { %v852_v23 = vmul.f32 %v1115_v49, %v3894_v42  ;;  %v553_v25 = vmul.f32 %v3960_v5, %v3860_v14  ;;  %v883_v26 = vadd.f32 %v851_v58, %v783_v15  ;;  %v653_v27 = vmul.f32 %v916_v0, %v3876_v31  ;;  %v1017_v5 = vld [vmem:[#allocation2 + $0x79] sm:$0xff]  ;;  %v919_v15 = vld [vmem:[#allocation2 + $0x90] sm:$0xff] }
  0x62   : > { %v684_v17 = vadd.f32 %v652_v3, %v584_v18  ;;  %v485_v60 = vadd.f32 %v453_v20, %v353_v19  ;;  %v1183_v2 = vadd.f32 %v1151_v63, %v1083_v21  ;;  %v1152_v28 = vmul.f32 %v3912_v56, %v1116_v10 }
  0x63   : > { %1614 = vrot.lane.b32.xlu1 %v1322_v4, %s3580_s10  ;;  %v953_v29 = vmul.f32 %v3902_v50, %v917_v24  ;;  %v753_v30 = vmul.f32 %v1016_v16, %v3878_v32  ;;  %v984_v34 = vadd.f32 %v952_v9, %v883_v26  ;;  %v354_v40 = vmul.f32 %v3964_v8, %v3855_v12 }
  0x64   : > { %v1323_v33 = vld [vmem:[#allocation3 + $0x31] sm:$0xff]  ;;  %v784_v36 = vadd.f32 %v752_v11, %v684_v17  ;;  %v585_v39 = vadd.f32 %v553_v25, %v485_v60  ;;  %1259 = vst.msk [vmem:[#allocation3 + $0x49] sm:$0xff] %vm196_vm0, %v1183_v2  ;;  %v1053_v41 = vmul.f32 %v3904_v51, %v1017_v5  ;;  %v1153_v43 = vmul.f32 %v3912_v56, %v1117_v37  ;;  %v1119_v17 = vld [vmem:[#allocation2 + $0x92] sm:$0xff] }
  0x65   : > { %1616 = vrot.lane.b32.xlu0 %v1323_v33, %s3580_s10  ;;  %v454_v44 = vmul.f32 %v1015_v48, %v3857_v13  ;;  %v554_v45 = vmul.f32 %v1115_v49, %v3860_v14  ;;  %v1084_v46 = vadd.f32 %v1052_v22, %v984_v34  ;;  %v853_v53 = vmul.f32 %v1116_v10, %v3894_v42 }
  0x66   : > { %v884_v47 = vadd.f32 %v852_v23, %v784_v36  ;;  %v685_v52 = vadd.f32 %v653_v27, %v585_v39  ;;  %v954_v8 = vmul.f32 %v3902_v50, %v918_v54  ;;  %v1054_v57 = vmul.f32 %v3904_v51, %v1018_v55  ;;  %v920_v36 = vld [vmem:[#allocation2 + $0x98] sm:$0xff] }
  0x67   : > { %v486_v59 = vadd.f32 %v454_v44, %v354_v40  ;;  %v654_v61 = vmul.f32 %v917_v24, %v3876_v31  ;;  %v1324_v62 = vld [vmem:[#allocation3 + $0x39] sm:$0xff]  ;;  %v1184_v35 = vadd.f32 %v1152_v28, %v1084_v46  ;;  %v355_v49 = vmul.f32 %v916_v0, %v3855_v12 }
  0x68   : > { %v985_v63 = vadd.f32 %v953_v29, %v884_v47  ;;  %v785_v48 = vadd.f32 %v753_v30, %v685_v52  ;;  %1618 = vrot.lane.b32.xlu1 %v1324_v62, %s3580_s10  ;;  %v754_v1 = vmul.f32 %v1017_v5, %v3878_v32  ;;  %v455_v3 = vmul.f32 %v1016_v16, %v3857_v13  ;;  %v1020_v47 = vld [vmem:[#allocation2 + $0x99] sm:$0xff] }
  0x69   : > { %v586_v58 = vadd.f32 %v554_v45, %v486_v59  ;;  %v555_v4 = vmul.f32 %v1116_v10, %v3860_v14  ;;  %1260 = vst.msk [vmem:[#allocation3 + $0x51] sm:$0xff] %vm196_vm0, %v1184_v35  ;;  %v1154_v9 = vmul.f32 %v3912_v56, %v1118_v38  ;;  %v854_v11 = vmul.f32 %v1117_v37, %v3894_v42  ;;  %v1019_v10 = vld [vmem:[#allocation2 + $0x91] sm:$0xff]  ;;  %v1120_v35 = vld [vmem:[#allocation2 + $0x9a] sm:$0xff] }
  0x6a   : > { %v1085_v6 = vadd.f32 %v1053_v41, %v985_v63  ;;  %v885_v7 = vadd.f32 %v853_v53, %v785_v48  ;;  %v955_v18 = vmul.f32 %v3902_v50, %v919_v15  ;;  %v487_v19 = vadd.f32 %v455_v3, %v355_v49  ;;  %v921_v48 = vld [vmem:[#allocation2 + $0xa8] sm:$0xff] }
  0x6b   : > { %v686_v0 = vadd.f32 %v654_v61, %v586_v58  ;;  %v655_v20 = vmul.f32 %v918_v54, %v3876_v31  ;;  %v1325_v21 = vld [vmem:[#allocation3 + $0x49] sm:$0xff]  ;;  %v755_v23 = vmul.f32 %v1018_v55, %v3878_v32  ;;  %v356_v25 = vmul.f32 %v917_v24, %v3855_v12 }
  0x6c   : > { %v1185_v22 = vadd.f32 %v1153_v43, %v1085_v6  ;;  %v986_v16 = vadd.f32 %v954_v8, %v885_v7  ;;  %1620 = vrot.lane.b32.xlu0 %v1325_v21, %s3580_s10  ;;  %v587_v60 = vadd.f32 %v555_v4, %v487_v19  ;;  %v456_v27 = vmul.f32 %v1017_v5, %v3857_v13 }
  0x6d   : > { %v786_v26 = vadd.f32 %v754_v1, %v686_v0  ;;  %v556_v2 = vmul.f32 %v1117_v37, %v3860_v14  ;;  %v1055_v29 = vmul.f32 %v3904_v51, %v1019_v10  ;;  %v1155_v30 = vmul.f32 %v3912_v56, %v1119_v17 }
  0x6e   : > { %1261 = vst.msk [vmem:[#allocation3 + $0x61] sm:$0xff] %vm196_vm0, %v1185_v22  ;;  %v1086_v28 = vadd.f32 %v1054_v57, %v986_v16  ;;  %v855_v33 = vmul.f32 %v1118_v38, %v3894_v42  ;;  %v687_v34 = vadd.f32 %v655_v20, %v587_v60  ;;  %v488_v39 = vadd.f32 %v456_v27, %v356_v25  ;;  %v922_v25 = vld [vmem:[#allocation2 + $0xb0] sm:$0xff] }
  0x6f   : > { %v886_v24 = vadd.f32 %v854_v11, %v786_v26  ;;  %v656_v40 = vmul.f32 %v919_v15, %v3876_v31  ;;  %v956_v5 = vmul.f32 %v3902_v50, %v920_v36  ;;  %v756_v37 = vmul.f32 %v1019_v10, %v3878_v32  ;;  %v1121_v11 = vld [vmem:[#allocation2 + $0xaa] sm:$0xff] }
  0x70   : > { %v1186_v41 = vadd.f32 %v1154_v9, %v1086_v28  ;;  %v357_v43 = vmul.f32 %v918_v54, %v3855_v12  ;;  %v1326_v44 = vld [vmem:[#allocation3 + $0x51] sm:$0xff]  ;;  %v787_v46 = vadd.f32 %v755_v23, %v687_v34  ;;  %v588_v52 = vadd.f32 %v556_v2, %v488_v39  ;;  %v1021_v9 = vld [vmem:[#allocation2 + $0xa9] sm:$0xff]  ;;  %v1022_v26 = vld [vmem:[#allocation2 + $0xb1] sm:$0xff] }
  0x71   : > { %v987_v45 = vadd.f32 %v955_v18, %v886_v24  ;;  %v457_v53 = vmul.f32 %v1018_v55, %v3857_v13  ;;  %1622 = vrot.lane.b32.xlu1 %v1326_v44, %s3580_s10  ;;  %v1056_v8 = vmul.f32 %v3904_v51, %v1020_v47  ;;  %v856_v57 = vmul.f32 %v1119_v17, %v3894_v42  ;;  %v1122_v24 = vld [vmem:[#allocation2 + $0xb2] sm:$0xff] }
  0x72   : > { %1262 = vst.msk [vmem:[#allocation3 + $0x69] sm:$0xff] %vm196_vm0, %v1186_v41  ;;  %v557_v59 = vmul.f32 %v1118_v38, %v3860_v14  ;;  %v657_v61 = vmul.f32 %v920_v36, %v3876_v31  ;;  %v887_v62 = vadd.f32 %v855_v33, %v787_v46  ;;  %v688_v63 = vadd.f32 %v656_v40, %v588_v52 }
  0x73   : > { %v1087_v54 = vadd.f32 %v1055_v29, %v987_v45  ;;  %v489_v49 = vadd.f32 %v457_v53, %v357_v43  ;;  %v1156_v55 = vmul.f32 %v3912_v56, %v1120_v35  ;;  %v957_v58 = vmul.f32 %v3902_v50, %v921_v48  ;;  %v923_v45 = vld [vmem:[#allocation2 + $0xc0] sm:$0xff] }
  0x74   : > { %v757_v1 = vmul.f32 %v1020_v47, %v3878_v32  ;;  %v358_v3 = vmul.f32 %v919_v15, %v3855_v12  ;;  %v988_v7 = vadd.f32 %v956_v5, %v887_v62  ;;  %v788_v38 = vadd.f32 %v756_v37, %v688_v63  ;;  %v1023_v62 = vld [vmem:[#allocation2 + $0xc1] sm:$0xff] }
  0x75   : > { %v1327_v4 = vld [vmem:[#allocation3 + $0x61] sm:$0xff]  ;;  %v1187_v6 = vadd.f32 %v1155_v30, %v1087_v54  ;;  %v589_v0 = vadd.f32 %v557_v59, %v489_v49  ;;  %v1057_v18 = vmul.f32 %v3904_v51, %v1021_v9  ;;  %v1157_v19 = vmul.f32 %v3912_v56, %v1121_v11 }
  0x76   : > { %1624 = vrot.lane.b32.xlu0 %v1327_v4, %s3580_s10  ;;  %v458_v20 = vmul.f32 %v1019_v10, %v3857_v13  ;;  %v558_v21 = vmul.f32 %v1119_v17, %v3860_v14  ;;  %v1088_v15 = vadd.f32 %v1056_v8, %v988_v7  ;;  %v888_v22 = vadd.f32 %v856_v57, %v788_v38  ;;  %v924_v7 = vld [vmem:[#allocation2 + $0xc8] sm:$0xff] }
  0x77   : > { %1263 = vst.msk [vmem:[#allocation3 + $0x79] sm:$0xff] %vm196_vm0, %v1187_v6  ;;  %v689_v16 = vadd.f32 %v657_v61, %v589_v0  ;;  %v857_v23 = vmul.f32 %v1120_v35, %v3894_v42  ;;  %v958_v60 = vmul.f32 %v3902_v50, %v922_v25  ;;  %v1058_v27 = vmul.f32 %v3904_v51, %v1022_v26 }
  0x78   : > { %v490_v2 = vadd.f32 %v458_v20, %v358_v3  ;;  %v658_v28 = vmul.f32 %v921_v48, %v3876_v31  ;;  %v1188_v10 = vadd.f32 %v1156_v55, %v1088_v15  ;;  %v989_v30 = vadd.f32 %v957_v58, %v888_v22  ;;  %v1024_v22 = vld [vmem:[#allocation2 + $0xc9] sm:$0xff] }
  0x79   : > { %v1328_v29 = vld [vmem:[#allocation3 + $0x69] sm:$0xff]  ;;  %v789_v17 = vadd.f32 %v757_v1, %v689_v16  ;;  %v359_v33 = vmul.f32 %v920_v36, %v3855_v12  ;;  %v758_v39 = vmul.f32 %v1021_v9, %v3878_v32  ;;  %v459_v40 = vmul.f32 %v1020_v47, %v3857_v13 }
  0x7a   : > { %1626 = vrot.lane.b32.xlu1 %v1328_v29, %s3580_s10  ;;  %v590_v34 = vadd.f32 %v558_v21, %v490_v2  ;;  %v559_v41 = vmul.f32 %v1120_v35, %v3860_v14  ;;  %1264 = vst.msk [vmem:[#allocation3 + $0x81] sm:$0xff] %vm196_vm0, %v1188_v10  ;;  %v1089_v5 = vadd.f32 %v1057_v18, %v989_v30  ;;  %v1123_v35 = vld [vmem:[#allocation2 + $0xc2] sm:$0xff]  ;;  %v1124_v10 = vld [vmem:[#allocation2 + $0xca] sm:$0xff] }
  0x7b   : > { %v889_v37 = vadd.f32 %v857_v23, %v789_v17  ;;  %v1158_v43 = vmul.f32 %v3912_v56, %v1122_v24  ;;  %v858_v44 = vmul.f32 %v1121_v11, %v3894_v42  ;;  %v959_v46 = vmul.f32 %v3902_v50, %v923_v45  ;;  %v925_v17 = vld [vmem:[#allocation2 + $0xd8] sm:$0xff] }
  0x7c   : > { %v690_v36 = vadd.f32 %v658_v28, %v590_v34  ;;  %v491_v52 = vadd.f32 %v459_v40, %v359_v33  ;;  %v659_v53 = vmul.f32 %v922_v25, %v3876_v31  ;;  %v1189_v8 = vadd.f32 %v1157_v19, %v1089_v5 }
  0x7d   : > { %v990_v57 = vadd.f32 %v958_v60, %v889_v37  ;;  %v759_v47 = vmul.f32 %v1022_v26, %v3878_v32  ;;  %v360_v59 = vmul.f32 %v921_v48, %v3855_v12  ;;  %v460_v49 = vmul.f32 %v1021_v9, %v3857_v13 }
  0x7e   : > { %v1329_v61 = vld [vmem:[#allocation3 + $0x79] sm:$0xff]  ;;  %v790_v54 = vadd.f32 %v758_v39, %v690_v36  ;;  %v591_v63 = vadd.f32 %v559_v41, %v491_v52  ;;  %v560_v55 = vmul.f32 %v1121_v11, %v3860_v14  ;;  %1265 = vst.msk [vmem:[#allocation3 + $0x91] sm:$0xff] %vm196_vm0, %v1189_v8  ;;  %v1059_v1 = vmul.f32 %v3904_v51, %v1023_v62 }
  0x7f   : > { %1628 = vrot.lane.b32.xlu0 %v1329_v61, %s3580_s10  ;;  %v1090_v58 = vadd.f32 %v1058_v27, %v990_v57  ;;  %v1159_v3 = vmul.f32 %v3912_v56, %v1123_v35  ;;  %v859_v48 = vmul.f32 %v1122_v24, %v3894_v42  ;;  %v492_v38 = vadd.f32 %v460_v49, %v360_v59  ;;  %v926_v61 = vld [vmem:[#allocation2 + $0xe0] sm:$0xff] }
  0x80   : > { %v890_v4 = vadd.f32 %v858_v44, %v790_v54  ;;  %v691_v6 = vadd.f32 %v659_v53, %v591_v63  ;;  %v660_v0 = vmul.f32 %v923_v45, %v3876_v31  ;;  %v960_v11 = vmul.f32 %v3902_v50, %v924_v7  ;;  %v1125_v44 = vld [vmem:[#allocation2 + $0xda] sm:$0xff] }
  0x81   : > { %v1190_v9 = vadd.f32 %v1158_v43, %v1090_v58  ;;  %v760_v18 = vmul.f32 %v1023_v62, %v3878_v32  ;;  %v361_v19 = vmul.f32 %v922_v25, %v3855_v12  ;;  %v1330_v20 = vld [vmem:[#allocation3 + $0x81] sm:$0xff]  ;;  %v592_v16 = vadd.f32 %v560_v55, %v492_v38  ;;  %v1025_v43 = vld [vmem:[#allocation2 + $0xd9] sm:$0xff]  ;;  %v1026_v54 = vld [vmem:[#allocation2 + $0xe1] sm:$0xff] }
  0x82   : > { %v991_v21 = vadd.f32 %v959_v46, %v890_v4  ;;  %v791_v15 = vadd.f32 %v759_v47, %v691_v6  ;;  %v461_v23 = vmul.f32 %v1022_v26, %v3857_v13  ;;  %1630 = vrot.lane.b32.xlu1 %v1330_v20, %s3580_s10  ;;  %v1060_v60 = vmul.f32 %v3904_v51, %v1024_v22  ;;  %v1126_v4 = vld [vmem:[#allocation2 + $0xe2] sm:$0xff] }
  0x83   : > { %1266 = vst.msk [vmem:[#allocation3 + $0x99] sm:$0xff] %vm196_vm0, %v1190_v9  ;;  %v860_v27 = vmul.f32 %v1123_v35, %v3894_v42  ;;  %v561_v2 = vmul.f32 %v1122_v24, %v3860_v14  ;;  %v661_v28 = vmul.f32 %v924_v7, %v3876_v31  ;;  %v692_v30 = vadd.f32 %v660_v0, %v592_v16 }
  0x84   : > { %v1091_v25 = vadd.f32 %v1059_v1, %v991_v21  ;;  %v891_v29 = vadd.f32 %v859_v48, %v791_v15  ;;  %v493_v33 = vadd.f32 %v461_v23, %v361_v19  ;;  %v1160_v26 = vmul.f32 %v3912_v56, %v1124_v10  ;;  %v927_v21 = vld [vmem:[#allocation2 + $0xf0] sm:$0xff] }
  0x85   : > { %v961_v34 = vmul.f32 %v3902_v50, %v925_v17  ;;  %v761_v39 = vmul.f32 %v1024_v22, %v3878_v32  ;;  %v362_v40 = vmul.f32 %v923_v45, %v3855_v12  ;;  %v1331_v41 = vld [vmem:[#allocation3 + $0x91] sm:$0xff]  ;;  %v792_v24 = vadd.f32 %v760_v18, %v692_v30 }
  0x86   : > { %v1191_v5 = vadd.f32 %v1159_v3, %v1091_v25  ;;  %v992_v37 = vadd.f32 %v960_v11, %v891_v29  ;;  %v593_v36 = vadd.f32 %v561_v2, %v493_v33  ;;  %1632 = vrot.lane.b32.xlu0 %v1331_v41, %s3580_s10  ;;  %v1061_v46 = vmul.f32 %v3904_v51, %v1025_v43  ;;  %v1027_v29 = vld [vmem:[#allocation2 + $0xf1] sm:$0xff] }
  0x87   : > { %v1161_v52 = vmul.f32 %v3912_v56, %v1125_v44  ;;  %v462_v53 = vmul.f32 %v1023_v62, %v3857_v13  ;;  %v562_v8 = vmul.f32 %v1123_v35, %v3860_v14  ;;  %v892_v57 = vadd.f32 %v860_v27, %v792_v24 }
  0x88   : > { %1267 = vst.msk [vmem:[#allocation3 + $0xa9] sm:$0xff] %vm196_vm0, %v1191_v5  ;;  %v1092_v45 = vadd.f32 %v1060_v60, %v992_v37  ;;  %v693_v47 = vadd.f32 %v661_v28, %v593_v36  ;;  %v861_v59 = vmul.f32 %v1124_v10, %v3894_v42  ;;  %v962_v63 = vmul.f32 %v3902_v50, %v926_v61  ;;  %v928_v37 = vld [vmem:[#allocation2 + $0xf8] sm:$0xff] }
  0x89   : > { %v1062_v49 = vmul.f32 %v3904_v51, %v1026_v54  ;;  %v494_v55 = vadd.f32 %v462_v53, %v362_v40  ;;  %v662_v58 = vmul.f32 %v925_v17, %v3876_v31  ;;  %v993_v3 = vadd.f32 %v961_v34, %v892_v57  ;;  %v1028_v57 = vld [vmem:[#allocation2 + $0xf9] sm:$0xff] }
  0x8a   : > { %v1332_v1 = vld [vmem:[#allocation3 + $0x99] sm:$0xff]  ;;  %v1192_v62 = vadd.f32 %v1160_v26, %v1092_v45  ;;  %v793_v35 = vadd.f32 %v761_v39, %v693_v47  ;;  %v363_v48 = vmul.f32 %v924_v7, %v3855_v12  ;;  %v762_v38 = vmul.f32 %v1025_v43, %v3878_v32 }
  0x8b   : > { %1634 = vrot.lane.b32.xlu1 %v1332_v1, %s3580_s10  ;;  %v594_v6 = vadd.f32 %v562_v8, %v494_v55  ;;  %v463_v0 = vmul.f32 %v1024_v22, %v3857_v13  ;;  %v563_v9 = vmul.f32 %v1124_v10, %v3860_v14  ;;  %v1093_v11 = vadd.f32 %v1061_v46, %v993_v3  ;;  %v1127_v10 = vld [vmem:[#allocation2 + $0xf2] sm:$0xff] }
  0x8c   : > { %1268 = vst.msk [vmem:[#allocation3 + $0xb1] sm:$0xff] %vm196_vm0, %v1192_v62  ;;  %v893_v18 = vadd.f32 %v861_v59, %v793_v35  ;;  %v1162_v19 = vmul.f32 %v3912_v56, %v1126_v4  ;;  %v862_v20 = vmul.f32 %v1125_v44, %v3894_v42  ;;  %v963_v15 = vmul.f32 %v3902_v50, %v927_v21  ;;  %v1128_v62 = vld [vmem:[#allocation2 + $0xfa] sm:$0xff]  ;;  %v929_v35 = vld [vmem:[#allocation2 + $0x108] sm:$0xff] }
  0x8d   : > { %v694_v7 = vadd.f32 %v662_v58, %v594_v6  ;;  %v495_v16 = vadd.f32 %v463_v0, %v363_v48  ;;  %v663_v23 = vmul.f32 %v926_v61, %v3876_v31  ;;  %v1193_v60 = vadd.f32 %v1161_v52, %v1093_v11 }
  0x8e   : > { %v994_v27 = vadd.f32 %v962_v63, %v893_v18  ;;  %v763_v22 = vmul.f32 %v1026_v54, %v3878_v32  ;;  %v364_v2 = vmul.f32 %v925_v17, %v3855_v12  ;;  %v464_v33 = vmul.f32 %v1025_v43, %v3857_v13 }
  0x8f   : > { %v1333_v28 = vld [vmem:[#allocation3 + $0xa9] sm:$0xff]  ;;  %v794_v25 = vadd.f32 %v762_v38, %v694_v7  ;;  %v595_v30 = vadd.f32 %v563_v9, %v495_v16  ;;  %v564_v26 = vmul.f32 %v1125_v44, %v3860_v14  ;;  %1269 = vst.msk [vmem:[#allocation3 + $0xc1] sm:$0xff] %vm196_vm0, %v1193_v60  ;;  %v1063_v39 = vmul.f32 %v3904_v51, %v1027_v29 }
  0x90   : > { %1636 = vrot.lane.b32.xlu0 %v1333_v28, %s3580_s10  ;;  %v1094_v34 = vadd.f32 %v1062_v49, %v994_v27  ;;  %v1163_v40 = vmul.f32 %v3912_v56, %v1127_v10  ;;  %v863_v17 = vmul.f32 %v1126_v4, %v3894_v42  ;;  %v496_v24 = vadd.f32 %v464_v33, %v364_v2  ;;  %v930_v28 = vld [vmem:[#allocation2 + $0x110] sm:$0xff] }
  0x91   : > { %v894_v41 = vadd.f32 %v862_v20, %v794_v25  ;;  %v695_v5 = vadd.f32 %v663_v23, %v595_v30  ;;  %v664_v36 = vmul.f32 %v927_v21, %v3876_v31  ;;  %v964_v44 = vmul.f32 %v3902_v50, %v928_v37  ;;  %v1129_v20 = vld [vmem:[#allocation2 + $0x10a] sm:$0xff] }
  0x92   : > { %v1194_v43 = vadd.f32 %v1162_v19, %v1094_v34  ;;  %v764_v46 = vmul.f32 %v1027_v29, %v3878_v32  ;;  %v365_v52 = vmul.f32 %v926_v61, %v3855_v12  ;;  %v596_v47 = vadd.f32 %v564_v26, %v496_v24  ;;  %v1029_v19 = vld [vmem:[#allocation2 + $0x109] sm:$0xff]  ;;  %v1030_v25 = vld [vmem:[#allocation2 + $0x111] sm:$0xff] }
  0x93   : > { %v1334_v53 = vld [vmem:[#allocation3 + $0xb1] sm:$0xff]  ;;  %v995_v8 = vadd.f32 %v963_v15, %v894_v41  ;;  %v795_v45 = vadd.f32 %v763_v22, %v695_v5  ;;  %v465_v59 = vmul.f32 %v1026_v54, %v3857_v13  ;;  %v1064_v63 = vmul.f32 %v3904_v51, %v1028_v57  ;;  %v1130_v41 = vld [vmem:[#allocation2 + $0x112] sm:$0xff] }
  0x94   : > { %1638 = vrot.lane.b32.xlu1 %v1334_v53, %s3580_s10  ;;  %1270 = vst.msk [vmem:[#allocation3 + $0xc9] sm:$0xff] %vm196_vm0, %v1194_v43  ;;  %v864_v49 = vmul.f32 %v1127_v10, %v3894_v42  ;;  %v565_v55 = vmul.f32 %v1126_v4, %v3860_v14  ;;  %v665_v58 = vmul.f32 %v928_v37, %v3876_v31 }
  0x95   : > { %v1095_v61 = vadd.f32 %v1063_v39, %v995_v8  ;;  %v895_v1 = vadd.f32 %v863_v17, %v795_v45  ;;  %v696_v3 = vadd.f32 %v664_v36, %v596_v47  ;;  %v497_v48 = vadd.f32 %v465_v59, %v365_v52  ;;  %v931_v8 = vld [vmem:[#allocation2 + $0x120] sm:$0xff] }
  0x96   : > { %v1164_v54 = vmul.f32 %v3912_v56, %v1128_v62  ;;  %v965_v6 = vmul.f32 %v3902_v50, %v929_v35  ;;  %v765_v38 = vmul.f32 %v1028_v57, %v3878_v32  ;;  %v366_v0 = vmul.f32 %v927_v21, %v3855_v12  ;;  %v1335_v9 = vld [vmem:[#allocation3 + $0xc1] sm:$0xff] }
  0x97   : > { %v1195_v11 = vadd.f32 %v1163_v40, %v1095_v61  ;;  %v996_v18 = vadd.f32 %v964_v44, %v895_v1  ;;  %v796_v4 = vadd.f32 %v764_v46, %v696_v3  ;;  %v597_v7 = vadd.f32 %v565_v55, %v497_v48  ;;  %1640 = vrot.lane.b32.xlu0 %v1335_v9, %s3580_s10  ;;  %v1031_v1 = vld [vmem:[#allocation2 + $0x121] sm:$0xff] }
  0x98   : > { %v1065_v15 = vmul.f32 %v3904_v51, %v1029_v19  ;;  %v1165_v16 = vmul.f32 %v3912_v56, %v1129_v20  ;;  %v466_v23 = vmul.f32 %v1027_v29, %v3857_v13  ;;  %v566_v60 = vmul.f32 %v1127_v10, %v3860_v14 }
  0x99   : > { %1271 = vst.msk [vmem:[#allocation3 + $0xd9] sm:$0xff] %vm196_vm0, %v1195_v11  ;;  %v1096_v21 = vadd.f32 %v1064_v63, %v996_v18  ;;  %v896_v27 = vadd.f32 %v864_v49, %v796_v4  ;;  %v697_v22 = vadd.f32 %v665_v58, %v597_v7  ;;  %v865_v2 = vmul.f32 %v1128_v62, %v3894_v42  ;;  %v932_v18 = vld [vmem:[#allocation2 + $0x128] sm:$0xff] }
  0x9a   : > { %v966_v30 = vmul.f32 %v3902_v50, %v930_v28  ;;  %v1066_v33 = vmul.f32 %v3904_v51, %v1030_v25  ;;  %v498_v26 = vadd.f32 %v466_v23, %v366_v0  ;;  %v666_v34 = vmul.f32 %v929_v35, %v3876_v31 }
  0x9b   : > { %v1336_v39 = vld [vmem:[#allocation3 + $0xc9] sm:$0xff]  ;;  %v1196_v29 = vadd.f32 %v1164_v54, %v1096_v21  ;;  %v997_v40 = vadd.f32 %v965_v6, %v896_v27  ;;  %v797_v10 = vadd.f32 %v765_v38, %v697_v22  ;;  %v367_v17 = vmul.f32 %v928_v37, %v3855_v12  ;;  %v1032_v27 = vld [vmem:[#allocation2 + $0x129] sm:$0xff] }
  0x9c   : > { %1642 = vrot.lane.b32.xlu1 %v1336_v39, %s3580_s10  ;;  %v598_v5 = vadd.f32 %v566_v60, %v498_v26  ;;  %v766_v24 = vmul.f32 %v1029_v19, %v3878_v32  ;;  %v467_v36 = vmul.f32 %v1028_v57, %v3857_v13  ;;  %v567_v43 = vmul.f32 %v1128_v62, %v3860_v14  ;;  %v1131_v62 = vld [vmem:[#allocation2 + $0x122] sm:$0xff] }
  0x9d   : > { %1272 = vst.msk [vmem:[#allocation3 + $0xe1] sm:$0xff] %vm196_vm0, %v1196_v29  ;;  %v1097_v44 = vadd.f32 %v1065_v15, %v997_v40  ;;  %v897_v46 = vadd.f32 %v865_v2, %v797_v10  ;;  %v1166_v52 = vmul.f32 %v3912_v56, %v1130_v41  ;;  %v866_v53 = vmul.f32 %v1129_v20, %v3894_v42  ;;  %v1132_v29 = vld [vmem:[#allocation2 + $0x12a] sm:$0xff]  ;;  %v933_v10 = vld [vmem:[#allocation2 + $0x138] sm:$0xff] }
  0x9e   : > { %v698_v37 = vadd.f32 %v666_v34, %v598_v5  ;;  %v967_v45 = vmul.f32 %v3902_v50, %v931_v8  ;;  %v499_v47 = vadd.f32 %v467_v36, %v367_v17  ;;  %v667_v59 = vmul.f32 %v930_v28, %v3876_v31 }
  0x9f   : > { %v1197_v63 = vadd.f32 %v1165_v16, %v1097_v44  ;;  %v998_v49 = vadd.f32 %v966_v30, %v897_v46  ;;  %v767_v57 = vmul.f32 %v1030_v25, %v3878_v32  ;;  %v368_v55 = vmul.f32 %v929_v35, %v3855_v12 }
  0xa0   : > { %v1337_v58 = vld [vmem:[#allocation3 + $0xd9] sm:$0xff]  ;;  %v798_v61 = vadd.f32 %v766_v24, %v698_v37  ;;  %v599_v3 = vadd.f32 %v567_v43, %v499_v47  ;;  %v468_v48 = vmul.f32 %v1029_v19, %v3857_v13  ;;  %v568_v54 = vmul.f32 %v1129_v20, %v3860_v14 }
  0xa1   : > { %1644 = vrot.lane.b32.xlu0 %v1337_v58, %s3580_s10  ;;  %1273 = vst.msk [vmem:[#allocation3 + $0xf1] sm:$0xff] %vm196_vm0, %v1197_v63  ;;  %v1098_v6 = vadd.f32 %v1066_v33, %v998_v49  ;;  %v1067_v38 = vmul.f32 %v3904_v51, %v1031_v1  ;;  %v1167_v0 = vmul.f32 %v3912_v56, %v1131_v62  ;;  %v934_v58 = vld [vmem:[#allocation2 + $0x140] sm:$0xff] }
  0xa2   : > { %v867_v35 = vmul.f32 %v1130_v41, %v3894_v42  ;;  %v898_v9 = vadd.f32 %v866_v53, %v798_v61  ;;  %v699_v11 = vadd.f32 %v667_v59, %v599_v3  ;;  %v500_v4 = vadd.f32 %v468_v48, %v368_v55  ;;  %v1133_v53 = vld [vmem:[#allocation2 + $0x13a] sm:$0xff] }
  0xa3   : > { %v668_v7 = vmul.f32 %v931_v8, %v3876_v31  ;;  %v1198_v19 = vadd.f32 %v1166_v52, %v1098_v6  ;;  %v968_v20 = vmul.f32 %v3902_v50, %v932_v18  ;;  %v768_v15 = vmul.f32 %v1031_v1, %v3878_v32  ;;  %v1033_v52 = vld [vmem:[#allocation2 + $0x139] sm:$0xff]  ;;  %v1034_v61 = vld [vmem:[#allocation2 + $0x141] sm:$0xff] }
  0xa4   : > { %v369_v16 = vmul.f32 %v930_v28, %v3855_v12  ;;  %v1338_v23 = vld [vmem:[#allocation3 + $0xe1] sm:$0xff]  ;;  %v999_v60 = vadd.f32 %v967_v45, %v898_v9  ;;  %v799_v21 = vadd.f32 %v767_v57, %v699_v11  ;;  %v600_v22 = vadd.f32 %v568_v54, %v500_v4  ;;  %v1134_v9 = vld [vmem:[#allocation2 + $0x142] sm:$0xff] }
  0xa5   : > { %v469_v2 = vmul.f32 %v1030_v25, %v3857_v13  ;;  %1646 = vrot.lane.b32.xlu1 %v1338_v23, %s3580_s10  ;;  %1274 = vst.msk [vmem:[#allocation3 + $0xf9] sm:$0xff] %vm196_vm0, %v1198_v19  ;;  %v1068_v30 = vmul.f32 %v3904_v51, %v1032_v27  ;;  %v868_v33 = vmul.f32 %v1131_v62, %v3894_v42 }
  0xa6   : > { %v569_v26 = vmul.f32 %v1130_v41, %v3860_v14  ;;  %v669_v34 = vmul.f32 %v932_v18, %v3876_v31  ;;  %v1099_v28 = vadd.f32 %v1067_v38, %v999_v60  ;;  %v899_v39 = vadd.f32 %v867_v35, %v799_v21  ;;  %v935_v60 = vld [vmem:[#allocation2 + $0x150] sm:$0xff] }
  0xa7   : > { %v700_v40 = vadd.f32 %v668_v7, %v600_v22  ;;  %v501_v17 = vadd.f32 %v469_v2, %v369_v16  ;;  %v1168_v25 = vmul.f32 %v3912_v56, %v1132_v29  ;;  %v969_v5 = vmul.f32 %v3902_v50, %v933_v10 }
  0xa8   : > { %v769_v24 = vmul.f32 %v1032_v27, %v3878_v32  ;;  %v370_v36 = vmul.f32 %v931_v8, %v3855_v12  ;;  %v1339_v43 = vld [vmem:[#allocation3 + $0xf1] sm:$0xff]  ;;  %v1199_v44 = vadd.f32 %v1167_v0, %v1099_v28  ;;  %v1000_v46 = vadd.f32 %v968_v20, %v899_v39  ;;  %v1035_v39 = vld [vmem:[#allocation2 + $0x151] sm:$0xff] }
  0xa9   : > { %v800_v41 = vadd.f32 %v768_v15, %v700_v40  ;;  %v601_v37 = vadd.f32 %v569_v26, %v501_v17  ;;  %1648 = vrot.lane.b32.xlu0 %v1339_v43, %s3580_s10  ;;  %v1069_v45 = vmul.f32 %v3904_v51, %v1033_v52  ;;  %v1169_v47 = vmul.f32 %v3912_v56, %v1133_v53 }
  0xaa   : > { %v470_v59 = vmul.f32 %v1031_v1, %v3857_v13  ;;  %v570_v63 = vmul.f32 %v1131_v62, %v3860_v14  ;;  %1275 = vst.msk [vmem:[#allocation3 + $0x109] sm:$0xff] %vm196_vm0, %v1199_v44  ;;  %v1100_v8 = vadd.f32 %v1068_v30, %v1000_v46  ;;  %v869_v55 = vmul.f32 %v1132_v29, %v3894_v42  ;;  %v936_v46 = vld [vmem:[#allocation2 + $0x158] sm:$0xff] }
  0xab   : > { %v900_v49 = vadd.f32 %v868_v33, %v800_v41  ;;  %v701_v57 = vadd.f32 %v669_v34, %v601_v37  ;;  %v970_v3 = vmul.f32 %v3902_v50, %v934_v58  ;;  %v1070_v48 = vmul.f32 %v3904_v51, %v1034_v61 }
  0xac   : > { %v502_v54 = vadd.f32 %v470_v59, %v370_v36  ;;  %v670_v6 = vmul.f32 %v933_v10, %v3876_v31  ;;  %v1340_v38 = vld [vmem:[#allocation3 + $0xf9] sm:$0xff]  ;;  %v1200_v1 = vadd.f32 %v1168_v25, %v1100_v8  ;;  %v371_v35 = vmul.f32 %v932_v18, %v3855_v12 }
  0xad   : > { %v1001_v0 = vadd.f32 %v969_v5, %v900_v49  ;;  %v801_v62 = vadd.f32 %v769_v24, %v701_v57  ;;  %1650 = vrot.lane.b32.xlu1 %v1340_v38, %s3580_s10  ;;  %v770_v4 = vmul.f32 %v1033_v52, %v3878_v32  ;;  %v471_v7 = vmul.f32 %v1032_v27, %v3857_v13  ;;  %v1036_v49 = vld [vmem:[#allocation2 + $0x159] sm:$0xff] }
  0xae   : > { %v602_v11 = vadd.f32 %v570_v63, %v502_v54  ;;  %v571_v19 = vmul.f32 %v1132_v29, %v3860_v14  ;;  %1276 = vst.msk [vmem:[#allocation3 + $0x111] sm:$0xff] %vm196_vm0, %v1200_v1  ;;  %v1170_v16 = vmul.f32 %v3912_v56, %v1134_v9  ;;  %v870_v23 = vmul.f32 %v1133_v53, %v3894_v42  ;;  %v1135_v29 = vld [vmem:[#allocation2 + $0x152] sm:$0xff]  ;;  %v1136_v1 = vld [vmem:[#allocation2 + $0x15a] sm:$0xff] }
  0xaf   : > { %v1101_v20 = vadd.f32 %v1069_v45, %v1001_v0  ;;  %v901_v15 = vadd.f32 %v869_v55, %v801_v62  ;;  %v971_v21 = vmul.f32 %v3902_v50, %v935_v60  ;;  %v503_v22 = vadd.f32 %v471_v7, %v371_v35  ;;  %v937_v62 = vld [vmem:[#allocation2 + $0x168] sm:$0xff] }
  0xb0   : > { %v702_v18 = vadd.f32 %v670_v6, %v602_v11  ;;  %v671_v2 = vmul.f32 %v934_v58, %v3876_v31  ;;  %v771_v27 = vmul.f32 %v1034_v61, %v3878_v32  ;;  %v372_v26 = vmul.f32 %v933_v10, %v3855_v12 }
  0xb1   : > { %v1201_v30 = vadd.f32 %v1169_v47, %v1101_v20  ;;  %v1002_v33 = vadd.f32 %v970_v3, %v901_v15  ;;  %v1341_v34 = vld [vmem:[#allocation3 + $0x109] sm:$0xff]  ;;  %v603_v40 = vadd.f32 %v571_v19, %v503_v22  ;;  %v472_v17 = vmul.f32 %v1033_v52, %v3857_v13 }
  0xb2   : > { %v802_v28 = vadd.f32 %v770_v4, %v702_v18  ;;  %v572_v25 = vmul.f32 %v1133_v53, %v3860_v14  ;;  %1652 = vrot.lane.b32.xlu0 %v1341_v34, %s3580_s10  ;;  %v1071_v24 = vmul.f32 %v3904_v51, %v1035_v39  ;;  %v1171_v36 = vmul.f32 %v3912_v56, %v1135_v29 }
  0xb3   : > { %1277 = vst.msk [vmem:[#allocation3 + $0x121] sm:$0xff] %vm196_vm0, %v1201_v30  ;;  %v1102_v5 = vadd.f32 %v1070_v48, %v1002_v33  ;;  %v871_v10 = vmul.f32 %v1134_v9, %v3894_v42  ;;  %v703_v44 = vadd.f32 %v671_v2, %v603_v40  ;;  %v504_v41 = vadd.f32 %v472_v17, %v372_v26  ;;  %v1137_v33 = vld [vmem:[#allocation2 + $0x16a] sm:$0xff] }
  0xb4   : > { %v902_v43 = vadd.f32 %v870_v23, %v802_v28  ;;  %v672_v37 = vmul.f32 %v935_v60, %v3876_v31  ;;  %v972_v53 = vmul.f32 %v3902_v50, %v936_v46  ;;  %v772_v45 = vmul.f32 %v1035_v39, %v3878_v32  ;;  %v938_v26 = vld [vmem:[#allocation2 + $0x170] sm:$0xff] }
  0xb5   : > { %v1202_v52 = vadd.f32 %v1170_v16, %v1102_v5  ;;  %v373_v47 = vmul.f32 %v934_v58, %v3855_v12  ;;  %v1342_v59 = vld [vmem:[#allocation3 + $0x111] sm:$0xff]  ;;  %v803_v8 = vadd.f32 %v771_v27, %v703_v44  ;;  %v604_v57 = vadd.f32 %v572_v25, %v504_v41  ;;  %v1037_v16 = vld [vmem:[#allocation2 + $0x169] sm:$0xff] }
  0xb6   : > { %v1003_v63 = vadd.f32 %v971_v21, %v902_v43  ;;  %v473_v55 = vmul.f32 %v1034_v61, %v3857_v13  ;;  %1654 = vrot.lane.b32.xlu1 %v1342_v59, %s3580_s10  ;;  %v1072_v3 = vmul.f32 %v3904_v51, %v1036_v49  ;;  %v872_v48 = vmul.f32 %v1135_v29, %v3894_v42  ;;  %v939_v44 = vld [vmem:[#allocation2 + $0x180] sm:$0xff] }
  0xb7   : > { %1278 = vst.msk [vmem:[#allocation3 + $0x129] sm:$0xff] %vm196_vm0, %v1202_v52  ;;  %v573_v54 = vmul.f32 %v1134_v9, %v3860_v14  ;;  %v673_v6 = vmul.f32 %v936_v46, %v3876_v31  ;;  %v903_v38 = vadd.f32 %v871_v10, %v803_v8  ;;  %v704_v0 = vadd.f32 %v672_v37, %v604_v57 }
  0xb8   : > { %v1103_v58 = vadd.f32 %v1071_v24, %v1003_v63  ;;  %v505_v35 = vadd.f32 %v473_v55, %v373_v47  ;;  %v1172_v61 = vmul.f32 %v3912_v56, %v1136_v1  ;;  %v973_v11 = vmul.f32 %v3902_v50, %v937_v62  ;;  %v1138_v47 = vld [vmem:[#allocation2 + $0x172] sm:$0xff]  ;;  %v1039_v63 = vld [vmem:[#allocation2 + $0x181] sm:$0xff] }
  0xb9   : > { %v773_v4 = vmul.f32 %v1036_v49, %v3878_v32  ;;  %v374_v7 = vmul.f32 %v935_v60, %v3855_v12  ;;  %v1004_v15 = vadd.f32 %v972_v53, %v903_v38  ;;  %v804_v9 = vadd.f32 %v772_v45, %v704_v0 }
  0xba   : > { %v1343_v19 = vld [vmem:[#allocation3 + $0x121] sm:$0xff]  ;;  %v1203_v20 = vadd.f32 %v1171_v36, %v1103_v58  ;;  %v605_v23 = vadd.f32 %v573_v54, %v505_v35  ;;  %v1073_v18 = vmul.f32 %v3904_v51, %v1037_v16  ;;  %v474_v21 = vmul.f32 %v1035_v39, %v3857_v13  ;;  %v1139_v54 = vld [vmem:[#allocation2 + $0x182] sm:$0xff] }
  0xbb   : > { %1656 = vrot.lane.b32.xlu0 %v1343_v19, %s3580_s10  ;;  %v574_v22 = vmul.f32 %v1135_v29, %v3860_v14  ;;  %v1104_v2 = vadd.f32 %v1072_v3, %v1004_v15  ;;  %v904_v30 = vadd.f32 %v872_v48, %v804_v9  ;;  %v873_v27 = vmul.f32 %v1136_v1, %v3894_v42  ;;  %v1038_v36 = vld [vmem:[#allocation2 + $0x171] sm:$0xff] }
  0xbc   : > { %1279 = vst.msk [vmem:[#allocation3 + $0x139] sm:$0xff] %vm196_vm0, %v1203_v20  ;;  %v705_v60 = vadd.f32 %v673_v6, %v605_v23  ;;  %v1173_v34 = vmul.f32 %v3912_v56, %v1137_v33  ;;  %v974_v28 = vmul.f32 %v3902_v50, %v938_v26  ;;  %v506_v40 = vadd.f32 %v474_v21, %v374_v7  ;;  %v1040_v23 = vld [vmem:[#allocation2 + $0x189] sm:$0xff] }
  0xbd   : > { %v674_v17 = vmul.f32 %v937_v62, %v3876_v31  ;;  %v1204_v39 = vadd.f32 %v1172_v61, %v1104_v2  ;;  %v1005_v5 = vadd.f32 %v973_v11, %v904_v30  ;;  %v375_v24 = vmul.f32 %v936_v46, %v3855_v12  ;;  %v940_v11 = vld [vmem:[#allocation2 + $0x188] sm:$0xff] }
  0xbe   : > { %v1344_v25 = vld [vmem:[#allocation3 + $0x129] sm:$0xff]  ;;  %v805_v29 = vadd.f32 %v773_v4, %v705_v60  ;;  %v606_v10 = vadd.f32 %v574_v22, %v506_v40  ;;  %v774_v43 = vmul.f32 %v1037_v16, %v3878_v32  ;;  %v475_v41 = vmul.f32 %v1036_v49, %v3857_v13 }
  0xbf   : > { %1658 = vrot.lane.b32.xlu1 %v1344_v25, %s3580_s10  ;;  %v575_v37 = vmul.f32 %v1136_v1, %v3860_v14  ;;  %1280 = vst.msk [vmem:[#allocation3 + $0x141] sm:$0xff] %vm196_vm0, %v1204_v39  ;;  %v1105_v52 = vadd.f32 %v1073_v18, %v1005_v5  ;;  %v1074_v45 = vmul.f32 %v3904_v51, %v1038_v36  ;;  %v941_v25 = vld [vmem:[#allocation2 + $0x198] sm:$0xff] }
  0xc0   : > { %v905_v53 = vadd.f32 %v873_v27, %v805_v29  ;;  %v706_v59 = vadd.f32 %v674_v17, %v606_v10  ;;  %v874_v46 = vmul.f32 %v1137_v33, %v3894_v42  ;;  %v507_v8 = vadd.f32 %v475_v41, %v375_v24  ;;  %v1140_v27 = vld [vmem:[#allocation2 + $0x18a] sm:$0xff] }
  0xc1   : > { %v675_v57 = vmul.f32 %v938_v26, %v3876_v31  ;;  %v1205_v55 = vadd.f32 %v1173_v34, %v1105_v52  ;;  %v1174_v49 = vmul.f32 %v3912_v56, %v1138_v47  ;;  %v975_v48 = vmul.f32 %v3902_v50, %v939_v44 }
  0xc2   : > { %v1006_v3 = vadd.f32 %v974_v28, %v905_v53  ;;  %v806_v58 = vadd.f32 %v774_v43, %v706_v59  ;;  %v607_v38 = vadd.f32 %v575_v37, %v507_v8  ;;  %v775_v1 = vmul.f32 %v1038_v36, %v3878_v32  ;;  %v942_v53 = vld [vmem:[#allocation2 + $0x1a0] sm:$0xff] }
  0xc3   : > { %v1345_v6 = vld [vmem:[#allocation3 + $0x139] sm:$0xff]  ;;  %v376_v0 = vmul.f32 %v937_v62, %v3855_v12  ;;  %1281 = vst.msk [vmem:[#allocation3 + $0x151] sm:$0xff] %vm196_vm0, %v1205_v55  ;;  %v1075_v61 = vmul.f32 %v3904_v51, %v1039_v63  ;;  %v476_v4 = vmul.f32 %v1037_v16, %v3857_v13  ;;  %v576_v7 = vmul.f32 %v1137_v33, %v3860_v14  ;;  %v1042_v8 = vld [vmem:[#allocation2 + $0x1a1] sm:$0xff] }
  0xc4   : > { %1660 = vrot.lane.b32.xlu0 %v1345_v6, %s3580_s10  ;;  %v1106_v35 = vadd.f32 %v1074_v45, %v1006_v3  ;;  %v906_v19 = vadd.f32 %v874_v46, %v806_v58  ;;  %v1175_v20 = vmul.f32 %v3912_v56, %v1139_v54  ;;  %v707_v15 = vadd.f32 %v675_v57, %v607_v38  ;;  %v1141_v45 = vld [vmem:[#allocation2 + $0x19a] sm:$0xff] }
  0xc5   : > { %v875_v9 = vmul.f32 %v1138_v47, %v3894_v42  ;;  %v508_v18 = vadd.f32 %v476_v4, %v376_v0  ;;  %v676_v21 = vmul.f32 %v939_v44, %v3876_v31  ;;  %v377_v22 = vmul.f32 %v938_v26, %v3855_v12  ;;  %v1041_v44 = vld [vmem:[#allocation2 + $0x199] sm:$0xff] }
  0xc6   : > { %v1206_v62 = vadd.f32 %v1174_v49, %v1106_v35  ;;  %v1346_v2 = vld [vmem:[#allocation3 + $0x141] sm:$0xff]  ;;  %v1007_v30 = vadd.f32 %v975_v48, %v906_v19  ;;  %v807_v60 = vadd.f32 %v775_v1, %v707_v15  ;;  %v976_v16 = vmul.f32 %v3902_v50, %v940_v11  ;;  %v4331_v19 = vld [vmem:[#allocation3 + $0x32] sm:$0xff]  ;;  %v4339_v15 = vld [vmem:[#allocation3 + $0x4a] sm:$0xff] }
  0xc7   : > { %v477_v33 = vmul.f32 %v1038_v36, %v3857_v13  ;;  %1662 = vrot.lane.b32.xlu1 %v1346_v2, %s3580_s10  ;;  %v1076_v34 = vmul.f32 %v3904_v51, %v1040_v23  ;;  %v608_v28 = vadd.f32 %v576_v7, %v508_v18  ;;  %v776_v40 = vmul.f32 %v1039_v63, %v3878_v32  ;;  %v4324_v7 = vld [vmem:[#allocation3 + $0x1a] sm:$0xff]  ;;  %v1363_v2 = vld [vmem:[#allocation3 + $0x92] sm:$0xff] }
  0xc8   : > { %1282 = vst.msk [vmem:[#allocation3 + $0x159] sm:$0xff] %vm196_vm0, %v1206_v62  ;;  %v577_v17 = vmul.f32 %v1138_v47, %v3860_v14  ;;  %v1107_v12 = vadd.f32 %v1075_v61, %v1007_v30  ;;  %v907_v26 = vadd.f32 %v875_v9, %v807_v60  ;;  %v677_v5 = vmul.f32 %v940_v11, %v3876_v31  ;;  %v1351_v61 = vld [vmem:[#allocation3 + $0x2] sm:$0xff]  ;;  %v4345_v9 = vld [vmem:[#allocation3 + $0x52] sm:$0xff]  ;;  %v1360_v62 = vld [vmem:[#allocation3 + $0x6a] sm:$0xff] }
  0xc9   : > { %v509_v39 = vadd.f32 %v477_v33, %v377_v22  ;;  %v1176_v29 = vmul.f32 %v3912_v56, %v1140_v27  ;;  %v708_v13 = vadd.f32 %v676_v21, %v608_v28  ;;  %v876_v24 = vmul.f32 %v1139_v54, %v3894_v42  ;;  %v1142_v54 = vld [vmem:[#allocation2 + $0x1a2] sm:$0xff]  ;;  %v1361_v18 = vld [vmem:[#allocation3 + $0x7a] sm:$0xff]  ;;  %v4352_v21 = vpop.permute.xlu0 %1608  ;;  %v1362_v22 = vld [vmem:[#allocation3 + $0x82] sm:$0xff] }
  0xca   : > { %v1347_v36 = vld [vmem:[#allocation3 + $0x151] sm:$0xff]  ;;  %v1207_v10 = vadd.f32 %v1175_v20, %v1107_v12  ;;  %v1008_v43 = vadd.f32 %v976_v16, %v907_v26  ;;  %v777_v37 = vmul.f32 %v1040_v23, %v3878_v32  ;;  %v977_v52 = vmul.f32 %v3902_v50, %v941_v25  ;;  %v4337_v20 = vld [vmem:[#allocation3 + $0x3a] sm:$0xff]  ;;  %v1359_v23 = vld [vmem:[#allocation3 + $0x62] sm:$0xff]  ;;  %5615 = vst [vmem:[#allocation7_spill] sm:$0xff] %v4352_v21 }
  0xcb   : > { %v609_v41 = vadd.f32 %v577_v17, %v509_v39  ;;  %1664 = vrot.lane.b32.xlu0 %v1347_v36, %s3580_s10  ;;  %v808_v14 = vadd.f32 %v776_v40, %v708_v13  ;;  %v877_v59 = vmul.f32 %v1140_v27, %v3894_v42  ;;  %v1077_v63 = vmul.f32 %v3904_v51, %v1041_v44  ;;  %v1364_v60 = vld [vmem:[#allocation3 + $0x9a] sm:$0xff]  ;;  %v1365_v16 = vld [vmem:[#allocation3 + $0xaa] sm:$0xff]  ;;  %v1366_v33 = vld [vmem:[#allocation3 + $0xb2] sm:$0xff] }
  0xcc   : > { %1283 = vst.msk [vmem:[#allocation3 + $0x169] sm:$0xff] %vm196_vm0, %v1207_v10  ;;  %v1108_v31 = vadd.f32 %v1076_v34, %v1008_v43  ;;  %v978_v3 = vmul.f32 %v3902_v50, %v942_v53  ;;  %v1177_v48 = vmul.f32 %v3912_v56, %v1141_v45  ;;  %v1078_v42 = vmul.f32 %v3904_v51, %v1042_v8  ;;  %v1352_v51 = vld [vmem:[#allocation3 + $0xa] sm:$0xff]  ;;  %v1367_v34 = vld [vmem:[#allocation3 + $0xc2] sm:$0xff]  ;;  %v4368_v12 = vld [vmem:[#allocation3 + $0xda] sm:$0xff] }
  0xcd   : > { %v709_v47 = vadd.f32 %v677_v5, %v609_v41  ;;  %v908_v46 = vadd.f32 %v876_v24, %v808_v14  ;;  %v1178_v1 = vmul.f32 %v3912_v56, %v1142_v54  ;;  %v4329_v56 = vld [vmem:[#allocation3 + $0x22] sm:$0xff]  ;;  %v4358_v27 = vpop.permute.xlu0 %1610  ;;  %v1368_v17 = vld [vmem:[#allocation3 + $0xca] sm:$0xff]  ;;  %v4377_v39 = vld [vmem:[#allocation3 + $0xf2] sm:$0xff] }
  0xce   : > { %v1208_v55 = vadd.f32 %v1176_v29, %v1108_v31  ;;  %5617 = vst [vmem:[#allocation9_spill] sm:$0xff] %v4358_v27  ;;  %v4375_v25 = vld [vmem:[#allocation3 + $0xe2] sm:$0xff]  ;;  %v4385_v29 = vld [vmem:[#allocation3 + $0xfa] sm:$0xff]  ;;  %v4387_v13 = vld [vmem:[#allocation3 + $0x10a] sm:$0xff] }
  0xcf   : > { %v1348_v57 = vld [vmem:[#allocation3 + $0x159] sm:$0xff]  ;;  %v809_v32 = vadd.f32 %v777_v37, %v709_v47  ;;  %v1009_v49 = vadd.f32 %v977_v52, %v908_v46  ;;  %v4399_v43 = vld [vmem:[#allocation3 + $0x122] sm:$0xff]  ;;  %v4407_v41 = vld [vmem:[#allocation3 + $0x12a] sm:$0xff] }
  0xd0   : > { %1666 = vrot.lane.b32.xlu1 %v1348_v57, %s3580_s10  ;;  %1284 = vst.msk [vmem:[#allocation3 + $0x171] sm:$0xff] %vm196_vm0, %v1208_v55  ;;  %v4397_v10 = vld [vmem:[#allocation3 + $0x112] sm:$0xff]  ;;  %5620 = vst [vmem:[#allocation12_spill] sm:$0xff] %v4399_v43  ;;  %v1377_v37 = vld [vmem:[#allocation3 + $0x13a] sm:$0xff] }
  0xd1   : > { %v909_v6 = vadd.f32 %v877_v59, %v809_v32  ;;  %v1109_v58 = vadd.f32 %v1077_v63, %v1009_v49  ;;  %v4356_v30 = vpop.permute.xlu1 %1612  ;;  %5619 = vst [vmem:[#allocation11_spill] sm:$0xff] %v4397_v10  ;;  %5621 = vst [vmem:[#allocation13_spill] sm:$0xff] %v4407_v41  ;;  %v1378_v52 = vld [vmem:[#allocation3 + $0x142] sm:$0xff]  ;;  %v1379_v53 = vld [vmem:[#allocation3 + $0x152] sm:$0xff] }
  0xd2   : > { %5616 = vst [vmem:[#allocation8_spill] sm:$0xff] %v4356_v30  ;;  %v1380_v47 = vld [vmem:[#allocation3 + $0x15a] sm:$0xff]  ;;  %v4445_v54 = vld [vmem:[#allocation3 + $0x48] sm:$0xff] }
  0xd3   : > { %v1010_v38 = vadd.f32 %v978_v3, %v909_v6  ;;  %v1349_v0 = vld [vmem:[#allocation3 + $0x169] sm:$0xff]  ;;  %v1209_v35 = vadd.f32 %v1177_v48, %v1109_v58  ;;  %v4426_v57 = vld [vmem:[#allocation3 + $0x18] sm:$0xff]  ;;  %v4433_v32 = vld [vmem:[#allocation3 + $0x20] sm:$0xff] }
  0xd4   : > { %1668 = vrot.lane.b32.xlu0 %v1349_v0, %s3580_s10  ;;  %5622 = vst [vmem:[#allocation14_spill] sm:$0xff] %v4426_v57  ;;  %5623 = vst [vmem:[#allocation15_spill] sm:$0xff] %v4433_v32  ;;  %v4435_v3 = vld [vmem:[#allocation3 + $0x30] sm:$0xff]  ;;  %v4443_v48 = vld [vmem:[#allocation3 + $0x38] sm:$0xff] }
  0xd5   : > { %v1110_v50 = vadd.f32 %v1078_v42, %v1010_v38  ;;  %1285 = vst.msk [vmem:[#allocation3 + $0x181] sm:$0xff] %vm196_vm0, %v1209_v35  ;;  %v4362_v28 = vpop.permute.xlu1 %1614  ;;  %v4455_v58 = vld [vmem:[#allocation3 + $0x50] sm:$0xff]  ;;  %v4457_v38 = vld [vmem:[#allocation3 + $0x60] sm:$0xff]  ;;  %v4465_v0 = vld [vmem:[#allocation3 + $0x68] sm:$0xff] }
  0xd6   : > { %5618 = vst [vmem:[#allocation10_spill] sm:$0xff] %v4362_v28  ;;  %v4467_v35 = vld [vmem:[#allocation3 + $0x78] sm:$0xff]  ;;  %v4577_v21 = vld [vmem:[#allocation3 + $0x168] sm:$0xff] }
  0xd7   : > { %v1210_v11 = vadd.f32 %v1178_v1, %v1110_v50  ;;  %v1350_v4 = vld [vmem:[#allocation3 + $0x171] sm:$0xff]  ;;  %v4366_v40 = vpop.permute.xlu0 %1616 }
  0xd8   : > { %1670 = vrot.lane.b32.xlu1 %v1350_v4, %s3580_s10  ;;  %1736 = vrot.lane.b32.xlu0 %v1351_v61, %s3581_s13  ;;  %v1381_v59 = vld [vmem:[#allocation3 + $0x16a] sm:$0xff]  ;;  %v1382_v63 = vld [vmem:[#allocation3 + $0x172] sm:$0xff]  ;;  %v4475_v61 = vld [vmem:[#allocation3 + $0x80] sm:$0xff]  ;;  %s3521_s10 = scalar_lea.vmem %s3520_s9, 8192 }
  0xd9   : > { %1286 = vst.msk [vmem:[#allocation3 + $0x189] sm:$0xff] %vm196_vm0, %v1210_v11  ;;  %v4477_v11 = vld [vmem:[#allocation3 + $0x90] sm:$0xff] }
  0xda   : > { %v4373_v26 = vpop.permute.xlu1 %1618 }
  0xdc   : > { %1738 = vrot.lane.b32.xlu1 %v1352_v51, %s3581_s13  ;;  %1740 = vrot.lane.b32.xlu0 %v4324_v7, %s3581_s13 }
  0xde   : > { %v4379_v5 = vpop.permute.xlu0 %1620 }
  0xe0   : > { %1742 = vrot.lane.b32.xlu1 %v4329_v56, %s3581_s13  ;;  %1744 = vrot.lane.b32.xlu0 %v4331_v19, %s3581_s13 }
  0xe3   : > { %v4389_v24 = vpop.permute.xlu1 %1622 }
  0xe4   : > { %1746 = vrot.lane.b32.xlu1 %v4337_v20, %s3581_s13  ;;  %1748 = vrot.lane.b32.xlu0 %v4339_v15, %s3581_s13 }
  0xe8   : > { %1750 = vrot.lane.b32.xlu1 %v4345_v9, %s3581_s13  ;;  %1752 = vrot.lane.b32.xlu0 %v1359_v23, %s3581_s13  ;;  %v4395_v36 = vpop.permute.xlu0 %1624  ;;  %v4487_v23 = vld [vmem:[#allocation3 + $0x98] sm:$0xff] }
  0xec   : > { %1754 = vrot.lane.b32.xlu1 %v1360_v62, %s3581_s13  ;;  %1756 = vrot.lane.b32.xlu0 %v1361_v18, %s3581_s13  ;;  %v4405_v44 = vpop.permute.xlu1 %1626  ;;  %v4489_v62 = vld [vmem:[#allocation3 + $0xa8] sm:$0xff] }
  0xf0   : > { %1758 = vrot.lane.b32.xlu1 %v1362_v22, %s3581_s13  ;;  %1760 = vrot.lane.b32.xlu0 %v1363_v2, %s3581_s13  ;;  %v4497_v22 = vld [vmem:[#allocation3 + $0xb0] sm:$0xff]  ;;  %v4499_v2 = vld [vmem:[#allocation3 + $0xc0] sm:$0xff] }
  0xf1   : > { %v4409_v14 = vpop.permute.xlu0 %1628  ;;  %5631 = vst [vmem:[#allocation23_spill] sm:$0xff] %v4499_v2 }
  0xf4   : > { %1762 = vrot.lane.b32.xlu1 %v1364_v60, %s3581_s13  ;;  %1764 = vrot.lane.b32.xlu0 %v1365_v16, %s3581_s13  ;;  %v4414_v31 = vpop.permute.xlu1 %1630  ;;  %v4507_v16 = vld [vmem:[#allocation3 + $0xc8] sm:$0xff] }
  0xf5   : > { %5633 = vst [vmem:[#allocation25_spill] sm:$0xff] %v4507_v16 }
  0xf8   : > { %1766 = vrot.lane.b32.xlu1 %v1366_v33, %s3581_s13  ;;  %1768 = vrot.lane.b32.xlu0 %v1367_v34, %s3581_s13  ;;  %v4418_v45 = vpop.permute.xlu0 %1632  ;;  %v4509_v33 = vld [vmem:[#allocation3 + $0xd8] sm:$0xff] }
  0xf9   : > { %5634 = vst [vmem:[#allocation26_spill] sm:$0xff] %v4509_v33 }
  0xfc   : > { %1770 = vrot.lane.b32.xlu1 %v1368_v17, %s3581_s13  ;;  %1772 = vrot.lane.b32.xlu0 %v4368_v12, %s3581_s13 }
  0xfd   : > { %v4422_v46 = vpop.permute.xlu1 %1634 }
 0x100   : > { %1774 = vrot.lane.b32.xlu1 %v4375_v25, %s3581_s13  ;;  %1776 = vrot.lane.b32.xlu0 %v4377_v39, %s3581_s13 }
 0x102   : > { %v4424_v8 = vpop.permute.xlu0 %1636 }
 0x104   : > { %1778 = vrot.lane.b32.xlu1 %v4385_v29, %s3581_s13  ;;  %1780 = vrot.lane.b32.xlu0 %v4387_v13, %s3581_s13 }
 0x106   : > { %v4431_v55 = vpop.permute.xlu1 %1638 }
 0x108   : > { %1782 = vrot.lane.b32.xlu1 %v4397_v10, %s3581_s13  ;;  %1784 = vrot.lane.b32.xlu0 %v4399_v43, %s3581_s13 }
 0x109   : > { %v4441_v49 = vpop.permute.xlu0 %1640 }
 0x10a   : > { %5624 = vst [vmem:[#allocation16_spill] sm:$0xff] %v4441_v49  ;;  %v4575_v49 = vld [vmem:[#allocation3 + $0x158] sm:$0xff] }
 0x10b   : > { %5649 = vst [vmem:[#allocation41_spill] sm:$0xff] %v4575_v49 }
 0x10c   : > { %1786 = vrot.lane.b32.xlu1 %v4407_v41, %s3581_s13  ;;  %1788 = vrot.lane.b32.xlu0 %v1377_v37, %s3581_s13  ;;  %v4519_v37 = vld [vmem:[#allocation3 + $0xe0] sm:$0xff] }
 0x10d   : > { %5637 = vst [vmem:[#allocation29_spill] sm:$0xff] %v4519_v37 }
 0x10e   : > { %v4451_v6 = vpop.permute.xlu1 %1642 }
 0x10f   : > { %5625 = vst [vmem:[#allocation17_spill] sm:$0xff] %v4451_v6  ;;  %v4565_v6 = vld [vmem:[#allocation3 + $0x150] sm:$0xff] }
 0x110   : > { %1790 = vrot.lane.b32.xlu1 %v1378_v52, %s3581_s13  ;;  %1792 = vrot.lane.b32.xlu0 %v1379_v53, %s3581_s13  ;;  %v4521_v52 = vld [vmem:[#allocation3 + $0xf0] sm:$0xff]  ;;  %5646 = vst [vmem:[#allocation38_spill] sm:$0xff] %v4565_v6 }
 0x113   : > { %v4453_v42 = vpop.permute.xlu0 %1644 }
 0x114   : > { %1794 = vrot.lane.b32.xlu1 %v1380_v47, %s3581_s13  ;;  %1796 = vrot.lane.b32.xlu0 %v1381_v59, %s3581_s13  ;;  %5626 = vst [vmem:[#allocation18_spill] sm:$0xff] %v4453_v42  ;;  %v4529_v47 = vld [vmem:[#allocation3 + $0xf8] sm:$0xff]  ;;  %v4531_v59 = vld [vmem:[#allocation3 + $0x108] sm:$0xff] }
 0x115   : > { %v4553_v42 = vld [vmem:[#allocation3 + $0x138] sm:$0xff] }
 0x116   : > { %5643 = vst [vmem:[#allocation35_spill] sm:$0xff] %v4553_v42 }
 0x117   : > { %v4463_v1 = vpop.permute.xlu1 %1646 }
 0x118   : > { %1798 = vrot.lane.b32.xlu1 %v1382_v63, %s3581_s13  ;;  %1864 = vrot.lane.b32.xlu0 %v4426_v57, %s3582_s14  ;;  %5627 = vst [vmem:[#allocation19_spill] sm:$0xff] %v4463_v1  ;;  %v4539_v1 = vld [vmem:[#allocation3 + $0x110] sm:$0xff] }
 0x11b   : > { %v4473_v50 = vpop.permute.xlu0 %1648 }
 0x11c   : > { %1866 = vrot.lane.b32.xlu1 %v4433_v32, %s3582_s14  ;;  %1868 = vrot.lane.b32.xlu0 %v4435_v3, %s3582_s14 }
 0x11f   : > { %v4483_v4 = vpop.permute.xlu1 %1650 }
 0x120   : > { %1870 = vrot.lane.b32.xlu1 %v4443_v48, %s3582_s14  ;;  %1872 = vrot.lane.b32.xlu0 %v4445_v54, %s3582_s14  ;;  %5628 = vst [vmem:[#allocation20_spill] sm:$0xff] %v4483_v4 }
 0x124   : > { %1874 = vrot.lane.b32.xlu1 %v4455_v58, %s3582_s14  ;;  %1876 = vrot.lane.b32.xlu0 %v4457_v38, %s3582_s14  ;;  %v4485_v51 = vpop.permute.xlu0 %1652 }
 0x125   : > { %5629 = vst [vmem:[#allocation21_spill] sm:$0xff] %v4485_v51  ;;  %v2613_v51 = vsel %vm196_vm0, %v4487_v23, %v4422_v46  ;;  %v2615_v46 = vsel %vm196_vm0, %v4497_v22, %v4431_v55 }
 0x128   : > { %1878 = vrot.lane.b32.xlu1 %v4465_v0, %s3582_s14  ;;  %1880 = vrot.lane.b32.xlu0 %v4467_v35, %s3582_s14  ;;  %v4495_v18 = vpop.permute.xlu1 %1654 }
 0x129   : > { %5630 = vst [vmem:[#allocation22_spill] sm:$0xff] %v4495_v18  ;;  %v1432_v18 = vld [vmem:[#allocation3 + $0xe1] sm:$0xff] }
 0x12c   : > { %1882 = vrot.lane.b32.xlu1 %v4475_v61, %s3582_s14  ;;  %1884 = vrot.lane.b32.xlu0 %v4477_v11, %s3582_s14 }
 0x12d   : > { %v4505_v60 = vpop.permute.xlu0 %1656 }
 0x12e   : > { %5632 = vst [vmem:[#allocation24_spill] sm:$0xff] %v4505_v60 }
 0x130   : > { %1886 = vrot.lane.b32.xlu1 %v4487_v23, %s3582_s14  ;;  %1888 = vrot.lane.b32.xlu0 %v4489_v62, %s3582_s14 }
 0x131   : > { %v4515_v34 = vpop.permute.xlu1 %1658 }
 0x132   : > { %5635 = vst [vmem:[#allocation27_spill] sm:$0xff] %v4515_v34 }
 0x134   : > { %1890 = vrot.lane.b32.xlu1 %v4497_v22, %s3582_s14  ;;  %1892 = vrot.lane.b32.xlu0 %v4499_v2, %s3582_s14 }
 0x136   : > { %v4517_v17 = vpop.permute.xlu0 %1660 }
 0x137   : > { %5636 = vst [vmem:[#allocation28_spill] sm:$0xff] %v4517_v17 }
 0x138   : > { %1894 = vrot.lane.b32.xlu1 %v4507_v16, %s3582_s14  ;;  %1896 = vrot.lane.b32.xlu0 %v4509_v33, %s3582_s14  ;;  %v4551_v33 = vld [vmem:[#allocation3 + $0x128] sm:$0xff]  ;;  %v4563_v16 = vld [vmem:[#allocation3 + $0x140] sm:$0xff] }
 0x139   : > { %v4527_v53 = vpop.permute.xlu1 %1662  ;;  %5642 = vst [vmem:[#allocation34_spill] sm:$0xff] %v4551_v33  ;;  %5645 = vst [vmem:[#allocation37_spill] sm:$0xff] %v4563_v16 }
 0x13a   : > { %5638 = vst [vmem:[#allocation30_spill] sm:$0xff] %v4527_v53 }
 0x13c   : > { %1898 = vrot.lane.b32.xlu1 %v4519_v37, %s3582_s14  ;;  %1900 = vrot.lane.b32.xlu0 %v4521_v52, %s3582_s14  ;;  %v4541_v37 = vld [vmem:[#allocation3 + $0x120] sm:$0xff] }
 0x13d   : > { %v4537_v63 = vpop.permute.xlu0 %1664  ;;  %5640 = vst [vmem:[#allocation32_spill] sm:$0xff] %v4541_v37 }
 0x13e   : > { %5639 = vst [vmem:[#allocation31_spill] sm:$0xff] %v4537_v63  ;;  %v1417_v63 = vld [vmem:[#allocation3 + $0x31] sm:$0xff] }
 0x140   : > { %1902 = vrot.lane.b32.xlu1 %v4529_v47, %s3582_s14  ;;  %1904 = vrot.lane.b32.xlu0 %v4531_v59, %s3582_s14 }
 0x142   : > { %v4547_v32 = vpop.permute.xlu1 %1666 }
 0x143   : > { %5641 = vst [vmem:[#allocation33_spill] sm:$0xff] %v4547_v32  ;;  %v4587_v32 = vld [vmem:[#allocation3 + $0x170] sm:$0xff] }
 0x144   : > { %1906 = vrot.lane.b32.xlu1 %v4539_v1, %s3582_s14  ;;  %1908 = vrot.lane.b32.xlu0 %v4541_v37, %s3582_s14 }
 0x146   : > { %v4549_v28 = vpop.permute.xlu0 %1668 }
 0x148   : > { %1910 = vrot.lane.b32.xlu1 %v4551_v33, %s3582_s14  ;;  %1912 = vrot.lane.b32.xlu0 %v4553_v42, %s3582_s14  ;;  %v4606_v42 = vld [vmem:[#allocation3 + $0x49] sm:$0xff]  ;;  %v1431_v33 = vld [vmem:[#allocation3 + $0xd9] sm:$0xff] }
 0x14a   : > { %v4559_v57 = vpop.permute.xlu1 %1670  ;;  %v4561_v30 = vpop.permute.xlu0 %1736 }
 0x14b   : > { %5644 = vst [vmem:[#allocation36_spill] sm:$0xff] %v4561_v30  ;;  %v1413_v30 = vld [vmem:[#allocation3 + $0x180] sm:$0xff] }
 0x14c   : > { %1914 = vrot.lane.b32.xlu1 %v4563_v16, %s3582_s14  ;;  %1916 = vrot.lane.b32.xlu0 %v4565_v6, %s3582_s14 }
 0x14e   : > { %v4571_v27 = vpop.permute.xlu1 %1738  ;;  %v4573_v2 = vpop.permute.xlu0 %1740 }
 0x14f   : > { %5647 = vst [vmem:[#allocation39_spill] sm:$0xff] %v4571_v27  ;;  %5648 = vst [vmem:[#allocation40_spill] sm:$0xff] %v4573_v2  ;;  %v1414_v2 = vld [vmem:[#allocation3 + $0x188] sm:$0xff]  ;;  %v1415_v27 = vld [vmem:[#allocation3 + $0x19] sm:$0xff] }
 0x150   : > { %1918 = vrot.lane.b32.xlu1 %v4575_v49, %s3582_s14  ;;  %1920 = vrot.lane.b32.xlu0 %v4577_v21, %s3582_s14 }
 0x152   : > { %v4583_v41 = vpop.permute.xlu1 %1742  ;;  %v4585_v43 = vpop.permute.xlu0 %1744 }
 0x153   : > { %5650 = vst [vmem:[#allocation42_spill] sm:$0xff] %v4583_v41  ;;  %v1416_v41 = vld [vmem:[#allocation3 + $0x21] sm:$0xff] }
 0x154   : > { %1922 = vrot.lane.b32.xlu1 %v4587_v32, %s3582_s14  ;;  %1924 = vrot.lane.b32.xlu0 %v1413_v30, %s3582_s14  ;;  %v4604_v30 = vld [vmem:[#allocation3 + $0x39] sm:$0xff] }
 0x156   : > { %v4592_v6 = vpop.permute.xlu1 %1746  ;;  %v4594_v49 = vpop.permute.xlu0 %1748 }
 0x158   : > { %1926 = vrot.lane.b32.xlu1 %v1414_v2, %s3582_s14  ;;  %1992 = vrot.lane.b32.xlu0 %v1415_v27, %s3583_s20  ;;  %v4616_v27 = vld [vmem:[#allocation3 + $0x51] sm:$0xff]  ;;  %s188_s14 = sand.u32 1, %s3569_s16  }
 0x159   : > { %s5543_s19 = scalar_lea.sflag [#allocation5], %s188_s14 }
 0x15a   : > { %v4598_v16 = vpop.permute.xlu1 %1750  ;;  %v4600_v53 = vpop.permute.xlu0 %1752 }
 0x15c   : > { %1994 = vrot.lane.b32.xlu1 %v1416_v41, %s3583_s20  ;;  %1996 = vrot.lane.b32.xlu0 %v1417_v63, %s3583_s20  ;;  %v2612_v41 = vsel %vm196_vm0, %v4477_v11, %v4418_v45  ;;  %v2614_v45 = vsel %vm196_vm0, %v4489_v62, %v4424_v8 }
 0x15e   : > { %v4608_v17 = vpop.permute.xlu1 %1754  ;;  %v4610_v2 = vpop.permute.xlu0 %1756 }
 0x160   : > { %1998 = vrot.lane.b32.xlu1 %v4604_v30, %s3583_s20  ;;  %2000 = vrot.lane.b32.xlu0 %v4606_v42, %s3583_s20 }
 0x162   : > { %v4621_v34 = vpop.permute.xlu1 %1758  ;;  %v1761_v37 = vpop.permute.xlu0 %1760 }
 0x163   : > { %v4624_v60 = vsel %vm2632_vm3, %v2612_v41, %v1761_v37  ;;  %v2866_v41 = vld [vmem:[%s5587_s2 + $0x18] sm:$0xff] }
 0x164   : > { %2002 = vrot.lane.b32.xlu1 %v4616_v27, %s3583_s20  ;;  %2024 = vrot.lane.b32.xlu0 %v1431_v33, %s3583_s20  ;;  %v2865_v33 = vld [vmem:[%s5587_s2 + $0x10] sm:$0xff] }
 0x166   : > { %v1763_v11 = vpop.permute.xlu1 %1762  ;;  %v1765_v4 = vpop.permute.xlu0 %1764 }
 0x167   : > { %v4636_v10 = vsel %vm2632_vm3, %v2613_v51, %v1763_v11  ;;  %v4639_v37 = vsel %vm2632_vm3, %v2614_v45, %v1765_v4  ;;  %v1528_v45 = vld [vmem:[#allocation3 + $0xf1] sm:$0xff]  ;;  %v3456_v11 = vpack.c.bf16 %v2866_v41, %v2865_v33 }
 0x168   : > { %2026 = vrot.lane.b32.xlu1 %v1432_v18, %s3583_s20  ;;  %2120 = vrot.lane.b32.xlu0 %v4324_v7, %s3584_s22 }
 0x16a   : > { %v1767_v23 = vpop.permute.xlu1 %1766  ;;  %v4647_v8 = vpop.permute.xlu0 %1768 }
 0x16b   : > { %v4650_v62 = vsel %vm2632_vm3, %v2615_v46, %v1767_v23 }
 0x16c   : > { %2152 = vrot.lane.b32.xlu1 %v4368_v12, %s3584_s22  ;;  %2122 = vrot.lane.b32.xlu0 %v4329_v56, %s3584_s22  ;;  %v2863_v12 = vld [vmem:[%s5587_s2] sm:$0xff]  ;;  %v2864_v56 = vld [vmem:[%s5587_s2 + $0x8] sm:$0xff] }
 0x16e   : > { %v4656_v4 = vpop.permute.xlu1 %1770  ;;  %v4658_v51 = vpop.permute.xlu0 %1772 }
 0x16f   : > { %5651 = vst [vmem:[#allocation43_spill] sm:$0xff] %v4656_v4  ;;  %5652 = vst [vmem:[#allocation44_spill] sm:$0xff] %v4658_v51 }
 0x170   : > { %2154 = vrot.lane.b32.xlu1 %v4375_v25, %s3584_s22  ;;  %2248 = vrot.lane.b32.xlu0 %v4435_v3, %s3585_s23  ;;  %v3452_v25 = vpack.c.bf16 %v2864_v56, %v2863_v12  ;;  %v1529_v12 = vld [vmem:[#allocation3 + $0xf9] sm:$0xff] }
 0x172   : > { %v4664_v7 = vpop.permute.xlu1 %1774  ;;  %v4666_v55 = vpop.permute.xlu0 %1776  ;;  %3453 = vmatprep.subr.bf16.mxu0 %v3452_v25  ;;  %3460 = vmatprep.subr.bf16.mxu1 %v3452_v25 }
 0x173   : > { %5653 = vst [vmem:[#allocation45_spill] sm:$0xff] %v4664_v7  ;;  %3455 = vmatpush3.bf16.msra.mxu0 %v3452_v25  ;;  %3463 = vmatpush3.bf16.msra.mxu1 %v3452_v25  ;;  %v2631_v7 = vsel %vm196_vm0, %v4587_v32, %v4559_v57 }
 0x174   : > { %2280 = vrot.lane.b32.xlu1 %v4521_v52, %s3585_s23  ;;  %2250 = vrot.lane.b32.xlu0 %v4443_v48, %s3585_s23 }
 0x175   : > { %3457 = vmatprep.subr.bf16.mxu0 %v3456_v11  ;;  %3461 = vmatprep.subr.bf16.mxu1 %v3456_v11 }
 0x176   : > { %v4678_v18 = vpop.permute.xlu1 %1778  ;;  %v4680_v22 = vpop.permute.xlu0 %1780 }
 0x177   : > { %3459 = vmatpush3.bf16.msra.mxu0 %v3456_v11  ;;  %3464 = vmatpush3.bf16.msra.mxu1 %v3456_v11 }
 0x178   : > { %2282 = vrot.lane.b32.xlu1 %v4529_v47, %s3585_s23  ;;  %2376 = vrot.lane.b32.xlu0 %v1417_v63, %s3586_s5  ;;  %v2867_v63 = vld [vmem:[%s5587_s2 + $0x20] sm:$0xf] }
 0x179   : > { %3402 = vmatprep.subr.msk.mxu0 %vm2972_vm4, %v2867_v63  ;;  %3462 = vmatprep.subr.msk.mxu1 %vm2972_vm4, %v2867_v63 }
 0x17a   : > { %v4691_v46 = vpop.permute.xlu1 %1782  ;;  %v4693_v23 = vpop.permute.xlu0 %1784 }
 0x17b   : > { %3403 = vmatpush3.msk.msra.mxu0 %vm2972_vm4, %v2867_v63  ;;  %3465 = vmatpush3.msk.msra.mxu1 %vm2972_vm4, %v2867_v63 }
 0x17c   : > { %2408 = vrot.lane.b32.xlu1 %v1528_v45, %s3586_s5  ;;  %2028 = vrot.lane.b32.xlu0 %v1528_v45, %s3583_s20  ;;  %v2630_v45 = vsel %vm196_vm0, %v4577_v21, %v4549_v28 }
 0x17e   : > { %v4700_v56 = vpop.permute.xlu1 %1786  ;;  %v4702_v25 = vpop.permute.xlu0 %1788 }
 0x180   : > { %2378 = vrot.lane.b32.xlu1 %v4604_v30, %s3586_s5  ;;  %2410 = vrot.lane.b32.xlu0 %v1529_v12, %s3586_s5 }
 0x182   : > { %v4707_v33 = vpop.permute.xlu1 %1790  ;;  %v4709_v41 = vpop.permute.xlu0 %1792 }
 0x184   : > { %2504 = vrot.lane.b32.xlu1 %v4331_v19, %s3587_s12  ;;  %2536 = vrot.lane.b32.xlu0 %v4377_v39, %s3587_s12 }
 0x186   : > { %v4718_v30 = vpop.permute.xlu1 %1794  ;;  %v1797_v11 = vpop.permute.xlu0 %1796 }
 0x187   : > { %v4721_v63 = vsel %vm2632_vm3, %v2630_v45, %v1797_v11 }
 0x188   : > { %2030 = vrot.lane.b32.xlu1 %v1529_v12, %s3583_s20  ;;  %2124 = vrot.lane.b32.xlu0 %v4331_v19, %s3584_s22  ;;  %v2604_v19 = vsel %vm196_vm0, %v4435_v3, %v4366_v40  ;;  %v2606_v40 = vsel %vm196_vm0, %v4445_v54, %v4379_v5  ;;  %v2608_v5 = vsel %vm196_vm0, %v4457_v38, %v4395_v36 }
 0x189   : > { %v2639_v3 = vsel %vm2632_vm3, %v2606_v40, %v4594_v49  ;;  %v2610_v36 = vsel %vm196_vm0, %v4467_v35, %v4409_v14  ;;  %v1531_v14 = vld [vmem:[#allocation3 + $0x111] sm:$0xff] }
 0x18a   : > { %v1799_v51 = vpop.permute.xlu1 %1798  ;;  %v4729_v4 = vpop.permute.xlu0 %1864 }
 0x18b   : > { %v4732_v21 = vsel %vm2632_vm3, %v2631_v7, %v1799_v51 }
 0x18c   : > { %2156 = vrot.lane.b32.xlu1 %v4377_v39, %s3584_s22  ;;  %2506 = vrot.lane.b32.xlu0 %v4337_v20, %s3587_s12  ;;  %v2637_v39 = vsel %vm2632_vm3, %v2604_v19, %v4585_v43 }
 0x18e   : > { %v4738_v28 = vpop.permute.xlu1 %1866  ;;  %v4740_v12 = vpop.permute.xlu0 %1868 }
 0x190   : > { %2538 = vrot.lane.b32.xlu1 %v4385_v29, %s3587_s12  ;;  %2126 = vrot.lane.b32.xlu0 %v4337_v20, %s3584_s22  ;;  %v2605_v20 = vsel %vm196_vm0, %v4443_v48, %v4373_v26  ;;  %v2607_v26 = vsel %vm196_vm0, %v4455_v58, %v4389_v24  ;;  %v2641_v48 = vsel %vm2632_vm3, %v2608_v5, %v4600_v53 }
 0x191   : > { %v2638_v43 = vsel %vm2632_vm3, %v2605_v20, %v4592_v6  ;;  %v2640_v49 = vsel %vm2632_vm3, %v2607_v26, %v4598_v16  ;;  %v2609_v24 = vsel %vm196_vm0, %v4465_v0, %v4405_v44  ;;  %v2643_v53 = vsel %vm2632_vm3, %v2610_v36, %v4610_v2 }
 0x192   : > { %v4751_v57 = vpop.permute.xlu1 %1870  ;;  %v1873_v32 = vpop.permute.xlu0 %1872  ;;  %v2642_v16 = vsel %vm2632_vm3, %v2609_v24, %v4608_v17  ;;  %v2611_v44 = vsel %vm196_vm0, %v4475_v61, %v4414_v31 }
 0x193   : > { %v4754_v51 = vsel %vm2665_vm5, %v2637_v39, %v1873_v32  ;;  %v2644_v17 = vsel %vm2632_vm3, %v2611_v44, %v4621_v34 }
 0x194   : > { %2158 = vrot.lane.b32.xlu1 %v4385_v29, %s3584_s22  ;;  %2252 = vrot.lane.b32.xlu0 %v4445_v54, %s3585_s23 }
 0x196   : > { %v1875_v7 = vpop.permute.xlu1 %1874  ;;  %v1877_v45 = vpop.permute.xlu0 %1876 }
 0x197   : > { %v4771_v29 = vsel %vm2665_vm5, %v2638_v43, %v1875_v7  ;;  %v4774_v11 = vsel %vm2665_vm5, %v2639_v3, %v1877_v45 }
 0x198   : > { %2284 = vrot.lane.b32.xlu1 %v4531_v59, %s3585_s23  ;;  %2254 = vrot.lane.b32.xlu0 %v4455_v58, %s3585_s23  ;;  %v1530_v58 = vld [vmem:[#allocation3 + $0x109] sm:$0xff] }
 0x19a   : > { %v1879_v54 = vpop.permute.xlu1 %1878  ;;  %v1881_v6 = vpop.permute.xlu0 %1880 }
 0x19b   : > { %v4791_v19 = vsel %vm2665_vm5, %v2640_v49, %v1879_v54  ;;  %v4794_v39 = vsel %vm2665_vm5, %v2641_v48, %v1881_v6  ;;  %v5656_v6 = vld [vmem:[#allocation11_spill] sm:$0xff] }
 0x19c   : > { %2286 = vrot.lane.b32.xlu1 %v4539_v1, %s3585_s23  ;;  %2380 = vrot.lane.b32.xlu0 %v4606_v42, %s3586_s5 }
 0x19e   : > { %v1883_v32 = vpop.permute.xlu1 %1882  ;;  %v1885_v20 = vpop.permute.xlu0 %1884 }
 0x19f   : > { %v4811_v40 = vsel %vm2665_vm5, %v2642_v16, %v1883_v32  ;;  %v4814_v42 = vsel %vm2665_vm5, %v2643_v53, %v1885_v20 }
 0x1a0   : > { %2412 = vrot.lane.b32.xlu1 %v1530_v58, %s3586_s5  ;;  %2032 = vrot.lane.b32.xlu0 %v1530_v58, %s3583_s20 }
 0x1a2   : > { %v1887_v2 = vpop.permute.xlu1 %1886  ;;  %v1889_v43 = vpop.permute.xlu0 %1888 }
 0x1a3   : > { %v4824_v3 = vsel %vm2665_vm5, %v2644_v17, %v1887_v2  ;;  %v4828_v7 = vsel %vm2665_vm5, %v4624_v60, %v1889_v43  ;;  %v5663_v43 = vld [vmem:[#allocation34_spill] sm:$0xff] }
 0x1a4   : > { %2382 = vrot.lane.b32.xlu1 %v4616_v27, %s3586_s5  ;;  %2414 = vrot.lane.b32.xlu0 %v1531_v14, %s3586_s5 }
 0x1a6   : > { %v1891_v45 = vpop.permute.xlu1 %1890  ;;  %v1893_v31 = vpop.permute.xlu0 %1892 }
 0x1a7   : > { %v4835_v26 = vsel %vm2665_vm5, %v4636_v10, %v1891_v45  ;;  %v4839_v34 = vsel %vm2665_vm5, %v4639_v37, %v1893_v31  ;;  %v5664_v45 = vld [vmem:[#allocation28_spill] sm:$0xff] }
 0x1a8   : > { %5654 = vst [vmem:[#allocation46_spill] sm:$0xff] %v4839_v34  ;;  %2508 = vrot.lane.b32.xlu1 %v4339_v15, %s3587_s12  ;;  %2540 = vrot.lane.b32.xlu0 %v4387_v13, %s3587_s12 }
 0x1aa   : > { %v1895_v60 = vpop.permute.xlu1 %1894  ;;  %v4845_v27 = vpop.permute.xlu0 %1896 }
 0x1ab   : > { %v4849_v5 = vsel %vm2665_vm5, %v4650_v62, %v1895_v60  ;;  %v2620_v62 = vsel %vm196_vm0, %v4521_v52, %v4473_v50  ;;  %v5658_v50 = vld [vmem:[#allocation21_spill] sm:$0xff] }
 0x1ac   : > { %5655 = vst [vmem:[#allocation47_spill] sm:$0xff] %v4849_v5  ;;  %2034 = vrot.lane.b32.xlu1 %v1531_v14, %s3583_s20  ;;  %2128 = vrot.lane.b32.xlu0 %v4339_v15, %s3584_s22  ;;  %v2653_v49 = vsel %vm2632_vm3, %v2620_v62, %v4666_v55  ;;  %v2622_v52 = vsel %vm196_vm0, %v4531_v59, %v5658_v50  ;;  %v1516_v60 = vld [vmem:[#allocation3 + $0x61] sm:$0xff] }
 0x1ad   : > { %v2655_v36 = vsel %vm2632_vm3, %v2622_v52, %v4680_v22  ;;  %v5661_v22 = vld [vmem:[#allocation32_spill] sm:$0xff]  ;;  %v5667_v50 = vld [vmem:[#allocation37_spill] sm:$0xff]  ;;  %v5668_v52 = vld [vmem:[#allocation31_spill] sm:$0xff] }
 0x1ae   : > { %v4854_v10 = vpop.permute.xlu1 %1898  ;;  %v4856_v37 = vpop.permute.xlu0 %1900  ;;  %v1535_v5 = vld [vmem:[#allocation3 + $0x141] sm:$0xff] }
 0x1b0   : > { %2160 = vrot.lane.b32.xlu1 %v4387_v13, %s3584_s22  ;;  %2510 = vrot.lane.b32.xlu0 %v4345_v9, %s3587_s12  ;;  %v5657_v13 = vld [vmem:[#allocation20_spill] sm:$0xff] }
 0x1b1   : > { %v2621_v24 = vsel %vm196_vm0, %v4529_v47, %v5657_v13  ;;  %v5659_v47 = vld [vmem:[#allocation22_spill] sm:$0xff] }
 0x1b2   : > { %v4867_v48 = vpop.permute.xlu1 %1902  ;;  %v1905_v15 = vpop.permute.xlu0 %1904  ;;  %v2654_v55 = vsel %vm2632_vm3, %v2621_v24, %v4678_v18  ;;  %v2623_v59 = vsel %vm196_vm0, %v4539_v1, %v5659_v47  ;;  %v5660_v18 = vld [vmem:[#allocation24_spill] sm:$0xff]  ;;  %v5662_v1 = vld [vmem:[#allocation27_spill] sm:$0xff]  ;;  %v5666_v24 = vld [vmem:[#allocation30_spill] sm:$0xff] }
 0x1b3   : > { %v4870_v54 = vsel %vm2665_vm5, %v2653_v49, %v1905_v15  ;;  %v2624_v32 = vsel %vm196_vm0, %v5661_v22, %v5660_v18  ;;  %v2656_v20 = vsel %vm2632_vm3, %v2623_v59, %v4691_v46  ;;  %v2625_v46 = vsel %vm196_vm0, %v5663_v43, %v5662_v1 }
 0x1b4   : > { %2542 = vrot.lane.b32.xlu1 %v5656_v6, %s3587_s12  ;;  %2130 = vrot.lane.b32.xlu0 %v4345_v9, %s3584_s22  ;;  %v2657_v44 = vsel %vm2632_vm3, %v2624_v32, %v4693_v23  ;;  %v5665_v23 = vld [vmem:[#allocation35_spill] sm:$0xff]  ;;  %v2658_v62 = vsel %vm2632_vm3, %v2625_v46, %v4700_v56  ;;  %v2627_v56 = vsel %vm196_vm0, %v5667_v50, %v5666_v24  ;;  %v5670_v32 = vld [vmem:[#allocation33_spill] sm:$0xff] }
 0x1b5   : > { %v2626_v31 = vsel %vm196_vm0, %v5665_v23, %v5664_v45  ;;  %v1533_v46 = vld [vmem:[#allocation3 + $0x129] sm:$0xff] }
 0x1b6   : > { %v1907_v58 = vpop.permute.xlu1 %1906  ;;  %v1909_v16 = vpop.permute.xlu0 %1908  ;;  %v2659_v49 = vsel %vm2632_vm3, %v2626_v31, %v4702_v25  ;;  %v1548_v45 = vld [vmem:[#allocation3 + $0x62] sm:$0xff] }
 0x1b7   : > { %v4887_v53 = vsel %vm2665_vm5, %v2654_v55, %v1907_v58  ;;  %v4890_v9 = vsel %vm2665_vm5, %v2655_v36, %v1909_v16  ;;  %v5669_v55 = vld [vmem:[#allocation38_spill] sm:$0xff]  ;;  %v2660_v58 = vsel %vm2632_vm3, %v2627_v56, %v4707_v33 }
 0x1b8   : > { %2162 = vrot.lane.b32.xlu1 %v5656_v6, %s3584_s22  ;;  %2256 = vrot.lane.b32.xlu0 %v4457_v38, %s3585_s23  ;;  %v2628_v25 = vsel %vm196_vm0, %v5669_v55, %v5668_v52  ;;  %v1532_v36 = vld [vmem:[#allocation3 + $0x121] sm:$0xff]  ;;  %v1517_v33 = vld [vmem:[#allocation3 + $0x69] sm:$0xff] }
 0x1b9   : > { %v2661_v16 = vsel %vm2632_vm3, %v2628_v25, %v4709_v41 }
 0x1ba   : > { %v1911_v14 = vpop.permute.xlu1 %1910  ;;  %v1913_v17 = vpop.permute.xlu0 %1912 }
 0x1bb   : > { %v4907_v2 = vsel %vm2665_vm5, %v2656_v20, %v1911_v14  ;;  %v4910_v38 = vsel %vm2665_vm5, %v2657_v44, %v1913_v17  ;;  %v5671_v20 = vld [vmem:[#allocation41_spill] sm:$0xff] }
 0x1bc   : > { %2288 = vrot.lane.b32.xlu1 %v5661_v22, %s3585_s23  ;;  %2258 = vrot.lane.b32.xlu0 %v4465_v0, %s3585_s23  ;;  %v2629_v44 = vsel %vm196_vm0, %v5671_v20, %v5670_v32 }
 0x1bd   : > { %v2662_v41 = vsel %vm2632_vm3, %v2629_v44, %v4718_v30  ;;  %v1518_v44 = vld [vmem:[#allocation3 + $0x79] sm:$0xff] }
 0x1be   : > { %v1915_v15 = vpop.permute.xlu1 %1914  ;;  %v1917_v6 = vpop.permute.xlu0 %1916 }
 0x1bf   : > { %v4927_v13 = vsel %vm2665_vm5, %v2658_v62, %v1915_v15  ;;  %v4930_v0 = vsel %vm2665_vm5, %v2659_v49, %v1917_v6  ;;  %v5674_v49 = vld [vmem:[#allocation12_spill] sm:$0xff] }
 0x1c0   : > { %2290 = vrot.lane.b32.xlu1 %v5663_v43, %s3585_s23  ;;  %2384 = vrot.lane.b32.xlu0 %v1516_v60, %s3586_s5 }
 0x1c2   : > { %v1919_v47 = vpop.permute.xlu1 %1918  ;;  %v1921_v59 = vpop.permute.xlu0 %1920 }
 0x1c3   : > { %v4946_v18 = vsel %vm2665_vm5, %v2660_v58, %v1919_v47  ;;  %v4949_v22 = vsel %vm2665_vm5, %v2661_v16, %v1921_v59  ;;  %v1470_v58 = vld [vmem:[#allocation3 + $0x12a] sm:$0xff] }
 0x1c4   : > { %2416 = vrot.lane.b32.xlu1 %v1532_v36, %s3586_s5  ;;  %2004 = vrot.lane.b32.xlu0 %v1516_v60, %s3583_s20 }
 0x1c6   : > { %v1923_v14 = vpop.permute.xlu1 %1922  ;;  %v1925_v17 = vpop.permute.xlu0 %1924 }
 0x1c7   : > { %v4959_v1 = vsel %vm2665_vm5, %v2662_v41, %v1923_v14  ;;  %v4963_v43 = vsel %vm2665_vm5, %v4721_v63, %v1925_v17  ;;  %v1534_v14 = vld [vmem:[#allocation3 + $0x139] sm:$0xff] }
 0x1c8   : > { %5672 = vst [vmem:[#allocation11_spill] sm:$0xff] %v4963_v43  ;;  %2036 = vrot.lane.b32.xlu1 %v1532_v36, %s3583_s20  ;;  %2386 = vrot.lane.b32.xlu0 %v1517_v33, %s3586_s5  ;;  %v5675_v36 = vld [vmem:[#allocation13_spill] sm:$0xff] }
 0x1c9   : > { %v1550_v43 = vld [vmem:[#allocation3 + $0x7a] sm:$0xff] }
 0x1ca   : > { %v1927_v31 = vpop.permute.xlu1 %1926  ;;  %v1993_v60 = vpop.permute.xlu0 %1992 }
 0x1cb   : > { %v4969_v30 = vsel %vm2665_vm5, %v4732_v21, %v1927_v31  ;;  %v1549_v21 = vld [vmem:[#allocation3 + $0x6a] sm:$0xff] }
 0x1cc   : > { %5673 = vst [vmem:[#allocation20_spill] sm:$0xff] %v4969_v30  ;;  %2418 = vrot.lane.b32.xlu1 %v1533_v46, %s3586_s5  ;;  %2512 = vrot.lane.b32.xlu0 %v1548_v45, %s3587_s12  ;;  %v5676_v31 = vld [vmem:[#allocation7_spill] sm:$0xff] }
 0x1ce   : > { %v4973_v62 = vpop.permute.xlu1 %1994  ;;  %v4975_v63 = vpop.permute.xlu0 %1996 }
 0x1d0   : > { %2544 = vrot.lane.b32.xlu1 %v5674_v49, %s3587_s12  ;;  %2006 = vrot.lane.b32.xlu0 %v1517_v33, %s3583_s20 }
 0x1d2   : > { %v4980_v15 = vpop.permute.xlu1 %1998  ;;  %v4982_v6 = vpop.permute.xlu0 %2000 }
 0x1d4   : > { %2038 = vrot.lane.b32.xlu1 %v1533_v46, %s3583_s20  ;;  %2132 = vrot.lane.b32.xlu0 %v1548_v45, %s3584_s22  ;;  %v1519_v46 = vld [vmem:[#allocation3 + $0x81] sm:$0xff] }
 0x1d6   : > { %v4986_v24 = vpop.permute.xlu1 %2002  ;;  %v2025_v56 = vpop.permute.xlu0 %2024 }
 0x1d8   : > { %2164 = vrot.lane.b32.xlu1 %v5674_v49, %s3584_s22  ;;  %2514 = vrot.lane.b32.xlu0 %v1549_v21, %s3587_s12 }
 0x1da   : > { %v4991_v52 = vpop.permute.xlu1 %2026  ;;  %v2121_v25 = vpop.permute.xlu0 %2120 }
 0x1dc   : > { %2546 = vrot.lane.b32.xlu1 %v5675_v36, %s3587_s12  ;;  %2134 = vrot.lane.b32.xlu0 %v1549_v21, %s3584_s22  ;;  %v5677_v21 = vld [vmem:[#allocation16_spill] sm:$0xff] }
 0x1de   : > { %v2153_v16 = vpop.permute.xlu1 %2152  ;;  %v4996_v47 = vpop.permute.xlu0 %2122 }
 0x1e0   : > { %2166 = vrot.lane.b32.xlu1 %v1470_v58, %s3584_s22  ;;  %2260 = vrot.lane.b32.xlu0 %v4467_v35, %s3585_s23  ;;  %v5679_v58 = vld [vmem:[#allocation36_spill] sm:$0xff] }
 0x1e2   : > { %v5001_v59 = vpop.permute.xlu1 %2154  ;;  %v2249_v32 = vpop.permute.xlu0 %2248 }
 0x1e4   : > { %2292 = vrot.lane.b32.xlu1 %v5665_v23, %s3585_s23  ;;  %2262 = vrot.lane.b32.xlu0 %v4475_v61, %s3585_s23  ;;  %v1287_v23 = vld [vmem:[#allocation3] sm:$0xff] }
 0x1e5   : > { %v2600_v49 = vsel %vm196_vm0, %v1287_v23, %v5676_v31 }
 0x1e6   : > { %v2281_v33 = vpop.permute.xlu1 %2280  ;;  %v2251_v41 = vpop.permute.xlu0 %2250 }
 0x1e8   : > { %2294 = vrot.lane.b32.xlu1 %v5667_v50, %s3585_s23  ;;  %2388 = vrot.lane.b32.xlu0 %v1518_v44, %s3586_s5  ;;  %v5678_v50 = vld [vmem:[#allocation23_spill] sm:$0xff] }
 0x1e9   : > { %v2616_v36 = vsel %vm196_vm0, %v5678_v50, %v5677_v21 }
 0x1ea   : > { %v5010_v17 = vpop.permute.xlu1 %2282  ;;  %v2377_v35 = vpop.permute.xlu0 %2376  ;;  %v2649_v30 = vsel %vm2632_vm3, %v2616_v36, %v4647_v8  ;;  %v1566_v36 = vld [vmem:[#allocation3 + $0x13a] sm:$0xff] }
 0x1eb   : > { %v2682_v31 = vsel %vm2665_vm5, %v2649_v30, %v4845_v27 }
 0x1ec   : > { %2420 = vrot.lane.b32.xlu1 %v1534_v14, %s3586_s5  ;;  %2008 = vrot.lane.b32.xlu0 %v1518_v44, %s3583_s20  ;;  %v2633_v44 = vsel %vm2632_vm3, %v2600_v49, %v5679_v58  ;;  %v2715_v34 = vsel %vm2698_vm6, %v2682_v31, %v2025_v56 }
 0x1ed   : > { %v2666_v23 = vsel %vm2665_vm5, %v2633_v44, %v4729_v4  ;;  %v2748_v8 = vsel %vm2731_vm7, %v2715_v34, %v2153_v16  ;;  %v1288_v4 = vld [vmem:[#allocation3 + $0x8] sm:$0xff]  ;;  %v5680_v16 = vld [vmem:[#allocation9_spill] sm:$0xff] }
 0x1ee   : > { %v2409_v45 = vpop.permute.xlu1 %2408  ;;  %v5014_v61 = vpop.permute.xlu0 %2028  ;;  %v2699_v50 = vsel %vm2698_vm6, %v2666_v23, %v1993_v60  ;;  %v2781_v30 = vsel %vm2764_vm8, %v2748_v8, %v2281_v33  ;;  %v2601_v23 = vsel %vm196_vm0, %v1288_v4, %v5680_v16  ;;  %v5683_v8 = vld [vmem:[#allocation25_spill] sm:$0xff] }
 0x1ef   : > { %v2732_v49 = vsel %vm2731_vm7, %v2699_v50, %v2121_v25  ;;  %v2814_v56 = vsel %vm2797_vm9, %v2781_v30, %v2409_v45 }
 0x1f0   : > { %2040 = vrot.lane.b32.xlu1 %v1534_v14, %s3583_s20  ;;  %2390 = vrot.lane.b32.xlu0 %v1519_v46, %s3586_s5  ;;  %v2765_v27 = vsel %vm2764_vm8, %v2732_v49, %v2249_v32  ;;  %v5681_v32 = vld [vmem:[#allocation39_spill] sm:$0xff]  ;;  %v5682_v49 = vld [vmem:[#allocation17_spill] sm:$0xff] }
 0x1f1   : > { %v2798_v60 = vsel %vm2797_vm9, %v2765_v27, %v2377_v35  ;;  %v2634_v33 = vsel %vm2632_vm3, %v2601_v23, %v5681_v32  ;;  %v5684_v27 = vld [vmem:[#allocation43_spill] sm:$0xff] }
 0x1f2   : > { %v2379_v21 = vpop.permute.xlu1 %2378  ;;  %v2411_v14 = vpop.permute.xlu0 %2410  ;;  %v2667_v35 = vsel %vm2665_vm5, %v2634_v33, %v4738_v28  ;;  %v1520_v32 = vld [vmem:[#allocation3 + $0x91] sm:$0xff] }
 0x1f3   : > { %v2700_v50 = vsel %vm2698_vm6, %v2667_v35, %v4973_v62 }
 0x1f4   : > { %2422 = vrot.lane.b32.xlu1 %v1535_v5, %s3586_s5  ;;  %2516 = vrot.lane.b32.xlu0 %v1550_v43, %s3587_s12  ;;  %v2733_v4 = vsel %vm2731_vm7, %v2700_v50, %v4996_v47  ;;  %v1536_v50 = vld [vmem:[#allocation3 + $0x151] sm:$0xff] }
 0x1f5   : > { %v2766_v30 = vsel %vm2764_vm8, %v2733_v4, %v2251_v41  ;;  %v5686_v4 = vld [vmem:[#allocation14_spill] sm:$0xff] }
 0x1f6   : > { %v2505_v58 = vpop.permute.xlu1 %2504  ;;  %v2537_v44 = vpop.permute.xlu0 %2536 }
 0x1f7   : > { %v2831_v34 = vsel %vm2830_vm10, %v2798_v60, %v2505_v58  ;;  %v2847_v25 = vsel %vm2830_vm10, %v2814_v56, %v2537_v44  ;;  %v1551_v60 = vld [vmem:[#allocation3 + $0x82] sm:$0xff]  ;;  %v2799_v56 = vsel %vm2797_vm9, %v2766_v30, %v2379_v21 }
 0x1f8   : > { %2548 = vrot.lane.b32.xlu1 %v1566_v36, %s3587_s12  ;;  %2010 = vrot.lane.b32.xlu0 %v1519_v46, %s3583_s20  ;;  %v2617_v46 = vsel %vm196_vm0, %v5683_v8, %v5682_v49 }
 0x1f9   : > { %3404 = vmatprep.mubr.msk.f32.mxu0 %vm2875_vm11, %v2831_v34  ;;  %3428 = vmatprep.mubr.msk.f32.mxu1 %vm2875_vm11, %v2847_v25  ;;  %v2650_v28 = vsel %vm2632_vm3, %v2617_v46, %v5684_v27  ;;  %v5685_v46 = vld [vmem:[#allocation8_spill] sm:$0xff] }
 0x1fa   : > { %v5053_v45 = vpop.permute.xlu1 %2030  ;;  %v2125_v31 = vpop.permute.xlu0 %2124  ;;  %v2683_v62 = vsel %vm2665_vm5, %v2650_v28, %v4854_v10  ;;  %v1567_v10 = vld [vmem:[#allocation3 + $0x142] sm:$0xff]  ;;  %v2602_v27 = vsel %vm196_vm0, %v5686_v4, %v5685_v46 }
 0x1fb   : > { %v2716_v47 = vsel %vm2698_vm6, %v2683_v62, %v4991_v52  ;;  %v5687_v28 = vld [vmem:[#allocation18_spill] sm:$0xff]  ;;  %v5690_v62 = vld [vmem:[#allocation44_spill] sm:$0xff] }
 0x1fc   : > { %2042 = vrot.lane.b32.xlu1 %v1535_v5, %s3583_s20  ;;  %2136 = vrot.lane.b32.xlu0 %v1550_v43, %s3584_s22  ;;  %v2749_v43 = vsel %vm2731_vm7, %v2716_v47, %v5001_v59  ;;  %v1488_v59 = vld [vmem:[#allocation3 + $0x90] sm:$0xff]  ;;  %v5691_v4 = vld [vmem:[#allocation10_spill] sm:$0xff] }
 0x1fd   : > { %v2782_v41 = vsel %vm2764_vm8, %v2749_v43, %v5010_v17 }
 0x1fe   : > { %v2157_v58 = vpop.permute.xlu1 %2156  ;;  %v2507_v44 = vpop.permute.xlu0 %2506  ;;  %v2815_v21 = vsel %vm2797_vm9, %v2782_v41, %v2411_v14  ;;  %v1489_v14 = vld [vmem:[#allocation3 + $0x98] sm:$0xff] }
 0x1ff   : > { %v2832_v5 = vsel %vm2830_vm10, %v2799_v56, %v2507_v44  ;;  %v1521_v44 = vld [vmem:[#allocation3 + $0x99] sm:$0xff] }
 0x200   : > { %2168 = vrot.lane.b32.xlu1 %v1566_v36, %s3584_s22  ;;  %2518 = vrot.lane.b32.xlu0 %v1551_v60, %s3587_s12 }
 0x201   : > { %3405 = vmatmul.mubr.msk.f32.vlgmr.msra.gmra.mrb[0].mxu0 %vm2875_vm11, %v2832_v5 }
 0x202   : > { %v2539_v34 = vpop.permute.xlu1 %2538  ;;  %v5081_v25 = vpop.permute.xlu0 %2126 }
 0x203   : > { %v2848_v52 = vsel %vm2830_vm10, %v2815_v21, %v2539_v34 }
 0x204   : > { %2550 = vrot.lane.b32.xlu1 %v1567_v10, %s3587_s12  ;;  %2138 = vrot.lane.b32.xlu0 %v1551_v60, %s3584_s22  ;;  %v5689_v60 = vld [vmem:[#allocation40_spill] sm:$0xff] }
 0x205   : > { %3429 = vmatmul.mubr.msk.f32.vlgmr.msra.gmra.mrb[0].mxu1 %vm2875_vm11, %v2848_v52 }
 0x206   : > { %v5087_v36 = vpop.permute.xlu1 %2158  ;;  %v2253_v17 = vpop.permute.xlu0 %2252 }
 0x208   : > { %2170 = vrot.lane.b32.xlu1 %v1567_v10, %s3584_s22  ;;  %2264 = vrot.lane.b32.xlu0 %v1488_v59, %s3585_s23  ;;  %v1537_v59 = vld [vmem:[#allocation3 + $0x159] sm:$0xff] }
 0x20a   : > { %v2285_v16 = vpop.permute.xlu1 %2284  ;;  %v2255_v23 = vpop.permute.xlu0 %2254 }
 0x20c   : > { %2296 = vrot.lane.b32.xlu1 %v5669_v55, %s3585_s23  ;;  %2266 = vrot.lane.b32.xlu0 %v1489_v14, %s3585_s23  ;;  %v5688_v55 = vld [vmem:[#allocation26_spill] sm:$0xff]  ;;  %v1552_v14 = vld [vmem:[#allocation3 + $0x92] sm:$0xff] }
 0x20d   : > { %v2618_v30 = vsel %vm196_vm0, %v5688_v55, %v5687_v28 }
 0x20e   : > { %v2287_v33 = vpop.permute.xlu1 %2286  ;;  %v2381_v35 = vpop.permute.xlu0 %2380  ;;  %v2651_v56 = vsel %vm2632_vm3, %v2618_v30, %v5690_v62 }
 0x20f   : > { %v2684_v5 = vsel %vm2665_vm5, %v2651_v56, %v4856_v37 }
 0x210   : > { %2298 = vrot.lane.b32.xlu1 %v5671_v20, %s3585_s23  ;;  %2392 = vrot.lane.b32.xlu0 %v1520_v32, %s3586_s5  ;;  %v2635_v20 = vsel %vm2632_vm3, %v2602_v27, %v5689_v60  ;;  %v2717_v21 = vsel %vm2698_vm6, %v2684_v5, %v5014_v61  ;;  %v5694_v60 = vld [vmem:[#allocation19_spill] sm:$0xff] }
 0x211   : > { %v2668_v47 = vsel %vm2665_vm5, %v2635_v20, %v4740_v12  ;;  %v2750_v52 = vsel %vm2731_vm7, %v2717_v21, %v2157_v58  ;;  %v5695_v20 = vld [vmem:[#allocation29_spill] sm:$0xff] }
 0x212   : > { %v2413_v49 = vpop.permute.xlu1 %2412  ;;  %v5097_v8 = vpop.permute.xlu0 %2032  ;;  %v2701_v10 = vsel %vm2698_vm6, %v2668_v47, %v4975_v63  ;;  %v2783_v37 = vsel %vm2764_vm8, %v2750_v52, %v2285_v16  ;;  %v2619_v62 = vsel %vm196_vm0, %v5695_v20, %v5694_v60  ;;  %v5696_v47 = vld [vmem:[#allocation45_spill] sm:$0xff]  ;;  %v1523_v20 = vld [vmem:[#allocation3 + $0xb1] sm:$0xff] }
 0x213   : > { %v2734_v34 = vsel %vm2731_vm7, %v2701_v10, %v2125_v31  ;;  %v2816_v63 = vsel %vm2797_vm9, %v2783_v37, %v2413_v49 }
 0x214   : > { %2424 = vrot.lane.b32.xlu1 %v1536_v50, %s3586_s5  ;;  %2012 = vrot.lane.b32.xlu0 %v1520_v32, %s3583_s20  ;;  %v2767_v12 = vsel %vm2764_vm8, %v2734_v34, %v2253_v17  ;;  %v5693_v17 = vld [vmem:[#allocation42_spill] sm:$0xff] }
 0x215   : > { %v2800_v32 = vsel %vm2797_vm9, %v2767_v12, %v2381_v35  ;;  %v1568_v35 = vld [vmem:[#allocation3 + $0x152] sm:$0xff] }
 0x216   : > { %v2383_v43 = vpop.permute.xlu1 %2382  ;;  %v2415_v41 = vpop.permute.xlu0 %2414 }
 0x218   : > { %2044 = vrot.lane.b32.xlu1 %v1536_v50, %s3583_s20  ;;  %2394 = vrot.lane.b32.xlu0 %v1521_v44, %s3586_s5  ;;  %v5692_v50 = vld [vmem:[#allocation15_spill] sm:$0xff] }
 0x219   : > { %v2603_v27 = vsel %vm196_vm0, %v5692_v50, %v5691_v4  ;;  %v1522_v4 = vld [vmem:[#allocation3 + $0xa9] sm:$0xff] }
 0x21a   : > { %v2509_v46 = vpop.permute.xlu1 %2508  ;;  %v2541_v61 = vpop.permute.xlu0 %2540  ;;  %v2636_v16 = vsel %vm2632_vm3, %v2603_v27, %v5693_v17  ;;  %v1538_v17 = vld [vmem:[#allocation3 + $0x169] sm:$0xff] }
 0x21b   : > { %v2833_v31 = vsel %vm2830_vm10, %v2800_v32, %v2509_v46  ;;  %v2849_v58 = vsel %vm2830_vm10, %v2816_v63, %v2541_v61  ;;  %v2669_v49 = vsel %vm2665_vm5, %v2636_v16, %v4751_v57  ;;  %v2652_v57 = vsel %vm2632_vm3, %v2619_v62, %v5696_v47  ;;  %v1506_v63 = vld [vmem:[#allocation3 + $0x168] sm:$0xff]  ;;  %v1491_v46 = vld [vmem:[#allocation3 + $0xb0] sm:$0xff] }
 0x21c   : > { %2426 = vrot.lane.b32.xlu1 %v1537_v59, %s3586_s5  ;;  %2520 = vrot.lane.b32.xlu0 %v1552_v14, %s3587_s12  ;;  %v2702_v30 = vsel %vm2698_vm6, %v2669_v49, %v4980_v15  ;;  %v2685_v10 = vsel %vm2665_vm5, %v2652_v57, %v4867_v48  ;;  %v1553_v48 = vld [vmem:[#allocation3 + $0x9a] sm:$0xff]  ;;  %v2703_v49 = vsel %vm2698_vm6, %v4754_v51, %v4982_v6 }
 0x21d   : > { %3407 = vmatprep.mubr.msk.f32.mxu0 %vm2875_vm11, %v2833_v31  ;;  %3431 = vmatprep.mubr.msk.f32.mxu1 %vm2875_vm11, %v2849_v58  ;;  %v2735_v56 = vsel %vm2731_vm7, %v2702_v30, %v5081_v25  ;;  %v2718_v52 = vsel %vm2698_vm6, %v2685_v10, %v5053_v45  ;;  %v1507_v58 = vld [vmem:[#allocation3 + $0x170] sm:$0xff]  ;;  %v2719_v57 = vsel %vm2698_vm6, %v4870_v54, %v5097_v8 }
 0x21e   : > { %v5140_v28 = vpop.permute.xlu1 %2034  ;;  %v2129_v55 = vpop.permute.xlu0 %2128  ;;  %v2768_v5 = vsel %vm2764_vm8, %v2735_v56, %v2255_v23  ;;  %v1554_v10 = vld [vmem:[#allocation3 + $0xaa] sm:$0xff] }
 0x21f   : > { %v2801_v15 = vsel %vm2797_vm9, %v2768_v5, %v2383_v43  ;;  %v2736_v30 = vsel %vm2731_vm7, %v2703_v49, %v2129_v55  ;;  %v1539_v55 = vld [vmem:[#allocation3 + $0x171] sm:$0xff]  ;;  %v1524_v49 = vld [vmem:[#allocation3 + $0xc1] sm:$0xff] }
 0x220   : > { %2552 = vrot.lane.b32.xlu1 %v1568_v35, %s3587_s12  ;;  %2014 = vrot.lane.b32.xlu0 %v1521_v44, %s3583_s20  ;;  %v2751_v44 = vsel %vm2731_vm7, %v2718_v52, %v5087_v36  ;;  %v1569_v36 = vld [vmem:[#allocation3 + $0x15a] sm:$0xff]  ;;  %v1570_v8 = vld [vmem:[#allocation3 + $0x16a] sm:$0xff] }
 0x221   : > { %v2784_v23 = vsel %vm2764_vm8, %v2751_v44, %v2287_v33  ;;  %v1490_v33 = vld [vmem:[#allocation3 + $0xa8] sm:$0xff]  ;;  %v2704_v44 = vsel %vm2698_vm6, %v4771_v29, %v4986_v24 }
 0x222   : > { %v2161_v21 = vpop.permute.xlu1 %2160  ;;  %v2511_v34 = vpop.permute.xlu0 %2510  ;;  %v2817_v43 = vsel %vm2797_vm9, %v2784_v23, %v2415_v41 }
 0x223   : > { %v2834_v25 = vsel %vm2830_vm10, %v2801_v15, %v2511_v34  ;;  %v2752_v51 = vsel %vm2731_vm7, %v2719_v57, %v2161_v21 }
 0x224   : > { %2046 = vrot.lane.b32.xlu1 %v1537_v59, %s3583_s20  ;;  %2140 = vrot.lane.b32.xlu0 %v1552_v14, %s3584_s22 }
 0x225   : > { %3408 = vmatmul.mubr.msk.f32.gmra.mrb[2].mxu0 %vm2875_vm11, %v2834_v25 }
 0x226   : > { %v2543_v12 = vpop.permute.xlu1 %2542  ;;  %v2131_v37 = vpop.permute.xlu0 %2130 }
 0x227   : > { %v2850_v45 = vsel %vm2830_vm10, %v2817_v43, %v2543_v12  ;;  %v2737_v23 = vsel %vm2731_vm7, %v2704_v44, %v2131_v37  ;;  %v1555_v37 = vld [vmem:[#allocation3 + $0xb2] sm:$0xff] }
 0x228   : > { %2172 = vrot.lane.b32.xlu1 %v1568_v35, %s3584_s22  ;;  %2522 = vrot.lane.b32.xlu0 %v1553_v48, %s3587_s12 }
 0x229   : > { %3432 = vmatmul.mubr.msk.f32.gmra.mrb[2].mxu1 %vm2875_vm11, %v2850_v45 }
 0x22a   : > { %v5171_v59 = vpop.permute.xlu1 %2162  ;;  %v2257_v14 = vpop.permute.xlu0 %2256 }
 0x22b   : > { %v2769_v60 = vsel %vm2764_vm8, %v2736_v30, %v2257_v14 }
 0x22c   : > { %2554 = vrot.lane.b32.xlu1 %v1569_v36, %s3587_s12  ;;  %2142 = vrot.lane.b32.xlu0 %v1553_v48, %s3584_s22 }
 0x22e   : > { %v2289_v41 = vpop.permute.xlu1 %2288  ;;  %v2259_v32 = vpop.permute.xlu0 %2258 }
 0x22f   : > { %v2785_v6 = vsel %vm2764_vm8, %v2752_v51, %v2289_v41  ;;  %v2770_v48 = vsel %vm2764_vm8, %v2737_v23, %v2259_v32  ;;  %v1525_v51 = vld [vmem:[#allocation3 + $0xc9] sm:$0xff] }
 0x230   : > { %2174 = vrot.lane.b32.xlu1 %v1569_v36, %s3584_s22  ;;  %2268 = vrot.lane.b32.xlu0 %v1490_v33, %s3585_s23  ;;  %v2720_v36 = vsel %vm2698_vm6, %v4887_v53, %v5140_v28  ;;  %v1571_v28 = vld [vmem:[#allocation3 + $0x172] sm:$0xff]  ;;  %v1556_v23 = vld [vmem:[#allocation3 + $0xc2] sm:$0xff] }
 0x231   : > { %v2753_v29 = vsel %vm2731_vm7, %v2720_v36, %v5171_v59 }
 0x232   : > { %v2291_v61 = vpop.permute.xlu1 %2290  ;;  %v2385_v31 = vpop.permute.xlu0 %2384 }
 0x233   : > { %v2802_v62 = vsel %vm2797_vm9, %v2769_v60, %v2385_v31  ;;  %v2786_v24 = vsel %vm2764_vm8, %v2753_v29, %v2291_v61 }
 0x234   : > { %2300 = vrot.lane.b32.xlu1 %v1506_v63, %s3585_s23  ;;  %2270 = vrot.lane.b32.xlu0 %v1491_v46, %s3585_s23  ;;  %v1492_v46 = vld [vmem:[#allocation3 + $0xc0] sm:$0xff] }
 0x236   : > { %v2417_v50 = vpop.permute.xlu1 %2416  ;;  %v5179_v27 = vpop.permute.xlu0 %2004 }
 0x237   : > { %v2818_v15 = vsel %vm2797_vm9, %v2785_v6, %v2417_v50 }
 0x238   : > { %2302 = vrot.lane.b32.xlu1 %v1507_v58, %s3585_s23  ;;  %2396 = vrot.lane.b32.xlu0 %v1522_v4, %s3586_s5  ;;  %v1508_v58 = vld [vmem:[#allocation3 + $0x180] sm:$0xff] }
 0x23a   : > { %v5183_v16 = vpop.permute.xlu1 %2036  ;;  %v2387_v35 = vpop.permute.xlu0 %2386 }
 0x23b   : > { %v2803_v43 = vsel %vm2797_vm9, %v2770_v48, %v2387_v35  ;;  %v1509_v35 = vld [vmem:[#allocation3 + $0x188] sm:$0xff] }
 0x23c   : > { %2428 = vrot.lane.b32.xlu1 %v1538_v17, %s3586_s5  ;;  %2016 = vrot.lane.b32.xlu0 %v1522_v4, %s3583_s20  ;;  %v1493_v4 = vld [vmem:[#allocation3 + $0xc8] sm:$0xff] }
 0x23e   : > { %v2419_v56 = vpop.permute.xlu1 %2418  ;;  %v2513_v47 = vpop.permute.xlu0 %2512 }
 0x23f   : > { %v2835_v5 = vsel %vm2830_vm10, %v2802_v62, %v2513_v47  ;;  %v2819_v33 = vsel %vm2797_vm9, %v2786_v24, %v2419_v56  ;;  %v2705_v47 = vsel %vm2698_vm6, %v4774_v11, %v5179_v27 }
 0x240   : > { %2048 = vrot.lane.b32.xlu1 %v1538_v17, %s3583_s20  ;;  %2398 = vrot.lane.b32.xlu0 %v1523_v20, %s3586_s5 }
 0x241   : > { %3410 = vmatprep.mubr.msk.f32.mxu0 %vm2875_vm11, %v2835_v5 }
 0x242   : > { %v2545_v34 = vpop.permute.xlu1 %2544  ;;  %v5203_v52 = vpop.permute.xlu0 %2006 }
 0x243   : > { %v2851_v54 = vsel %vm2830_vm10, %v2818_v15, %v2545_v34  ;;  %v2721_v15 = vsel %vm2698_vm6, %v4890_v9, %v5183_v16  ;;  %v1572_v16 = vld [vmem:[#allocation3 + $0x182] sm:$0xff] }
 0x244   : > { %2430 = vrot.lane.b32.xlu1 %v1539_v55, %s3586_s5  ;;  %2524 = vrot.lane.b32.xlu0 %v1554_v10, %s3587_s12 }
 0x245   : > { %3434 = vmatprep.mubr.msk.f32.mxu1 %vm2875_vm11, %v2851_v54  ;;  %v1541_v54 = vld [vmem:[#allocation3 + $0x189] sm:$0xff] }
 0x246   : > { %v5209_v21 = vpop.permute.xlu1 %2038  ;;  %v2133_v25 = vpop.permute.xlu0 %2132 }
 0x247   : > { %v2738_v57 = vsel %vm2731_vm7, %v2705_v47, %v2133_v25 }
 0x248   : > { %2556 = vrot.lane.b32.xlu1 %v1570_v8, %s3587_s12  ;;  %2018 = vrot.lane.b32.xlu0 %v1523_v20, %s3583_s20  ;;  %v1540_v20 = vld [vmem:[#allocation3 + $0x181] sm:$0xff] }
 0x24a   : > { %v2165_v12 = vpop.permute.xlu1 %2164  ;;  %v2515_v45 = vpop.permute.xlu0 %2514 }
 0x24b   : > { %v2836_v14 = vsel %vm2830_vm10, %v2803_v43, %v2515_v45  ;;  %v2754_v11 = vsel %vm2731_vm7, %v2721_v15, %v2165_v12  ;;  %v2706_v12 = vsel %vm2698_vm6, %v4791_v19, %v5203_v52 }
 0x24c   : > { %2050 = vrot.lane.b32.xlu1 %v1539_v55, %s3583_s20  ;;  %2144 = vrot.lane.b32.xlu0 %v1554_v10, %s3584_s22 }
 0x24d   : > { %3411 = vmatmul.mubr.msk.f32.gmra.mrb[4].mxu0 %vm2875_vm11, %v2836_v14 }
 0x24e   : > { %v2547_v41 = vpop.permute.xlu1 %2546  ;;  %v2135_v32 = vpop.permute.xlu0 %2134 }
 0x24f   : > { %v2852_v53 = vsel %vm2830_vm10, %v2819_v33, %v2547_v41  ;;  %v2739_v45 = vsel %vm2731_vm7, %v2706_v12, %v2135_v32 }
 0x250   : > { %2176 = vrot.lane.b32.xlu1 %v1570_v8, %s3584_s22  ;;  %2526 = vrot.lane.b32.xlu0 %v1555_v37, %s3587_s12 }
 0x251   : > { %3435 = vmatmul.mubr.msk.f32.gmra.mrb[4].mxu1 %vm2875_vm11, %v2852_v53 }
 0x252   : > { %v5234_v59 = vpop.permute.xlu1 %2166  ;;  %v2261_v63 = vpop.permute.xlu0 %2260 }
 0x253   : > { %v2771_v5 = vsel %vm2764_vm8, %v2738_v57, %v2261_v63 }
 0x254   : > { %2558 = vrot.lane.b32.xlu1 %v1571_v28, %s3587_s12  ;;  %2146 = vrot.lane.b32.xlu0 %v1555_v37, %s3584_s22  ;;  %v2722_v37 = vsel %vm2698_vm6, %v4907_v2, %v5209_v21  ;;  %v1573_v21 = vld [vmem:[#allocation3 + $0x18a] sm:$0xff] }
 0x255   : > { %v2755_v19 = vsel %vm2731_vm7, %v2722_v37, %v5234_v59 }
 0x256   : > { %v2293_v61 = vpop.permute.xlu1 %2292  ;;  %v2263_v31 = vpop.permute.xlu0 %2262 }
 0x257   : > { %v2787_v27 = vsel %vm2764_vm8, %v2754_v11, %v2293_v61  ;;  %v2772_v36 = vsel %vm2764_vm8, %v2739_v45, %v2263_v31  ;;  %v1494_v31 = vld [vmem:[#allocation3 + $0xd8] sm:$0xff] }
 0x258   : > { %2178 = vrot.lane.b32.xlu1 %v1571_v28, %s3584_s22  ;;  %2272 = vrot.lane.b32.xlu0 %v1492_v46, %s3585_s23  ;;  %v1557_v28 = vld [vmem:[#allocation3 + $0xca] sm:$0xff] }
 0x25a   : > { %v2295_v50 = vpop.permute.xlu1 %2294  ;;  %v2389_v17 = vpop.permute.xlu0 %2388 }
 0x25b   : > { %v2804_v6 = vsel %vm2797_vm9, %v2771_v5, %v2389_v17  ;;  %v2788_v52 = vsel %vm2764_vm8, %v2755_v19, %v2295_v50  ;;  %v1495_v17 = vld [vmem:[#allocation3 + $0xe0] sm:$0xff] }
 0x25c   : > { %2304 = vrot.lane.b32.xlu1 %v1508_v58, %s3585_s23  ;;  %2274 = vrot.lane.b32.xlu0 %v1493_v4, %s3585_s23  ;;  %v1510_v58 = vld [vmem:[#allocation3 + $0x198] sm:$0xff]  ;;  %v1527_v5 = vld [vmem:[#allocation3 + $0xe1] sm:$0xff] }
 0x25e   : > { %v2421_v30 = vpop.permute.xlu1 %2420  ;;  %v5242_v60 = vpop.permute.xlu0 %2008 }
 0x25f   : > { %v2820_v8 = vsel %vm2797_vm9, %v2787_v27, %v2421_v30  ;;  %v1558_v27 = vld [vmem:[#allocation3 + $0xda] sm:$0xff] }
 0x260   : > { %2306 = vrot.lane.b32.xlu1 %v1509_v35, %s3585_s23  ;;  %2400 = vrot.lane.b32.xlu0 %v1524_v49, %s3586_s5  ;;  %v1511_v35 = vld [vmem:[#allocation3 + $0x1a0] sm:$0xff] }
 0x262   : > { %v5246_v62 = vpop.permute.xlu1 %2040  ;;  %v2391_v56 = vpop.permute.xlu0 %2390 }
 0x263   : > { %v2805_v14 = vsel %vm2797_vm9, %v2772_v36, %v2391_v56  ;;  %v1542_v56 = vld [vmem:[#allocation3 + $0x199] sm:$0xff] }
 0x264   : > { %2432 = vrot.lane.b32.xlu1 %v1540_v20, %s3586_s5  ;;  %2020 = vrot.lane.b32.xlu0 %v1524_v49, %s3583_s20 }
 0x266   : > { %v2423_v55 = vpop.permute.xlu1 %2422  ;;  %v2517_v10 = vpop.permute.xlu0 %2516 }
 0x267   : > { %v2837_v34 = vsel %vm2830_vm10, %v2804_v6, %v2517_v10  ;;  %v2821_v41 = vsel %vm2797_vm9, %v2788_v52, %v2423_v55  ;;  %v1543_v10 = vld [vmem:[#allocation3 + $0x1a1] sm:$0xff] }
 0x268   : > { %2052 = vrot.lane.b32.xlu1 %v1540_v20, %s3583_s20  ;;  %2402 = vrot.lane.b32.xlu0 %v1525_v51, %s3586_s5  ;;  %v1526_v20 = vld [vmem:[#allocation3 + $0xd9] sm:$0xff] }
 0x269   : > { %3413 = vmatprep.mubr.msk.f32.mxu0 %vm2875_vm11, %v2837_v34 }
 0x26a   : > { %v2549_v25 = vpop.permute.xlu1 %2548  ;;  %v5266_v44 = vpop.permute.xlu0 %2010 }
 0x26b   : > { %v2853_v9 = vsel %vm2830_vm10, %v2820_v8, %v2549_v25  ;;  %v1574_v25 = vld [vmem:[#allocation3 + $0x19a] sm:$0xff]  ;;  %v2708_v36 = vsel %vm2698_vm6, %v4811_v40, %v5266_v44 }
 0x26c   : > { %2434 = vrot.lane.b32.xlu1 %v1541_v54, %s3586_s5  ;;  %3437 = vmatprep.mubr.msk.f32.mxu1 %vm2875_vm11, %v2853_v9 }
 0x26d   : > { %2528 = vrot.lane.b32.xlu0 %v1556_v23, %s3587_s12 }
 0x26e   : > { %v5272_v48 = vpop.permute.xlu1 %2042  ;;  %v2137_v43 = vpop.permute.xlu0 %2136 }
 0x26f   : > { %v2724_v19 = vsel %vm2698_vm6, %v4927_v13, %v5272_v48 }
 0x270   : > { %2560 = vrot.lane.b32.xlu1 %v1572_v16, %s3587_s12 }
 0x271   : > { %2022 = vrot.lane.b32.xlu0 %v1525_v51, %s3583_s20  ;;  %v2707_v51 = vsel %vm2698_vm6, %v4794_v39, %v5242_v60 }
 0x272   : > { %v2169_v29 = vpop.permute.xlu1 %2168  ;;  %v2519_v24 = vpop.permute.xlu0 %2518  ;;  %v2740_v6 = vsel %vm2731_vm7, %v2707_v51, %v2137_v43  ;;  %v1559_v43 = vld [vmem:[#allocation3 + $0xe2] sm:$0xff] }
 0x273   : > { %v2838_v33 = vsel %vm2830_vm10, %v2805_v14, %v2519_v24 }
 0x274   : > { %2054 = vrot.lane.b32.xlu1 %v1541_v54, %s3583_s20  ;;  %3414 = vmatmul.mubr.msk.f32.gmra.mrb[6].mxu0 %vm2875_vm11, %v2838_v33  ;;  %v2723_v54 = vsel %vm2698_vm6, %v4910_v38, %v5246_v62  ;;  %v1575_v62 = vld [vmem:[#allocation3 + $0x1a2] sm:$0xff]  ;;  %s3313_s20 = sshll.u32 %s188_s14, 8 }
 0x275   : > { %2148 = vrot.lane.b32.xlu0 %v1556_v23, %s3584_s22  ;;  %v2756_v60 = vsel %vm2731_vm7, %v2723_v54, %v2169_v29  ;;  %s5404_s27 = scalar_lea.vmem [#allocation4], %s3313_s20 }
 0x276   : > { %v2551_v32 = vpop.permute.xlu1 %2550  ;;  %v5293_v53 = vpop.permute.xlu0 %2138  ;;  %s3247_s29 = sshll.u32 %s5404_s27, 4  ;;  %s5537_s29 = int_to_ptr.vmem [resolvable:$true] %s3247_s29 }
 0x277   : > { %v2854_v2 = vsel %vm2830_vm10, %v2821_v41, %v2551_v32  ;;  %v2741_v14 = vsel %vm2731_vm7, %v2708_v36, %v5293_v53  ;;  %v5398_v36 = vld [vmem:[%s5588_s3] ss:$0 sm:$0xff]  ;;  %s3515_s7 = scalar_lea.vmem %s5537_s29, 4096  ;;  %p3522_p0 = scmp.lt.s32.totalorder %s5537_s29, %s3520_s9 }
 0x278   : > { %2180 = vrot.lane.b32.xlu1 %v1572_v16, %s3584_s22  ;;  %3438 = vmatmul.mubr.msk.f32.gmra.mrb[6].mxu1 %vm2875_vm11, %v2854_v2  ;;  %p3516_p11 = scmp.ne.s32.totalorder %s5537_s29, %s3515_s7  ;;  %p3523_p1 = scmp.lt.s32.totalorder %s3521_s10, %s3515_s7 }
 0x279   : > { %2530 = vrot.lane.b32.xlu0 %v1557_v28, %s3587_s12 }
 0x27a   : > { %v5299_v59 = vpop.permute.xlu1 %2170  ;;  %v2265_v63 = vpop.permute.xlu0 %2264  ;;  %p3517_p12 = pnand %p3516_p11, %p3653_p5  ;;  %p3524_p2 = por %p3523_p1, %p3522_p0 }
 0x27b   : > { %v2773_v55 = vsel %vm2764_vm8, %v2740_v6, %v2265_v63  ;;  %v2757_v40 = vsel %vm2731_vm7, %v2724_v19, %v5299_v59 }
 0x27c   : > { %2562 = vrot.lane.b32.xlu1 %v1573_v21, %s3587_s12  ;;  %p3518_p13 = pneg %p3517_p12 }
 0x27d   : > { %2150 = vrot.lane.b32.xlu0 %v1557_v28, %s3584_s22 }
 0x27e   : > { %v2297_v46 = vpop.permute.xlu1 %2296  ;;  %v2267_v61 = vpop.permute.xlu0 %2266  ;;  %p3525_p3 = pnand %p3524_p2, %p3518_p13 }
 0x27f   : > { %v2789_v8 = vsel %vm2764_vm8, %v2756_v60, %v2297_v46  ;;  %v2774_v29 = vsel %vm2764_vm8, %v2741_v14, %v2267_v61 }
 0x280   : > { %2182 = vrot.lane.b32.xlu1 %v1573_v21, %s3584_s22 }
 0x281   : > { %2276 = vrot.lane.b32.xlu0 %v1494_v31, %s3585_s23 }
 0x282   : > { %v2299_v4 = vpop.permute.xlu1 %2298  ;;  %v2393_v50 = vpop.permute.xlu0 %2392 }
 0x283   : > { %v2806_v15 = vsel %vm2797_vm9, %v2773_v55, %v2393_v50  ;;  %v2790_v44 = vsel %vm2764_vm8, %v2757_v40, %v2299_v4 }
 0x284   : > { %2308 = vrot.lane.b32.xlu1 %v1510_v58, %s3585_s23 }
 0x285   : > { %2278 = vrot.lane.b32.xlu0 %v1495_v17, %s3585_s23 }
 0x286   : > { %v2425_v49 = vpop.permute.xlu1 %2424  ;;  %v5307_v30 = vpop.permute.xlu0 %2012 }
 0x287   : > { %v2822_v23 = vsel %vm2797_vm9, %v2789_v8, %v2425_v49  ;;  %v2709_v4 = vsel %vm2698_vm6, %v4814_v42, %v5307_v30 }
 0x288   : > { %2310 = vrot.lane.b32.xlu1 %v1511_v35, %s3585_s23 }
 0x289   : > { %2404 = vrot.lane.b32.xlu0 %v1526_v20, %s3586_s5 }
 0x28a   : > { %v5311_v47 = vpop.permute.xlu1 %2044  ;;  %v2395_v57 = vpop.permute.xlu0 %2394 }
 0x28b   : > { %v2807_v24 = vsel %vm2797_vm9, %v2774_v29, %v2395_v57 }
 0x28c   : > { %2436 = vrot.lane.b32.xlu1 %v1542_v56, %s3586_s5  ;;  %v2725_v56 = vsel %vm2698_vm6, %v4930_v0, %v5311_v47 }
 0x28d   : > { %2406 = vrot.lane.b32.xlu0 %v1527_v5, %s3586_s5 }
 0x28e   : > { %v2427_v34 = vpop.permute.xlu1 %2426  ;;  %v2521_v11 = vpop.permute.xlu0 %2520 }
 0x28f   : > { %v2839_v39 = vsel %vm2830_vm10, %v2806_v15, %v2521_v11  ;;  %v2823_v41 = vsel %vm2797_vm9, %v2790_v44, %v2427_v34 }
 0x290   : > { %2438 = vrot.lane.b32.xlu1 %v1543_v10, %s3586_s5  ;;  %3416 = vmatprep.mubr.msk.f32.mxu0 %vm2875_vm11, %v2839_v39 }
 0x291   : > { %2532 = vrot.lane.b32.xlu0 %v1558_v27, %s3587_s12 }
 0x292   : > { %v2553_v9 = vpop.permute.xlu1 %2552  ;;  %v2015_v16 = vpop.permute.xlu0 %2014 }
 0x293   : > { %v2855_v38 = vsel %vm2830_vm10, %v2822_v23, %v2553_v9  ;;  %v2710_v47 = vsel %vm2698_vm6, %v4824_v3, %v2015_v16 }
 0x294   : > { %2564 = vrot.lane.b32.xlu1 %v1574_v25, %s3587_s12  ;;  %3440 = vmatprep.mubr.msk.f32.mxu1 %vm2875_vm11, %v2855_v38 }
 0x295   : > { %2534 = vrot.lane.b32.xlu0 %v1559_v43, %s3587_s12 }
 0x296   : > { %v2047_v12 = vpop.permute.xlu1 %2046  ;;  %v2141_v45 = vpop.permute.xlu0 %2140 }
 0x297   : > { %v2742_v50 = vsel %vm2731_vm7, %v2709_v4, %v2141_v45  ;;  %v2726_v39 = vsel %vm2698_vm6, %v4946_v18, %v2047_v12 }
 0x298   : > { %2566 = vrot.lane.b32.xlu1 %v1575_v62, %s3587_s12 }
 0x29a   : > { %v2173_v37 = vpop.permute.xlu1 %2172  ;;  %v2523_v33 = vpop.permute.xlu0 %2522 }
 0x29b   : > { %v2840_v52 = vsel %vm2830_vm10, %v2807_v24, %v2523_v33  ;;  %v2758_v5 = vsel %vm2731_vm7, %v2725_v56, %v2173_v37 }
 0x29c   : > { %3417 = vmatmul.mubr.msk.f32.gmra.mrb[8].mxu0 %vm2875_vm11, %v2840_v52 }
 0x29e   : > { %v2555_v32 = vpop.permute.xlu1 %2554  ;;  %v2143_v53 = vpop.permute.xlu0 %2142 }
 0x29f   : > { %v2856_v28 = vsel %vm2830_vm10, %v2823_v41, %v2555_v32  ;;  %v2743_v15 = vsel %vm2731_vm7, %v2710_v47, %v2143_v53 }
 0x2a0   : > { %3441 = vmatmul.mubr.msk.f32.gmra.mrb[8].mxu1 %vm2875_vm11, %v2856_v28 }
 0x2a2   : > { %v2175_v2 = vpop.permute.xlu1 %2174  ;;  %v2269_v21 = vpop.permute.xlu0 %2268 }
 0x2a3   : > { %v2775_v17 = vsel %vm2764_vm8, %v2742_v50, %v2269_v21  ;;  %v2759_v8 = vsel %vm2731_vm7, %v2726_v39, %v2175_v2 }
 0x2a6   : > { %v2301_v13 = vpop.permute.xlu1 %2300  ;;  %v2271_v48 = vpop.permute.xlu0 %2270 }
 0x2a7   : > { %v2791_v42 = vsel %vm2764_vm8, %v2758_v5, %v2301_v13  ;;  %v2776_v34 = vsel %vm2764_vm8, %v2743_v15, %v2271_v48 }
 0x2aa   : > { %v2303_v63 = vpop.permute.xlu1 %2302  ;;  %v2397_v46 = vpop.permute.xlu0 %2396 }
 0x2ab   : > { %v2808_v35 = vsel %vm2797_vm9, %v2775_v17, %v2397_v46  ;;  %v2792_v3 = vsel %vm2764_vm8, %v2759_v8, %v2303_v63 }
 0x2ae   : > { %v2429_v61 = vpop.permute.xlu1 %2428  ;;  %v5354_v59 = vpop.permute.xlu0 %2016 }
 0x2af   : > { %v2824_v30 = vsel %vm2797_vm9, %v2791_v42, %v2429_v61  ;;  %v2711_v28 = vsel %vm2698_vm6, %v4828_v7, %v5354_v59 }
 0x2b2   : > { %v5356_v31 = vpop.permute.xlu1 %2048  ;;  %v2399_v58 = vpop.permute.xlu0 %2398 }
 0x2b3   : > { %v2809_v11 = vsel %vm2797_vm9, %v2776_v34, %v2399_v58  ;;  %v2727_v48 = vsel %vm2698_vm6, %v4949_v22, %v5356_v31 }
 0x2b6   : > { %v2431_v49 = vpop.permute.xlu1 %2430  ;;  %v2525_v20 = vpop.permute.xlu0 %2524 }
 0x2b7   : > { %v2841_v57 = vsel %vm2830_vm10, %v2808_v35, %v2525_v20  ;;  %v2825_v25 = vsel %vm2797_vm9, %v2792_v3, %v2431_v49 }
 0x2b8   : > { %3419 = vmatprep.mubr.msk.f32.mxu0 %vm2875_vm11, %v2841_v57 }
 0x2ba   : > { %v2557_v51 = vpop.permute.xlu1 %2556  ;;  %v5372_v6 = vpop.permute.xlu0 %2018 }
 0x2bb   : > { %v2857_v55 = vsel %vm2830_vm10, %v2824_v30, %v2557_v51  ;;  %v2712_v35 = vsel %vm2698_vm6, %v4835_v26, %v5372_v6 }
 0x2bc   : > { %3443 = vmatprep.mubr.msk.f32.mxu1 %vm2875_vm11, %v2857_v55 }
 0x2be   : > { %v5376_v10 = vpop.permute.xlu1 %2050  ;;  %v2145_v0 = vpop.permute.xlu0 %2144 }
 0x2bf   : > { %v2744_v2 = vsel %vm2731_vm7, %v2711_v28, %v2145_v0  ;;  %v2728_v57 = vsel %vm2698_vm6, %v4959_v1, %v5376_v10 }
 0x2c2   : > { %v2177_v27 = vpop.permute.xlu1 %2176  ;;  %v2527_v54 = vpop.permute.xlu0 %2526 }
 0x2c3   : > { %v2842_v60 = vsel %vm2830_vm10, %v2809_v11, %v2527_v54  ;;  %v2760_v61 = vsel %vm2731_vm7, %v2727_v48, %v2177_v27 }
 0x2c4   : > { %3420 = vmatmul.mubr.msk.f32.gmra.mrb[10].mxu0 %vm2875_vm11, %v2842_v60 }
 0x2c6   : > { %v2559_v23 = vpop.permute.xlu1 %2558  ;;  %v2147_v9 = vpop.permute.xlu0 %2146 }
 0x2c7   : > { %v2858_v16 = vsel %vm2830_vm10, %v2825_v25, %v2559_v23  ;;  %v2745_v49 = vsel %vm2731_vm7, %v2712_v35, %v2147_v9 }
 0x2c8   : > { %3444 = vmatmul.mubr.msk.f32.gmra.mrb[10].mxu1 %vm2875_vm11, %v2858_v16 }
 0x2ca   : > { %v2179_v43 = vpop.permute.xlu1 %2178  ;;  %v2273_v38 = vpop.permute.xlu0 %2272 }
 0x2cb   : > { %v2777_v21 = vsel %vm2764_vm8, %v2744_v2, %v2273_v38  ;;  %v2761_v30 = vsel %vm2731_vm7, %v2728_v57, %v2179_v43  ;;  %v5697_v38 = vld [vmem:[#allocation46_spill] sm:$0xff]  ;;  %v5700_v2 = vld [vmem:[#allocation20_spill] sm:$0xff] }
 0x2ce   : > { %v2305_v62 = vpop.permute.xlu1 %2304  ;;  %v2275_v18 = vpop.permute.xlu0 %2274 }
 0x2cf   : > { %v2793_v4 = vsel %vm2764_vm8, %v2760_v61, %v2305_v62  ;;  %v2778_v20 = vsel %vm2764_vm8, %v2745_v49, %v2275_v18 }
 0x2d2   : > { %v2307_v12 = vpop.permute.xlu1 %2306  ;;  %v2401_v45 = vpop.permute.xlu0 %2400 }
 0x2d3   : > { %v2810_v63 = vsel %vm2797_vm9, %v2777_v21, %v2401_v45  ;;  %v2794_v55 = vsel %vm2764_vm8, %v2761_v30, %v2307_v12 }
 0x2d4   : > { %v3406_v14 = vpop.f32.mrb[0].mxu0 }
 0x2d5   : > { %v3048_v29 = vadd.f32 %v3406_v14, %v5398_v36  ;;  %v3042_v24 = vpop.f32.mrb[1].mxu0  ;;  %v5698_v14 = vld [vmem:[#allocation11_spill] sm:$0xff] }
 0x2d6   : > { %v3043_v37 = vadd.f32 %v5398_v36, %v3042_v24  ;;  %v2433_v33 = vpop.permute.xlu1 %2432  ;;  %v5402_v19 = vpop.permute.xlu0 %2020 }
 0x2d7   : > { %3202 = vst [vmem:[%s5404_s27 + $0x8] sm:$0xff] %v3048_v29  ;;  %v2826_v7 = vsel %vm2797_vm9, %v2793_v4, %v2433_v33  ;;  %v2713_v62 = vsel %vm2698_vm6, %v5697_v38, %v5402_v19  ;;  %v5699_v33 = vld [vmem:[#allocation47_spill] sm:$0xff] }
 0x2d8   : > { %3201 = vst [vmem:[%s5404_s27] sm:$0xff] %v3043_v37  ;;  %v3430_v52 = vpop.f32.mrb[0].mxu1 }
 0x2d9   : > { %v3128_v40 = vadd.f32 %v3430_v52, %v5398_v36  ;;  %v3122_v44 = vpop.f32.mrb[1].mxu1 }
 0x2da   : > { %v3123_v41 = vadd.f32 %v5398_v36, %v3122_v44  ;;  %v5410_v32 = vpop.permute.xlu1 %2052  ;;  %v2403_v53 = vpop.permute.xlu0 %2402 }
 0x2db   : > { %3218 = vst [vmem:[%s5404_s27 + $0x88] sm:$0xff] %v3128_v40  ;;  %v2811_v5 = vsel %vm2797_vm9, %v2778_v20, %v2403_v53  ;;  %v2729_v29 = vsel %vm2698_vm6, %v5698_v14, %v5410_v32 }
 0x2dc   : > { %3217 = vst [vmem:[%s5404_s27 + $0x80] sm:$0xff] %v3123_v41 }
 0x2de   : > { %v2435_v13 = vpop.permute.xlu1 %2434 }
 0x2df   : > { %v2529_v46 = vpop.permute.xlu0 %2528  ;;  %v2827_v26 = vsel %vm2797_vm9, %v2794_v55, %v2435_v13 }
 0x2e0   : > { %v2843_v58 = vsel %vm2830_vm10, %v2810_v63, %v2529_v46 }
 0x2e1   : > { %3422 = vmatprep.mubr.msk.f32.mxu0 %vm2875_vm11, %v2843_v58 }
 0x2e2   : > { %v2561_v59 = vpop.permute.xlu1 %2560 }
 0x2e3   : > { %v2859_v50 = vsel %vm2830_vm10, %v2826_v7, %v2561_v59  ;;  %v2023_v17 = vpop.permute.xlu0 %2022 }
 0x2e4   : > { %3446 = vmatprep.mubr.msk.f32.mxu1 %vm2875_vm11, %v2859_v50  ;;  %v2714_v52 = vsel %vm2698_vm6, %v5699_v33, %v2023_v17 }
 0x2e6   : > { %v2055_v22 = vpop.permute.xlu1 %2054 }
 0x2e7   : > { %v2149_v31 = vpop.permute.xlu0 %2148  ;;  %v2730_v21 = vsel %vm2698_vm6, %v5700_v2, %v2055_v22 }
 0x2e8   : > { %v2746_v18 = vsel %vm2731_vm7, %v2713_v62, %v2149_v31 }
 0x2ea   : > { %v2181_v56 = vpop.permute.xlu1 %2180 }
 0x2eb   : > { %v2531_v42 = vpop.permute.xlu0 %2530  ;;  %v2762_v40 = vsel %vm2731_vm7, %v2729_v29, %v2181_v56 }
 0x2ec   : > { %v2844_v51 = vsel %vm2830_vm10, %v2811_v5, %v2531_v42 }
 0x2ed   : > { %3423 = vmatmul.mubr.msk.f32.gmra.mrb[12].mxu0 %vm2875_vm11, %v2844_v51 }
 0x2ee   : > { %v2563_v6 = vpop.permute.xlu1 %2562 }
 0x2ef   : > { %v2860_v0 = vsel %vm2830_vm10, %v2827_v26, %v2563_v6  ;;  %v2151_v47 = vpop.permute.xlu0 %2150 }
 0x2f0   : > { %3447 = vmatmul.mubr.msk.f32.gmra.mrb[12].mxu1 %vm2875_vm11, %v2860_v0  ;;  %v2747_v44 = vsel %vm2731_vm7, %v2714_v52, %v2151_v47 }
 0x2f2   : > { %v2183_v1 = vpop.permute.xlu1 %2182 }
 0x2f3   : > { %v2277_v10 = vpop.permute.xlu0 %2276  ;;  %v2763_v46 = vsel %vm2731_vm7, %v2730_v21, %v2183_v1 }
 0x2f4   : > { %v2779_v12 = vsel %vm2764_vm8, %v2746_v18, %v2277_v10 }
 0x2f6   : > { %v2309_v15 = vpop.permute.xlu1 %2308 }
 0x2f7   : > { %v2279_v34 = vpop.permute.xlu0 %2278  ;;  %v2795_v41 = vsel %vm2764_vm8, %v2762_v40, %v2309_v15 }
 0x2f8   : > { %v3409_v11 = vpop.f32.mrb[2].mxu0  ;;  %v2780_v53 = vsel %vm2764_vm8, %v2747_v44, %v2279_v34 }
 0x2f9   : > { %v3058_v27 = vadd.f32 %v3409_v11, %v5398_v36  ;;  %v3052_v54 = vpop.f32.mrb[3].mxu0 }
 0x2fa   : > { %v3053_v39 = vadd.f32 %v5398_v36, %v3052_v54  ;;  %v2311_v60 = vpop.permute.xlu1 %2310 }
 0x2fb   : > { %3204 = vst [vmem:[%s5404_s27 + $0x18] sm:$0xff] %v3058_v27  ;;  %v2405_v8 = vpop.permute.xlu0 %2404  ;;  %v2796_v58 = vsel %vm2764_vm8, %v2763_v46, %v2311_v60 }
 0x2fc   : > { %3203 = vst [vmem:[%s5404_s27 + $0x10] sm:$0xff] %v3053_v39  ;;  %v3433_v3 = vpop.f32.mrb[2].mxu1  ;;  %v2812_v24 = vsel %vm2797_vm9, %v2779_v12, %v2405_v8 }
 0x2fd   : > { %v3138_v25 = vadd.f32 %v3433_v3, %v5398_v36  ;;  %v3132_v23 = vpop.f32.mrb[3].mxu1 }
 0x2fe   : > { %v3133_v9 = vadd.f32 %v5398_v36, %v3132_v23  ;;  %v2437_v16 = vpop.permute.xlu1 %2436 }
 0x2ff   : > { %3220 = vst [vmem:[%s5404_s27 + $0x98] sm:$0xff] %v3138_v25  ;;  %v2407_v43 = vpop.permute.xlu0 %2406  ;;  %v2828_v32 = vsel %vm2797_vm9, %v2795_v41, %v2437_v16 }
 0x300   : > { %3219 = vst [vmem:[%s5404_s27 + $0x90] sm:$0xff] %v3133_v9  ;;  %v2813_v13 = vsel %vm2797_vm9, %v2780_v53, %v2407_v43 }
 0x302   : > { %v2439_v45 = vpop.permute.xlu1 %2438 }
 0x303   : > { %v2533_v37 = vpop.permute.xlu0 %2532  ;;  %v2829_v4 = vsel %vm2797_vm9, %v2796_v58, %v2439_v45 }
 0x304   : > { %v2845_v19 = vsel %vm2830_vm10, %v2812_v24, %v2533_v37 }
 0x305   : > { %3425 = vmatprep.mubr.msk.f32.mxu0 %vm2875_vm11, %v2845_v19 }
 0x306   : > { %v2565_v28 = vpop.permute.xlu1 %2564 }
 0x307   : > { %v2861_v48 = vsel %vm2830_vm10, %v2828_v32, %v2565_v28  ;;  %v2535_v63 = vpop.permute.xlu0 %2534 }
 0x308   : > { %v2846_v61 = vsel %vm2830_vm10, %v2813_v13, %v2535_v63  ;;  %3449 = vmatprep.mubr.msk.f32.mxu1 %vm2875_vm11, %v2861_v48 }
 0x309   : > { %3426 = vmatmul.mubr.msk.f32.gmra.mrb[14].mxu0 %vm2875_vm11, %v2846_v61 }
 0x30a   : > { %v2567_v7 = vpop.permute.xlu1 %2566 }
 0x30b   : > { %v2862_v59 = vsel %vm2830_vm10, %v2829_v4, %v2567_v7 }
 0x30c   : > { %3450 = vmatmul.mubr.msk.f32.gmra.mrb[14].mxu1 %vm2875_vm11, %v2862_v59 }
 0x320   : > { %v3412_v50 = vpop.f32.mrb[4].mxu0 }
 0x321   : > { %v3068_v17 = vadd.f32 %v3412_v50, %v5398_v36  ;;  %v3062_v22 = vpop.f32.mrb[5].mxu0 }
 0x322   : > { %v3063_v31 = vadd.f32 %v5398_v36, %v3062_v22 }
 0x323   : > { %3206 = vst [vmem:[%s5404_s27 + $0x28] sm:$0xff] %v3068_v17 }
 0x324   : > { %3205 = vst [vmem:[%s5404_s27 + $0x20] sm:$0xff] %v3063_v31  ;;  %v3436_v35 = vpop.f32.mrb[4].mxu1 }
 0x325   : > { %v3148_v49 = vadd.f32 %v3436_v35, %v5398_v36  ;;  %v3142_v20 = vpop.f32.mrb[5].mxu1 }
 0x326   : > { %v3143_v56 = vadd.f32 %v5398_v36, %v3142_v20 }
 0x327   : > { %3222 = vst [vmem:[%s5404_s27 + $0xa8] sm:$0xff] %v3148_v49 }
 0x328   : > { %3221 = vst [vmem:[%s5404_s27 + $0xa0] sm:$0xff] %v3143_v56 }
 0x347   : > { %v3415_v57 = vpop.f32.mrb[6].mxu0 }
 0x348   : > { %v3078_v5 = vadd.f32 %v3415_v57, %v5398_v36  ;;  %v3072_v42 = vpop.f32.mrb[7].mxu0 }
 0x349   : > { %v3073_v30 = vadd.f32 %v5398_v36, %v3072_v42 }
 0x34a   : > { %3208 = vst [vmem:[%s5404_s27 + $0x38] sm:$0xff] %v3078_v5 }
 0x34b   : > { %3207 = vst [vmem:[%s5404_s27 + $0x30] sm:$0xff] %v3073_v30  ;;  %v3439_v51 = vpop.f32.mrb[6].mxu1 }
 0x34c   : > { %v3158_v55 = vadd.f32 %v3439_v51, %v5398_v36  ;;  %v3152_v26 = vpop.f32.mrb[7].mxu1 }
 0x34d   : > { %v3153_v6 = vadd.f32 %v5398_v36, %v3152_v26 }
 0x34e   : > { %3224 = vst [vmem:[%s5404_s27 + $0xb8] sm:$0xff] %v3158_v55 }
 0x34f   : > { %3223 = vst [vmem:[%s5404_s27 + $0xb0] sm:$0xff] %v3153_v6 }
 0x36f   : > { %v3418_v0 = vpop.f32.mrb[8].mxu0 }
 0x370   : > { %v3088_v47 = vadd.f32 %v3418_v0, %v5398_v36  ;;  %v3082_v1 = vpop.f32.mrb[9].mxu0 }
 0x371   : > { %v3083_v10 = vadd.f32 %v5398_v36, %v3082_v1 }
 0x372   : > { %3210 = vst [vmem:[%s5404_s27 + $0x48] sm:$0xff] %v3088_v47 }
 0x373   : > { %3209 = vst [vmem:[%s5404_s27 + $0x40] sm:$0xff] %v3083_v10  ;;  %v3442_v15 = vpop.f32.mrb[8].mxu1 }
 0x374   : > { %v3168_v34 = vadd.f32 %v3442_v15, %v5398_v36  ;;  %v3162_v11 = vpop.f32.mrb[9].mxu1 }
 0x375   : > { %v3163_v27 = vadd.f32 %v5398_v36, %v3162_v11 }
 0x376   : > { %3226 = vst [vmem:[%s5404_s27 + $0xc8] sm:$0xff] %v3168_v34 }
 0x377   : > { %3225 = vst [vmem:[%s5404_s27 + $0xc0] sm:$0xff] %v3163_v27 }
 0x397   : > { %v3421_v54 = vpop.f32.mrb[10].mxu0 }
 0x398   : > { %v3098_v39 = vadd.f32 %v3421_v54, %v5398_v36  ;;  %v3092_v60 = vpop.f32.mrb[11].mxu0 }
 0x399   : > { %v3093_v8 = vadd.f32 %v5398_v36, %v3092_v60 }
 0x39a   : > { %3212 = vst [vmem:[%s5404_s27 + $0x58] sm:$0xff] %v3098_v39 }
 0x39b   : > { %3211 = vst [vmem:[%s5404_s27 + $0x50] sm:$0xff] %v3093_v8  ;;  %v3445_v3 = vpop.f32.mrb[10].mxu1 }
 0x39c   : > { %v3178_v25 = vadd.f32 %v3445_v3, %v5398_v36  ;;  %v3172_v23 = vpop.f32.mrb[11].mxu1 }
 0x39d   : > { %v3173_v9 = vadd.f32 %v5398_v36, %v3172_v23 }
 0x39e   : > { %3228 = vst [vmem:[%s5404_s27 + $0xd8] sm:$0xff] %v3178_v25 }
 0x39f   : > { %3227 = vst [vmem:[%s5404_s27 + $0xd0] sm:$0xff] %v3173_v9 }
 0x3c0   : > { %v3424_v16 = vpop.f32.mrb[12].mxu0 }
 0x3c1   : > { %v3108_v43 = vadd.f32 %v3424_v16, %v5398_v36  ;;  %v3102_v38 = vpop.f32.mrb[13].mxu0 }
 0x3c2   : > { %v3103_v62 = vadd.f32 %v5398_v36, %v3102_v38 }
 0x3c3   : > { %3214 = vst [vmem:[%s5404_s27 + $0x68] sm:$0xff] %v3108_v43  ;;  %v3448_v18 = vpop.f32.mrb[12].mxu1 }
 0x3c4   : > { %3213 = vst [vmem:[%s5404_s27 + $0x60] sm:$0xff] %v3103_v62  ;;  %v3188_v12 = vadd.f32 %v3448_v18, %v5398_v36  ;;  %v3182_v45 = vpop.f32.mrb[13].mxu1 }
 0x3c5   : > { %v3183_v14 = vadd.f32 %v5398_v36, %v3182_v45 }
 0x3c6   : > { %3230 = vst [vmem:[%s5404_s27 + $0xe8] sm:$0xff] %v3188_v12 }
 0x3c7   : > { %3229 = vst [vmem:[%s5404_s27 + $0xe0] sm:$0xff] %v3183_v14 }
 0x3dc   : > { %v3427_v29 = vpop.f32.mrb[14].mxu0 }
 0x3dd   : > { %v3118_v24 = vadd.f32 %v3427_v29, %v5398_v36  ;;  %v3112_v37 = vpop.f32.mrb[15].mxu0 }
 0x3de   : > { %v3113_v33 = vadd.f32 %v5398_v36, %v3112_v37 }
 0x3df   : > { %3216 = vst [vmem:[%s5404_s27 + $0x78] sm:$0xff] %v3118_v24  ;;  %v3451_v52 = vpop.f32.mrb[14].mxu1 }
 0x3e0   : > { %3215 = vst [vmem:[%s5404_s27 + $0x70] sm:$0xff] %v3113_v33  ;;  %v3198_v40 = vadd.f32 %v3451_v52, %v5398_v36  ;;  %v3192_v19 = vpop.f32.mrb[15].mxu1 }
 0x3e1   : > { %v3193_v44 = vadd.f32 %v5398_v36, %v3192_v19 }
 0x3e2   : > { %3232 = vst [vmem:[%s5404_s27 + $0xf8] sm:$0xff] %v3198_v40 }
 0x3e3   : > { %3231 = vst [vmem:[%s5404_s27 + $0xf0] sm:$0xff] %v3193_v44 }
 0x3e4   : > { %3528 = shalt.err (!%p3525_p3)
}
 0x3e5   : > { %s3529_s11 = scalar_lea.hbm %s5534_s6, 4096  ;;  %s3533_s20 = scalar_lea.hbm %s5589_s4, 8192 }
 0x3e6   : > { %p3530_p4 = scmp.ne.s32.totalorder %s5534_s6, %s3529_s11  ;;  %p3534_p9 = scmp.lt.u32.totalorder %s5534_s6, %s5589_s4 }
 0x3e7   : > { %p3535_p10 = scmp.lt.u32.totalorder %s3533_s20, %s3529_s11  ;;  %p3537_p12 = scmp.lt.u32.totalorder %s3529_s11, %s5534_s6 }
 0x3e8   : > { %p3531_p7 = pnand %p3530_p4, %p3653_p5 }
 0x3e9   : > { %p3536_p11 = por %p3535_p10, %p3534_p9 }
 0x3ea   : > { %p3532_p8 = pneg %p3531_p7 }
 0x3eb   : > { %p3538_p13 = por %p3537_p12, %p3536_p11 }
 0x3ed   : > { %p3539_p0 = pnand %p3538_p13, %p3532_p8 }
 0x3ef   : > { %3542 = shalt.err (!%p3539_p0)
}
 0x3f0   : > { %s3589_s27 = smov 128  }
 0x3f1   : > { %3466 = dma.vmem_to_hbm [thread:$0]  (%p3653_p5), %s5537_s29, 4096, %s5534_s6, %s5543_s19, %s3589_s27, %s3589_s27, %s3581_s13  }
 0x3f2 PF: > { %p3472_p1 = scmp.ge.s32.totalorder %s3577_s18, 2  ;;  %s3262_s28 = sand.u32 1, %s3565_s15  }
 0x3f3   : > { %s3263_s30 = scalar_lea.sflag [#allocation5], %s3262_s28 }
 0x3f4   : > { %p3469_p2 = pnand %p3472_p1, %p3657_p6 }
 0x3f6   : > { %3560 = dma.done.wait (!%p3469_p2), %s3263_s30, 4096  }
 0x3f7   : > { %3562 = vsyncadd (!%p3469_p2), %s3263_s30, 4294963200  ;;  %p14_p3 = scmp.ge.s32.totalorder %s3640_s21, 4   ;;  %s5701_s15 = smov %s3569_s16 }
 0x3f8   : > { %s5702_s16 = smov %s3573_s17  ;;  %s5703_s17 = smov %s3651_s24 }
 0x3f9   : > { %s5704_s18 = smov %s3640_s21  ;;  %16 = sbr.rel (!%p14_p3) target bundleno = 3 (0x3), region = 77 }
 0x400   :  { %3268 = vsyncpa [#allocation5], 1 }
 0x401   :  { %3270 = vsyncpa [#allocation5 + $0x1], 1 }

</bundles_post_ra>
